<compile_context>
chip_gen: v7x
topology: tpu7x:2x2x1
jax: 0.10.0
libtpu: 0.0.40
codegen_flags: <defaults>
</compile_context>

<pallas_src>
import jax
import jax.numpy as jnp
from jax.experimental import pallas as pl
from jax.experimental.pallas import tpu as pltpu

LANE = 128
ROW_PAD = 512          # pad N to a multiple of 512 (perf review)


def _round_up(x, m):
    return ((x + m - 1) // m) * m


def _pad2d(x, rows, cols):
    if x.shape == (rows, cols):
        return x
    return jnp.zeros((rows, cols), x.dtype).at[: x.shape[0], : x.shape[1]].set(x)


def _vmem_budget_bytes():
    """~75% of physical VMEM: 48 MiB on v7x (64 MiB phys), 96 MiB on v5e/v6e."""
    cap = 64 * 1024 * 1024
    try:
        cap = int(getattr(pltpu.get_tpu_info(), "vmem_capacity_bytes", cap)) or cap
    except Exception:
        pass
    return (cap // 4) * 3


def _row_tile(n_pad, row_bytes, budget, max_tile=512):
    """Largest row tile (power of two <= max_tile, divides n_pad) whose slab fits
    `budget`; keeps >= 2 row tiles so the 'parallel' axis can shard across both
    v7x TensorCores (harmless no-op on v5e/v6e)."""
    tm = min(max_tile, n_pad)
    while tm > 8 and (n_pad % tm != 0 or tm * row_bytes > budget):
        tm //= 2
    if n_pad // tm < 2 and tm > 8:
        tm //= 2
    return tm


# ---------------------------------------------------------------------------
# 1) prep: f32 A -> bf16 A + norm = rsqrt(clamp(in_degree, 1)), one HBM pass
# ---------------------------------------------------------------------------
def prep_kernel(a_ref, a16_ref, norm_ref):
    a = a_ref[...]                                          # (tm, N) f32 row slab
    a16_ref[...] = a.astype(jnp.bfloat16)                   # 0/1 entries: exact
    deg = jnp.sum(a, axis=1, keepdims=True)                 # in-degree (row sum)
    norm_ref[...] = jax.lax.rsqrt(jnp.maximum(deg, 1.0))    # clamp(min=1) ** -0.5


def gcn_prep(a_pad, budget):
    n_pad = a_pad.shape[0]
    # f32 input slab + bf16 output slab, each double-buffered
    tm = _row_tile(n_pad, row_bytes=n_pad * (4 + 2) * 2, budget=(budget * 3) // 5)
    return pl.pallas_call(
        prep_kernel,
        out_shape=(
            jax.ShapeDtypeStruct((n_pad, n_pad), jnp.bfloat16),
            jax.ShapeDtypeStruct((n_pad, 1), jnp.float32),
        ),
        grid=(n_pad // tm,),
        in_specs=[pl.BlockSpec((tm, n_pad), lambda i: (i, 0))],
        out_specs=[
            pl.BlockSpec((tm, n_pad), lambda i: (i, 0)),
            pl.BlockSpec((tm, 1), lambda i: (i, 0)),
        ],
        compiler_params=pltpu.CompilerParams(
            dimension_semantics=("parallel",),
            vmem_limit_bytes=budget,
        ),
    )(a_pad)


# ---------------------------------------------------------------------------
# 2) project: M = (X_bf16 @ W_bf16) * norm  (f32 accumulate, bf16 output)
# ---------------------------------------------------------------------------
def project_kernel(x_ref, w_ref, norm_ref, m_ref):
    h = jnp.dot(x_ref[...].astype(jnp.bfloat16), w_ref[...],
                preferred_element_type=jnp.float32)
    m_ref[...] = (h * norm_ref[...]).astype(m_ref.dtype)


def gcn_project(x_pad, w16, norm, budget):
    n_pad, f_in = x_pad.shape
    f_out = w16.shape[1]
    tm = min(256, n_pad)
    return pl.pallas_call(
        project_kernel,
        out_shape=jax.ShapeDtypeStruct((n_pad, f_out), jnp.bfloat16),
        grid=(n_pad // tm,),
        in_specs=[
            pl.BlockSpec((tm, f_in), lambda i: (i, 0)),
            pl.BlockSpec((f_in, f_out), lambda i: (0, 0)),     # W resident
            pl.BlockSpec((tm, 1), lambda i: (i, 0)),
        ],
        out_specs=pl.BlockSpec((tm, f_out), lambda i: (i, 0)),
        compiler_params=pltpu.CompilerParams(
            dimension_semantics=("parallel",),
            vmem_limit_bytes=budget,
        ),
    )(x_pad, w16, norm)


# ---------------------------------------------------------------------------
# 3) aggregate: relu(A @ M) — M resident in VMEM, A streamed as row slabs
# ---------------------------------------------------------------------------
def aggregate_kernel(a_ref, m_ref, o_ref):
    acc = jnp.dot(a_ref[...], m_ref[...], preferred_element_type=jnp.float32)
    o_ref[...] = jnp.maximum(acc, 0.0).astype(o_ref.dtype)


def gcn_aggregate(a16, m16, out_dtype, budget):
    n_pad, f_out = m16.shape
    resident = 2 * n_pad * f_out * 2                     # VMEM-resident M (2 bufs)
    # bf16 A row slab (double-buffered) + f32-acc/output tile (2 bufs)
    row_bytes = n_pad * 2 * 2 + f_out * (4 + 4) * 2
    tm = _row_tile(n_pad, row_bytes, budget=((budget - resident) * 3) // 5)
    return pl.pallas_call(
        aggregate_kernel,
        out_shape=jax.ShapeDtypeStruct((n_pad, f_out), out_dtype),
        grid=(n_pad // tm,),
        in_specs=[
            pl.BlockSpec((tm, n_pad), lambda i: (i, 0)),       # A row slab, streamed
            pl.BlockSpec((n_pad, f_out), lambda i: (0, 0)),    # M resident, 1 fetch
        ],
        out_specs=pl.BlockSpec((tm, f_out), lambda i: (i, 0)),
        compiler_params=pltpu.CompilerParams(
            dimension_semantics=("parallel",),
            vmem_limit_bytes=budget,
        ),
    )(a16, m16)


# ---------------------------------------------------------------------------
# Fused both-layers kernel (A resident in VMEM, read from HBM once)
# ---------------------------------------------------------------------------
def fused_kernel(a_ref, x_ref, w1_ref, w2_ref, o_ref):
    a = a_ref[...]                                              # (N, N) f32
    a16 = a.astype(jnp.bfloat16)                                # 0/1 exact in bf16
    norm = jax.lax.rsqrt(jnp.maximum(jnp.sum(a, axis=1, keepdims=True), 1.0))
    # layer 1: relu(A @ ((X W1) * norm))
    h = jnp.dot(x_ref[...].astype(jnp.bfloat16), w1_ref[...],
                preferred_element_type=jnp.float32)
    m = (h * norm).astype(jnp.bfloat16)
    h1 = jnp.maximum(jnp.dot(a16, m, preferred_element_type=jnp.float32), 0.0)
    # layer 2: relu(A @ ((H1 W2) * norm))
    h = jnp.dot(h1.astype(jnp.bfloat16), w2_ref[...],
                preferred_element_type=jnp.float32)
    m = (h * norm).astype(jnp.bfloat16)
    o_ref[...] = jnp.maximum(jnp.dot(a16, m, preferred_element_type=jnp.float32), 0.0)


def gcn_fused(a_pad, x_pad, w1_16, w2_16, budget):
    n_pad, f_in = x_pad.shape
    f_hid = w1_16.shape[1]
    f_out = w2_16.shape[1]
    return pl.pallas_call(
        fused_kernel,
        out_shape=jax.ShapeDtypeStruct((n_pad, f_out), jnp.float32),
        grid=(1,),
        in_specs=[
            pl.BlockSpec((n_pad, n_pad), lambda i: (0, 0)),    # A resident
            pl.BlockSpec((n_pad, f_in), lambda i: (0, 0)),
            pl.BlockSpec((f_in, f_hid), lambda i: (0, 0)),
            pl.BlockSpec((f_hid, f_out), lambda i: (0, 0)),
        ],
        out_specs=pl.BlockSpec((n_pad, f_out), lambda i: (0, 0)),
        compiler_params=pltpu.CompilerParams(
            dimension_semantics=("arbitrary",),
            vmem_limit_bytes=budget,
        ),
    )(a_pad, x_pad, w1_16, w2_16)


# ---------------------------------------------------------------------------
# Full GCN.forward
# ---------------------------------------------------------------------------
def gcn_forward(a, features, w1, w2, *, force_tiled=False):
    n = a.shape[0]
    out_cols = w2.shape[1]

    n_pad = _round_up(n, ROW_PAD)
    f_in_pad = _round_up(features.shape[1], LANE)
    f_hid_pad = _round_up(w1.shape[1], LANE)        # layer2 mm requires w2 rows == w1 cols
    f_out_pad = _round_up(w2.shape[1], LANE)

    # Zero padding is inert: padded nodes have degree 0 -> norm 1 and zero
    # features/edges, so real-node outputs are unchanged.
    a_pad = _pad2d(a, n_pad, n_pad)
    x_pad = _pad2d(features, n_pad, f_in_pad)
    w1_16 = _pad2d(w1, f_in_pad, f_hid_pad).astype(jnp.bfloat16)
    w2_16 = _pad2d(w2, f_hid_pad, f_out_pad).astype(jnp.bfloat16)

    budget = _vmem_budget_bytes()

    # Rough VMEM need of the fused (A-resident) path: f32 A input (x2 buffers) +
    # loaded f32 value + bf16 copy + small feature-side terms.
    fused_need = n_pad * n_pad * 14 + n_pad * (f_in_pad + 3 * f_hid_pad) * 8

    if (not force_tiled) and fused_need <= budget:
        out = gcn_fused(a_pad, x_pad, w1_16, w2_16, budget)
    else:
        a16, norm = gcn_prep(a_pad, budget)
        m1 = gcn_project(x_pad, w1_16, norm, budget)
        h1 = gcn_aggregate(a16, m1, jnp.bfloat16, budget)   # layer-1 output in bf16
        m2 = gcn_project(h1, w2_16, norm, budget)
        out = gcn_aggregate(a16, m2, jnp.float32, budget)
    # TODO(synk): on v7x, a per-core A row-slab residency with an H1 exchange via
    # CMEM would extend the fused (single-HBM-read) path beyond full-A-in-VMEM sizes.
    return out[:n, :out_cols]


def gcn_reference(a, features, w1, w2):
    """Pure-JAX f32 reference for correctness checking."""
    deg = jnp.maximum(jnp.sum(a, axis=1, keepdims=True), 1.0)
    norm = deg ** -0.5
    h = jnp.maximum(a @ ((features @ w1) * norm), 0.0)
    h = jnp.maximum(a @ ((h @ w2) * norm), 0.0)
    return h


if __name__ == "__main__":
    # GCN(in_dim, hidden_dim, out_dim); layer2 weight is (out_dim, hidden_dim), so
    # the forward only type-checks when hidden_dim == out_dim (as in the module).
    N, in_dim, hidden_dim, out_dim = 16, 8, 32, 32

    key = jax.random.PRNGKey(0)
    k_feat, k_adj, k_w1, k_w2 = jax.random.split(key, 4)

    features = jax.random.normal(k_feat, (N, in_dim), dtype=jnp.float32)
    # deterministic random directed graph: A[dst, src] = 1.0 with prob 0.3
    a = (jax.random.uniform(k_adj, (N, N)) < 0.3).astype(jnp.float32)
    # GCNLayer.__init__: weight = torch.rand(in_dim, out_dim) -> uniform [0, 1)
    w1 = jax.random.uniform(k_w1, (in_dim, hidden_dim), dtype=jnp.float32)
    w2 = jax.random.uniform(k_w2, (out_dim, hidden_dim), dtype=jnp.float32)

    gcn = jax.jit(gcn_forward, static_argnames=("force_tiled",))
    ref = gcn_reference(a, features, w1, w2)

    # Fused (A-resident) path — the one a small graph takes.
    out_fused = jax.block_until_ready(gcn(a, features, w1, w2))
    assert out_fused.shape == (N, hidden_dim), out_fused.shape
    err_f = float(jnp.max(jnp.abs(out_fused - ref)))
    assert jnp.allclose(out_fused, ref, atol=2e-2, rtol=2e-2), f"fused max abs err {err_f}"

    # Tiled path — exercised explicitly so the large-graph code is validated too.
    out_tiled = jax.block_until_ready(gcn(a, features, w1, w2, force_tiled=True))
    assert out_tiled.shape == (N, hidden_dim), out_tiled.shape
    err_t = float(jnp.max(jnp.abs(out_tiled - ref)))
    assert jnp.allclose(out_tiled, ref, atol=2e-2, rtol=2e-2), f"tiled max abs err {err_t}"

    print("KERNEL_OK")
</pallas_src>

<mosaic_0001>
module attributes {stable_mosaic.version = 11 : i64} {
  func.func @fused_kernel(%arg0: i32, %arg1: memref<512x512xf32, #tpu.memory_space<vmem>>, %arg2: memref<512x128xf32, #tpu.memory_space<vmem>>, %arg3: memref<128x128xbf16, #tpu.memory_space<vmem>>, %arg4: memref<128x128xbf16, #tpu.memory_space<vmem>>, %arg5: memref<512x128xf32, #tpu.memory_space<vmem>>) attributes {dimension_semantics = [#tpu.dimension_semantics<arbitrary>], iteration_bounds = array<i64: 1>, scalar_prefetch = 0 : i64, scratch_operands = 0 : i64, tpu.core_type = #tpu.core_type<tc>, window_params = [{pipeline_mode = #tpu.pipeline_mode<synchronous>, transform_indices = @transform_0, window_bounds = array<i64: 512, 512>}, {pipeline_mode = #tpu.pipeline_mode<synchronous>, transform_indices = @transform_1, window_bounds = array<i64: 512, 128>}, {pipeline_mode = #tpu.pipeline_mode<synchronous>, transform_indices = @transform_2, window_bounds = array<i64: 128, 128>}, {pipeline_mode = #tpu.pipeline_mode<synchronous>, transform_indices = @transform_3, window_bounds = array<i64: 128, 128>}, {pipeline_mode = #tpu.pipeline_mode<synchronous>, transform_indices = @transform_4, window_bounds = array<i64: 512, 128>}]} {
    %c0 = arith.constant 0 : index
    %c0_0 = arith.constant 0 : index
    %0 = vector.load %arg1[%c0, %c0_0] : memref<512x512xf32, #tpu.memory_space<vmem>>, vector<512x512xf32>
    %1 = arith.truncf %0 : vector<512x512xf32> to vector<512x512xbf16>
    %cst = arith.constant dense<0.000000e+00> : vector<512xf32>
    %2 = vector.multi_reduction <add>, %0, %cst [1] : vector<512x512xf32> to vector<512xf32>
    %3 = vector.shape_cast %2 : vector<512xf32> to vector<512x1xf32>
    %cst_1 = arith.constant 1.000000e+00 : f32
    %4 = vector.broadcast %cst_1 : f32 to vector<512x1xf32>
    %5 = arith.maximumf %3, %4 : vector<512x1xf32>
    %6 = math.rsqrt %5 : vector<512x1xf32>
    %c0_2 = arith.constant 0 : index
    %c0_3 = arith.constant 0 : index
    %7 = vector.load %arg2[%c0_2, %c0_3] : memref<512x128xf32, #tpu.memory_space<vmem>>, vector<512x128xf32>
    %8 = arith.truncf %7 : vector<512x128xf32> to vector<512x128xbf16>
    %c0_4 = arith.constant 0 : index
    %c0_5 = arith.constant 0 : index
    %9 = vector.load %arg3[%c0_4, %c0_5] : memref<128x128xbf16, #tpu.memory_space<vmem>>, vector<128x128xbf16>
    %cst_6 = arith.constant dense<0.000000e+00> : vector<512x128xf32>
    %10 = tpu.matmul %8, %9, %cst_6 {dimension_numbers = #tpu.dot_dimension_numbers<[1], [0], [0], [1], [0, 0, 1, 1], [], []>} : vector<512x128xbf16>, vector<128x128xbf16>, vector<512x128xf32> -> vector<512x128xf32>
    %11 = vector.broadcast %6 : vector<512x1xf32> to vector<512x128xf32>
    %12 = arith.mulf %10, %11 : vector<512x128xf32>
    %13 = arith.truncf %12 : vector<512x128xf32> to vector<512x128xbf16>
    %cst_7 = arith.constant dense<0.000000e+00> : vector<512x128xf32>
    %14 = tpu.matmul %1, %13, %cst_7 {dimension_numbers = #tpu.dot_dimension_numbers<[1], [0], [0], [1], [0, 0, 1, 1], [], []>} : vector<512x512xbf16>, vector<512x128xbf16>, vector<512x128xf32> -> vector<512x128xf32>
    %cst_8 = arith.constant 0.000000e+00 : f32
    %15 = vector.broadcast %cst_8 : f32 to vector<512x128xf32>
    %16 = arith.maximumf %14, %15 : vector<512x128xf32>
    %17 = arith.truncf %16 : vector<512x128xf32> to vector<512x128xbf16>
    %c0_9 = arith.constant 0 : index
    %c0_10 = arith.constant 0 : index
    %18 = vector.load %arg4[%c0_9, %c0_10] : memref<128x128xbf16, #tpu.memory_space<vmem>>, vector<128x128xbf16>
    %cst_11 = arith.constant dense<0.000000e+00> : vector<512x128xf32>
    %19 = tpu.matmul %17, %18, %cst_11 {dimension_numbers = #tpu.dot_dimension_numbers<[1], [0], [0], [1], [0, 0, 1, 1], [], []>} : vector<512x128xbf16>, vector<128x128xbf16>, vector<512x128xf32> -> vector<512x128xf32>
    %20 = vector.broadcast %6 : vector<512x1xf32> to vector<512x128xf32>
    %21 = arith.mulf %19, %20 : vector<512x128xf32>
    %22 = arith.truncf %21 : vector<512x128xf32> to vector<512x128xbf16>
    %cst_12 = arith.constant dense<0.000000e+00> : vector<512x128xf32>
    %23 = tpu.matmul %1, %22, %cst_12 {dimension_numbers = #tpu.dot_dimension_numbers<[1], [0], [0], [1], [0, 0, 1, 1], [], []>} : vector<512x512xbf16>, vector<512x128xbf16>, vector<512x128xf32> -> vector<512x128xf32>
    %cst_13 = arith.constant 0.000000e+00 : f32
    %24 = vector.broadcast %cst_13 : f32 to vector<512x128xf32>
    %25 = arith.maximumf %23, %24 : vector<512x128xf32>
    %c0_14 = arith.constant 0 : index
    %c0_15 = arith.constant 0 : index
    %26 = vector.load %arg5[%c0_14, %c0_15] : memref<512x128xf32, #tpu.memory_space<vmem>>, vector<512x128xf32>
    tpu.vector_store %arg5[%c0_14, %c0_15], %25 {strides = array<i32>} : memref<512x128xf32, #tpu.memory_space<vmem>>, vector<512x128xf32>,
    return
  }
  func.func @transform_0(%arg0: i32) -> (i32, i32) {
    %c0_i32 = arith.constant 0 : i32
    %c0_i32_0 = arith.constant 0 : i32
    %c0_i32_1 = arith.constant 0 : i32
    return %c0_i32, %c0_i32_0 : i32, i32
  }
  func.func @transform_1(%arg0: i32) -> (i32, i32) {
    %c0_i32 = arith.constant 0 : i32
    %c0_i32_0 = arith.constant 0 : i32
    %c0_i32_1 = arith.constant 0 : i32
    return %c0_i32, %c0_i32_0 : i32, i32
  }
  func.func @transform_2(%arg0: i32) -> (i32, i32) {
    %c0_i32 = arith.constant 0 : i32
    %c0_i32_0 = arith.constant 0 : i32
    %c0_i32_1 = arith.constant 0 : i32
    return %c0_i32, %c0_i32_0 : i32, i32
  }
  func.func @transform_3(%arg0: i32) -> (i32, i32) {
    %c0_i32 = arith.constant 0 : i32
    %c0_i32_0 = arith.constant 0 : i32
    %c0_i32_1 = arith.constant 0 : i32
    return %c0_i32, %c0_i32_0 : i32, i32
  }
  func.func @transform_4(%arg0: i32) -> (i32, i32) {
    %c0_i32 = arith.constant 0 : i32
    %c0_i32_0 = arith.constant 0 : i32
    %c0_i32_1 = arith.constant 0 : i32
    return %c0_i32, %c0_i32_0 : i32, i32
  }
}

</mosaic_0001>

<bundles_post_ra>
// kernel: gcn_forward.1
= control target key start
LH: loop header
LB: loop body
LE: loop exit
PB: predicated region body
PF: predicated region fallthrough
CT: control target
= control target key end

     0   :  { %s6928_s2 = inlined_call_operand.vmem [shape: bf16[128,128], index: 2, kind: input, shape index: {}]   ;;  %s6929_s1 = inlined_call_operand.vmem [shape: f32[512,128], index: 1, kind: input, shape index: {}]   ;;  %s6930_s0 = inlined_call_operand.vmem [shape: f32[512,512], index: 0, kind: input, shape index: {}]   ;;  %s6931_s3 = inlined_call_operand.vmem [shape: bf16[128,128], index: 3, kind: input, shape index: {}]   ;;  %s6932_s4 = inlined_call_operand.vmem [shape: f32[512,128], index: 4, kind: output, shape index: {}]  }
   0x1   :  { %v3741_v0 = vld [vmem:[%s6928_s2] sm:$0xff]   ;;  %v3742_v1 = vld [vmem:[%s6928_s2 + $0x8] sm:$0xff]   ;;  %v3743_v2 = vld [vmem:[%s6928_s2 + $0x10] sm:$0xff]  }
   0x2   :  { %3324 = vmatprep.subr.bf16.mxu1 %v3741_v0  ;;  %v3744_v3 = vld [vmem:[%s6928_s2 + $0x18] sm:$0xff]   ;;  %v850_v4 = vld [vmem:[%s6929_s1] sm:$0xff]  ;;  %v851_v5 = vld [vmem:[%s6929_s1 + $0x8] sm:$0xff] }
   0x3   :  { %3325 = vmatpush3.bf16.msra.mxu1 %v3741_v0  ;;  %v914_v6 = vpack.c.bf16 %v851_v5, %v850_v4  ;;  %v3745_v7 = vld [vmem:[%s6928_s2 + $0x20] sm:$0xff]   ;;  %v3746_v8 = vld [vmem:[%s6928_s2 + $0x28] sm:$0xff]   ;;  %v28_v11 = vld [vmem:[%s6930_s0 + $0x50] sm:$0xff] }
   0x4   :  { %3326 = vmatprep.subr.bf16.mxu1 %v3742_v1  ;;  %v26_v9 = vld [vmem:[%s6930_s0 + $0x40] sm:$0xff]  ;;  %v27_v10 = vld [vmem:[%s6930_s0 + $0x48] sm:$0xff]  ;;  %v29_v12 = vld [vmem:[%s6930_s0 + $0x58] sm:$0xff] }
   0x5   :  { %3340 = vmatprep.mubr.bf16.mxu1 %v914_v6  ;;  %v33_v13 = vld [vmem:[%s6930_s0 + $0x78] sm:$0xff]  ;;  %v412_v14 = vadd.f32 %v27_v10, %v26_v9  ;;  %v3747_v15 = vld [vmem:[%s6928_s2 + $0x30] sm:$0xff]   ;;  %v18_v17 = vld [vmem:[%s6930_s0] sm:$0xff] }
   0x6   :  { %v4140_v16 = vpack.c.bf16 %v33_v13, %v29_v12  ;;  %v19_v18 = vld [vmem:[%s6930_s0 + $0x8] sm:$0xff]  ;;  %v20_v20 = vld [vmem:[%s6930_s0 + $0x10] sm:$0xff]  ;;  %v21_v21 = vld [vmem:[%s6930_s0 + $0x18] sm:$0xff] }
   0x7   :  { %3327 = vmatpush3.bf16.msra.mxu1 %v3742_v1  ;;  %v413_v19 = vadd.f32 %v412_v14, %v28_v11  ;;  %v22_v22 = vld [vmem:[%s6930_s0 + $0x20] sm:$0xff]  ;;  %v402_v23 = vadd.f32 %v19_v18, %v18_v17  ;;  %v3748_v24 = vld [vmem:[%s6928_s2 + $0x38] sm:$0xff]   ;;  %v24_v25 = vld [vmem:[%s6930_s0 + $0x30] sm:$0xff] }
   0x8   :  { %3328 = vmatprep.subr.bf16.mxu1 %v3743_v2  ;;  %7086 = vst [vmem:[#allocation2_spill] sm:$0xff] %v4140_v16  ;;  %v25_v26 = vld [vmem:[%s6930_s0 + $0x38] sm:$0xff]  ;;  %v4166_v27 = vpack.c.bf16 %v22_v22, %v18_v17  ;;  %v30_v28 = vld [vmem:[%s6930_s0 + $0x60] sm:$0xff]  ;;  %v4171_v30 = vpack.c.bf16 %v24_v25, %v20_v20  ;;  %v31_v33 = vld [vmem:[%s6930_s0 + $0x68] sm:$0xff] }
   0x9   :  { %v414_v29 = vadd.f32 %v413_v19, %v29_v12  ;;  %v4173_v31 = vpack.c.bf16 %v25_v26, %v21_v21  ;;  %v403_v32 = vadd.f32 %v402_v23, %v20_v20  ;;  %v32_v34 = vld [vmem:[%s6930_s0 + $0x70] sm:$0xff]  ;;  %v4184_v35 = vld [vmem:[%s6930_s0 + $0x28] sm:$0xff]  ;;  %v4194_v37 = vld [vmem:[%s6929_s1 + $0x18] sm:$0xff]  ;;  %v417_v38 = vadd.f32 %v31_v33, %v30_v28 }
   0xa   :  { %v4189_v36 = vld [vmem:[%s6929_s1 + $0x10] sm:$0xff]  ;;  %v407_v39 = vadd.f32 %v4184_v35, %v22_v22  ;;  %v38_v40 = vld [vmem:[%s6930_s0 + $0xa0] sm:$0xff]  ;;  %v39_v41 = vld [vmem:[%s6930_s0 + $0xa8] sm:$0xff] }
   0xb   :  { %3329 = vmatpush3.bf16.msra.mxu1 %v3743_v2  ;;  %v40_v42 = vld [vmem:[%s6930_s0 + $0xb0] sm:$0xff]  ;;  %415 = vadd.xlane.f32.xlu1 %v414_v29  ;;  %v404_v43 = vadd.f32 %v403_v32, %v21_v21  ;;  %v41_v44 = vld [vmem:[%s6930_s0 + $0xb8] sm:$0xff]  ;;  %v427_v45 = vadd.f32 %v39_v41, %v38_v40  ;;  %v34_v46 = vld [vmem:[%s6930_s0 + $0x80] sm:$0xff]  ;;  %v418_v50 = vadd.f32 %v417_v38, %v32_v34 }
   0xc   :  { %3330 = vmatprep.subr.bf16.mxu1 %v3744_v3  ;;  %v35_v47 = vld [vmem:[%s6930_s0 + $0x88] sm:$0xff]  ;;  %v854_v48 = vld [vmem:[%s6929_s1 + $0x20] sm:$0xff]  ;;  %v408_v51 = vadd.f32 %v407_v39, %v24_v25  ;;  %v36_v52 = vld [vmem:[%s6930_s0 + $0x90] sm:$0xff]  ;;  %v915_v4 = vpack.c.bf16 %v4194_v37, %v4189_v36 }
   0xd   :  { %v855_v49 = vld [vmem:[%s6929_s1 + $0x28] sm:$0xff]  ;;  %v37_v53 = vld [vmem:[%s6930_s0 + $0x98] sm:$0xff]  ;;  %v422_v54 = vadd.f32 %v35_v47, %v34_v46  ;;  %v46_v55 = vld [vmem:[%s6930_s0 + $0xe0] sm:$0xff]  ;;  %405 = vadd.xlane.f32.xlu0 %v404_v43  ;;  %v428_v56 = vadd.f32 %v427_v45, %v40_v42  ;;  %v419_v61 = vadd.f32 %v418_v50, %v33_v13 }
   0xe   :  { %v4230_v57 = vpack.c.bf16 %v41_v44, %v37_v53  ;;  %v47_v58 = vld [vmem:[%s6930_s0 + $0xe8] sm:$0xff]  ;;  %v48_v59 = vld [vmem:[%s6930_s0 + $0xf0] sm:$0xff]  ;;  %v49_v60 = vld [vmem:[%s6930_s0 + $0xf8] sm:$0xff]  ;;  %v409_v62 = vadd.f32 %v408_v51, %v25_v26 }
   0xf   :  { %3331 = vmatpush3.bf16.msra.mxu1 %v3744_v3  ;;  %v423_v63 = vadd.f32 %v422_v54, %v36_v52  ;;  %v437_v0 = vadd.f32 %v47_v58, %v46_v55  ;;  %v42_v1 = vld [vmem:[%s6930_s0 + $0xc0] sm:$0xff]  ;;  %v43_v2 = vld [vmem:[%s6930_s0 + $0xc8] sm:$0xff]  ;;  %v44_v3 = vld [vmem:[%s6930_s0 + $0xd0] sm:$0xff]  ;;  %420 = vadd.xlane.f32.xlu1 %v419_v61  ;;  %v429_v9 = vadd.f32 %v428_v56, %v41_v44 }
  0x10   :  { %3332 = vmatprep.subr.bf16.mxu1 %v3745_v7  ;;  %7087 = vst [vmem:[#allocation3_spill] sm:$0xff] %v4230_v57  ;;  %v45_v5 = vld [vmem:[%s6930_s0 + $0xd8] sm:$0xff]  ;;  %v432_v6 = vadd.f32 %v43_v2, %v42_v1  ;;  %v56_v12 = vld [vmem:[%s6930_s0 + $0x130] sm:$0xff]  ;;  %v50_v14 = vld [vmem:[%s6930_s0 + $0x100] sm:$0xff] }
  0x11   :  { %v438_v10 = vadd.f32 %v437_v0, %v48_v59  ;;  %v4261_v11 = vpack.c.bf16 %v49_v60, %v45_v5  ;;  %410 = vadd.xlane.f32.xlu0 %v409_v62  ;;  %v424_v17 = vadd.f32 %v423_v63, %v37_v53  ;;  %v57_v19 = vld [vmem:[%s6930_s0 + $0x138] sm:$0xff]  ;;  %v51_v20 = vld [vmem:[%s6930_s0 + $0x108] sm:$0xff]  ;;  %v856_v22 = vld [vmem:[%s6929_s1 + $0x30] sm:$0xff] }
  0x12   :  { %v433_v18 = vadd.f32 %v432_v6, %v44_v3  ;;  %v53_v21 = vld [vmem:[%s6930_s0 + $0x118] sm:$0xff]  ;;  %v52_v23 = vld [vmem:[%s6930_s0 + $0x110] sm:$0xff]  ;;  %v442_v25 = vadd.f32 %v51_v20, %v50_v14  ;;  %v62_v26 = vld [vmem:[%s6930_s0 + $0x160] sm:$0xff] }
  0x13   :  { %3333 = vmatpush3.bf16.msra.mxu1 %v3745_v7  ;;  %v54_v7 = vld [vmem:[%s6930_s0 + $0x120] sm:$0xff]  ;;  %7088 = vst [vmem:[#allocation4_spill] sm:$0xff] %v4261_v11  ;;  %v63_v28 = vld [vmem:[%s6930_s0 + $0x168] sm:$0xff]  ;;  %v857_v29 = vld [vmem:[%s6929_s1 + $0x38] sm:$0xff]  ;;  %v439_v32 = vadd.f32 %v438_v10, %v49_v60  ;;  %430 = vadd.xlane.f32.xlu1 %v429_v9 }
  0x14   :  { %3334 = vmatprep.subr.bf16.mxu1 %v3746_v8  ;;  %v58_v33 = vld [vmem:[%s6930_s0 + $0x140] sm:$0xff]  ;;  %v59_v34 = vld [vmem:[%s6930_s0 + $0x148] sm:$0xff]  ;;  %v434_v38 = vadd.f32 %v433_v18, %v45_v5  ;;  %v65_v40 = vld [vmem:[%s6930_s0 + $0x178] sm:$0xff]  ;;  %v457_v41 = vadd.f32 %v63_v28, %v62_v26  ;;  %v443_v43 = vadd.f32 %v442_v25, %v52_v23  ;;  %v917_v52 = vpack.c.bf16 %v857_v29, %v856_v22 }
  0x15   :  { %v858_v36 = vld [vmem:[%s6929_s1 + $0x40] sm:$0xff]  ;;  %v859_v37 = vld [vmem:[%s6929_s1 + $0x48] sm:$0xff]  ;;  %v61_v42 = vld [vmem:[%s6930_s0 + $0x158] sm:$0xff]  ;;  %425 = vadd.xlane.f32.xlu0 %v424_v17  ;;  %v452_v46 = vadd.f32 %v59_v34, %v58_v33 }
  0x16   :  { %v64_v44 = vld [vmem:[%s6930_s0 + $0x170] sm:$0xff]  ;;  %v4316_v45 = vpack.c.bf16 %v65_v40, %v61_v42  ;;  %v70_v47 = vld [vmem:[%s6930_s0 + $0x1a0] sm:$0xff]  ;;  %v67_v51 = vld [vmem:[%s6930_s0 + $0x188] sm:$0xff]  ;;  %v918_v0 = vpack.c.bf16 %v859_v37, %v858_v36  ;;  %v444_v1 = vadd.f32 %v443_v43, %v53_v21 }
  0x17   :  { %3335 = vmatpush3.bf16.msra.mxu1 %v3746_v8  ;;  %v55_v8 = vld [vmem:[%s6930_s0 + $0x128] sm:$0xff]  ;;  %v66_v50 = vld [vmem:[%s6930_s0 + $0x180] sm:$0xff]  ;;  %v72_v53 = vld [vmem:[%s6930_s0 + $0x1b0] sm:$0xff]  ;;  %440 = vadd.xlane.f32.xlu1 %v439_v32  ;;  %v458_v58 = vadd.f32 %v457_v41, %v64_v44 }
  0x18   :  { %3336 = vmatprep.subr.bf16.mxu1 %v3747_v15  ;;  %v447_v13 = vadd.f32 %v55_v8, %v54_v7  ;;  %7090 = vst [vmem:[#allocation6_spill] sm:$0xff] %v4316_v45  ;;  %v73_v54 = vld [vmem:[%s6930_s0 + $0x1b8] sm:$0xff]  ;;  %v78_v61 = vld [vmem:[%s6930_s0 + $0x1e0] sm:$0xff]  ;;  %v79_v62 = vld [vmem:[%s6930_s0 + $0x1e8] sm:$0xff]  ;;  %v462_v3 = vadd.f32 %v67_v51, %v66_v50 }
  0x19   :  { %v69_v55 = vld [vmem:[%s6930_s0 + $0x198] sm:$0xff]  ;;  %435 = vadd.xlane.f32.xlu0 %v434_v38  ;;  %v75_v5 = vld [vmem:[%s6930_s0 + $0x1c8] sm:$0xff]  ;;  %v68_v7 = vld [vmem:[%s6930_s0 + $0x190] sm:$0xff]  ;;  %v459_v14 = vadd.f32 %v458_v58, %v65_v40 }
  0x1a   :  { %v448_v39 = vadd.f32 %v447_v13, %v56_v12  ;;  %v4342_v60 = vpack.c.bf16 %v73_v54, %v69_v55  ;;  %v81_v63 = vld [vmem:[%s6930_s0 + $0x1f8] sm:$0xff]  ;;  %v860_v9 = vld [vmem:[%s6929_s1 + $0x50] sm:$0xff]  ;;  %v477_v12 = vadd.f32 %v79_v62, %v78_v61  ;;  %v862_v13 = vld [vmem:[%s6929_s1 + $0x60] sm:$0xff]  ;;  %v463_v22 = vadd.f32 %v462_v3, %v68_v7 }
  0x1b   :  { %3337 = vmatpush3.bf16.msra.mxu1 %v3747_v15  ;;  %v916_v15 = vpack.c.bf16 %v855_v49, %v854_v48  ;;  %v71_v48 = vld [vmem:[%s6930_s0 + $0x1a8] sm:$0xff]  ;;  %v60_v49 = vld [vmem:[%s6930_s0 + $0x150] sm:$0xff]  ;;  %v77_v6 = vld [vmem:[%s6930_s0 + $0x1d8] sm:$0xff] }
  0x1c   :  { %3338 = vmatprep.subr.bf16.mxu1 %v3748_v24  ;;  %v449_v56 = vadd.f32 %v448_v39, %v57_v19  ;;  %v467_v59 = vadd.f32 %v71_v48, %v70_v47  ;;  %7091 = vst [vmem:[#allocation7_spill] sm:$0xff] %v4342_v60  ;;  %v453_v2 = vadd.f32 %v452_v46, %v60_v49  ;;  %v861_v10 = vld [vmem:[%s6929_s1 + $0x58] sm:$0xff]  ;;  %v80_v17 = vld [vmem:[%s6930_s0 + $0x1f0] sm:$0xff]  ;;  %v86_v25 = vld [vmem:[%s6930_s0 + $0x220] sm:$0xff] }
  0x1d   :  { %v4365_v8 = vpack.c.bf16 %v81_v63, %v77_v6  ;;  %v4387_v20 = vld [vmem:[%s6930_s0 + $0x218] sm:$0xff]  ;;  %445 = vadd.xlane.f32.xlu0 %v444_v1  ;;  %v76_v23 = vld [vmem:[%s6930_s0 + $0x1d0] sm:$0xff]  ;;  %v87_v26 = vld [vmem:[%s6930_s0 + $0x228] sm:$0xff]  ;;  %v919_v34 = vpack.c.bf16 %v861_v10, %v860_v9  ;;  %v478_v36 = vadd.f32 %v477_v12, %v80_v17  ;;  %v464_v47 = vadd.f32 %v463_v22, %v69_v55 }
  0x1e   :  { %450 = vadd.xlane.f32.xlu1 %v449_v56  ;;  %v863_v29 = vld [vmem:[%s6929_s1 + $0x68] sm:$0xff]  ;;  %v82_v32 = vld [vmem:[%s6930_s0 + $0x200] sm:$0xff]  ;;  %v4414_v37 = vld [vmem:[%s6930_s0 + $0x278] sm:$0xff] }
  0x1f   :  { %3339 = vmatpush3.bf16.msra.mxu1 %v3748_v24  ;;  %v4284_v24 = vpack.c.bf16 %v57_v19, %v53_v21  ;;  %7092 = vst [vmem:[#allocation8_spill] sm:$0xff] %v4365_v8  ;;  %v4382_v19 = vld [vmem:[%s6930_s0 + $0x238] sm:$0xff]  ;;  %v454_v21 = vadd.f32 %v453_v2, %v61_v42  ;;  %v83_v33 = vld [vmem:[%s6930_s0 + $0x208] sm:$0xff]  ;;  %v88_v41 = vld [vmem:[%s6930_s0 + $0x230] sm:$0xff]  ;;  %v487_v42 = vadd.f32 %v87_v26, %v86_v25 }
  0x20   :  { %v4400_v28 = vpack.c.bf16 %v4382_v19, %v4387_v20  ;;  %v4419_v38 = vld [vmem:[%s6930_s0 + $0x258] sm:$0xff]  ;;  %v94_v43 = vld [vmem:[%s6930_s0 + $0x260] sm:$0xff]  ;;  %v920_v46 = vpack.c.bf16 %v863_v29, %v862_v13  ;;  %v482_v48 = vadd.f32 %v83_v33, %v82_v32  ;;  %v95_v49 = vld [vmem:[%s6930_s0 + $0x268] sm:$0xff] }
  0x21   :  { %7089 = vst [vmem:[#allocation5_spill] sm:$0xff] %v4284_v24  ;;  %v4429_v44 = vpack.c.bf16 %v4414_v37, %v4419_v38  ;;  %455 = vadd.xlane.f32.xlu0 %v454_v21  ;;  %v4437_v50 = vld [vmem:[%s6930_s0 + $0x2b8] sm:$0xff]  ;;  %v864_v56 = vld [vmem:[%s6929_s1 + $0x70] sm:$0xff]  ;;  %v866_v61 = vld [vmem:[%s6929_s1 + $0x80] sm:$0xff]  ;;  %v488_v1 = vadd.f32 %v487_v42, %v88_v41  ;;  %v497_v2 = vadd.f32 %v95_v49, %v94_v43 }
  0x22   :  { %3341 = vmatmul.mubr.bf16.vlgmr.msra.gmra.mrb[0].mxu1 %v915_v4  ;;  %v74_v4 = vld [vmem:[%s6930_s0 + $0x1c0] sm:$0xff]  ;;  %7093 = vst [vmem:[#allocation9_spill] sm:$0xff] %v4400_v28  ;;  %460 = vadd.xlane.f32.xlu1 %v459_v14  ;;  %v4442_v51 = vld [vmem:[%s6930_s0 + $0x298] sm:$0xff]  ;;  %v867_v62 = vld [vmem:[%s6929_s1 + $0x88] sm:$0xff] }
  0x23   :  { %3344 = vmatprep.mubr.bf16.mxu1 %v916_v15  ;;  %v468_v15 = vadd.f32 %v467_v59, %v72_v53  ;;  %v472_v18 = vadd.f32 %v75_v5, %v74_v4  ;;  %7094 = vst [vmem:[#allocation10_spill] sm:$0xff] %v4429_v44  ;;  %v90_v53 = vld [vmem:[%s6930_s0 + $0x240] sm:$0xff]  ;;  %v4455_v55 = vpack.c.bf16 %v4437_v50, %v4442_v51  ;;  %v865_v58 = vld [vmem:[%s6929_s1 + $0x78] sm:$0xff]  ;;  %v96_v5 = vld [vmem:[%s6930_s0 + $0x270] sm:$0xff] }
  0x24   :  { %v479_v59 = vadd.f32 %v478_v36, %v81_v63  ;;  %v4472_v3 = vld [vmem:[%s6930_s0 + $0x2f8] sm:$0xff]  ;;  %v102_v7 = vld [vmem:[%s6930_s0 + $0x2a0] sm:$0xff]  ;;  %v103_v9 = vld [vmem:[%s6930_s0 + $0x2a8] sm:$0xff]  ;;  %v489_v22 = vadd.f32 %v488_v1, %v4382_v19 }
  0x25   :  { %v469_v39 = vadd.f32 %v468_v15, %v73_v54  ;;  %v473_v40 = vadd.f32 %v472_v18, %v76_v23  ;;  %v91_v54 = vld [vmem:[%s6930_s0 + $0x248] sm:$0xff]  ;;  %7095 = vst [vmem:[#allocation11_spill] sm:$0xff] %v4455_v55  ;;  %v4477_v63 = vld [vmem:[%s6930_s0 + $0x2d8] sm:$0xff]  ;;  %465 = vadd.xlane.f32.xlu0 %v464_v47  ;;  %v92_v12 = vld [vmem:[%s6930_s0 + $0x250] sm:$0xff]  ;;  %v921_v15 = vpack.c.bf16 %v865_v58, %v864_v56 }
  0x26   :  { %v4490_v10 = vpack.c.bf16 %v4472_v3, %v4477_v63  ;;  %v98_v13 = vld [vmem:[%s6930_s0 + $0x280] sm:$0xff]  ;;  %v99_v14 = vld [vmem:[%s6930_s0 + $0x288] sm:$0xff]  ;;  %v104_v17 = vld [vmem:[%s6930_s0 + $0x2b0] sm:$0xff]  ;;  %v498_v23 = vadd.f32 %v497_v2, %v96_v5  ;;  %v507_v25 = vadd.f32 %v103_v9, %v102_v7 }
  0x27   :  { %470 = vadd.xlane.f32.xlu1 %v469_v39  ;;  %v4507_v18 = vld [vmem:[%s6930_s0 + $0x338] sm:$0xff]  ;;  %v110_v26 = vld [vmem:[%s6930_s0 + $0x2e0] sm:$0xff]  ;;  %v111_v29 = vld [vmem:[%s6930_s0 + $0x2e8] sm:$0xff]  ;;  %v502_v39 = vadd.f32 %v99_v14, %v98_v13 }
  0x28   :  { %7096 = vst [vmem:[#allocation12_spill] sm:$0xff] %v4490_v10  ;;  %v4512_v21 = vld [vmem:[%s6930_s0 + $0x318] sm:$0xff]  ;;  %v106_v32 = vld [vmem:[%s6930_s0 + $0x2c0] sm:$0xff]  ;;  %v119_v1 = vld [vmem:[%s6930_s0 + $0x328] sm:$0xff] }
  0x29   :  { %v4526_v33 = vpack.c.bf16 %v4507_v18, %v4512_v21  ;;  %v4535_v41 = vld [vmem:[%s6930_s0 + $0x378] sm:$0xff]  ;;  %v870_v49 = vld [vmem:[%s6929_s1 + $0xa0] sm:$0xff]  ;;  %v115_v5 = vld [vmem:[%s6930_s0 + $0x308] sm:$0xff] }
  0x2a   :  { %3345 = vmatmul.mubr.bf16.gmra.mrb[4].mxu1 %v917_v52  ;;  %v84_v52 = vld [vmem:[%s6930_s0 + $0x210] sm:$0xff]  ;;  %v4540_v42 = vld [vmem:[%s6930_s0 + $0x358] sm:$0xff] }
  0x2b   :  { %3348 = vmatprep.mubr.bf16.mxu1 %v918_v0  ;;  %v474_v0 = vadd.f32 %v473_v40, %v77_v6  ;;  %v483_v4 = vadd.f32 %v482_v48, %v84_v52  ;;  %v492_v6 = vadd.f32 %v91_v54, %v90_v53  ;;  %480 = vadd.xlane.f32.xlu1 %v479_v59  ;;  %v107_v40 = vld [vmem:[%s6930_s0 + $0x2c8] sm:$0xff]  ;;  %v869_v47 = vld [vmem:[%s6929_s1 + $0x98] sm:$0xff]  ;;  %v112_v54 = vld [vmem:[%s6930_s0 + $0x2f0] sm:$0xff] }
  0x2c   :  { %7097 = vst [vmem:[#allocation13_spill] sm:$0xff] %v4526_v33  ;;  %v4547_v43 = vpack.c.bf16 %v4535_v41, %v4540_v42  ;;  %v517_v48 = vadd.f32 %v111_v29, %v110_v26  ;;  %v499_v52 = vadd.f32 %v498_v23, %v4414_v37  ;;  %v508_v53 = vadd.f32 %v507_v25, %v104_v17  ;;  %v4565_v58 = vld [vmem:[%s6930_s0 + $0x3b8] sm:$0xff]  ;;  %v120_v25 = vld [vmem:[%s6930_s0 + $0x330] sm:$0xff]  ;;  %v126_v29 = vld [vmem:[%s6930_s0 + $0x360] sm:$0xff] }
  0x2d   :  { %475 = vadd.xlane.f32.xlu0 %v474_v0  ;;  %v484_v19 = vadd.f32 %v483_v4, %v4387_v20  ;;  %v493_v36 = vadd.f32 %v492_v6, %v92_v12  ;;  %v100_v20 = vld [vmem:[%s6930_s0 + $0x290] sm:$0xff]  ;;  %v512_v56 = vadd.f32 %v107_v40, %v106_v32  ;;  %v4570_v59 = vld [vmem:[%s6930_s0 + $0x398] sm:$0xff]  ;;  %v118_v0 = vld [vmem:[%s6930_s0 + $0x320] sm:$0xff] }
  0x2e   :  { %7098 = vst [vmem:[#allocation14_spill] sm:$0xff] %v4547_v43  ;;  %v4584_v2 = vpack.c.bf16 %v4565_v58, %v4570_v59  ;;  %v114_v4 = vld [vmem:[%s6930_s0 + $0x300] sm:$0xff]  ;;  %v518_v7 = vadd.f32 %v517_v48, %v112_v54  ;;  %v4598_v9 = vld [vmem:[%s6930_s0 + $0x3f8] sm:$0xff]  ;;  %v509_v13 = vadd.f32 %v508_v53, %v4437_v50  ;;  %v127_v50 = vld [vmem:[%s6930_s0 + $0x368] sm:$0xff] }
  0x2f   :  { %490 = vadd.xlane.f32.xlu1 %v489_v22  ;;  %v494_v37 = vadd.f32 %v493_v36, %v4419_v38  ;;  %v871_v38 = vld [vmem:[%s6929_s1 + $0xa8] sm:$0xff]  ;;  %v4603_v12 = vld [vmem:[%s6930_s0 + $0x3d8] sm:$0xff]  ;;  %v522_v26 = vadd.f32 %v115_v5, %v114_v4  ;;  %v116_v32 = vld [vmem:[%s6930_s0 + $0x310] sm:$0xff]  ;;  %v537_v48 = vadd.f32 %v127_v50, %v126_v29 }
  0x30   :  { %7099 = vst [vmem:[#allocation15_spill] sm:$0xff] %v4584_v2  ;;  %v4608_v17 = vpack.c.bf16 %v4598_v9, %v4603_v12  ;;  %v924_v22 = vpack.c.bf16 %v871_v38, %v870_v49  ;;  %v873_v36 = vld [vmem:[%s6929_s1 + $0xb8] sm:$0xff]  ;;  %v519_v40 = vadd.f32 %v518_v7, %v4472_v3  ;;  %v128_v53 = vld [vmem:[%s6930_s0 + $0x370] sm:$0xff]  ;;  %v134_v54 = vld [vmem:[%s6930_s0 + $0x3a0] sm:$0xff] }
  0x31   :  { %485 = vadd.xlane.f32.xlu0 %v484_v19  ;;  %v872_v19 = vld [vmem:[%s6929_s1 + $0xb0] sm:$0xff]  ;;  %v4646_v49 = vld [vmem:[%s6930_s0 + $0x438] sm:$0xff]  ;;  %v523_v3 = vadd.f32 %v522_v26, %v116_v32  ;;  %v538_v5 = vadd.f32 %v537_v48, %v128_v53  ;;  %v138_v29 = vld [vmem:[%s6930_s0 + $0x3c0] sm:$0xff] }
  0x32   :  { %3349 = vmatmul.mubr.bf16.gmra.mrb[8].mxu1 %v919_v34  ;;  %v922_v34 = vpack.c.bf16 %v867_v62, %v866_v61  ;;  %v503_v61 = vadd.f32 %v502_v39, %v100_v20  ;;  %v108_v62 = vld [vmem:[%s6930_s0 + $0x2d0] sm:$0xff]  ;;  %7100 = vst [vmem:[#allocation16_spill] sm:$0xff] %v4608_v17  ;;  %v874_v39 = vld [vmem:[%s6929_s1 + $0xc0] sm:$0xff]  ;;  %v875_v20 = vld [vmem:[%s6929_s1 + $0xc8] sm:$0xff] }
  0x33   :  { %3352 = vmatprep.mubr.bf16.mxu1 %v920_v46  ;;  %v868_v46 = vld [vmem:[%s6929_s1 + $0x90] sm:$0xff]  ;;  %500 = vadd.xlane.f32.xlu1 %v499_v52  ;;  %v513_v14 = vadd.f32 %v512_v56, %v108_v62  ;;  %v4651_v52 = vld [vmem:[%s6930_s0 + $0x418] sm:$0xff]  ;;  %v135_v56 = vld [vmem:[%s6930_s0 + $0x3a8] sm:$0xff]  ;;  %v926_v38 = vpack.c.bf16 %v875_v20, %v874_v39 }
  0x34   :  { %v923_v6 = vpack.c.bf16 %v869_v47, %v868_v46  ;;  %v504_v23 = vadd.f32 %v503_v61, %v4442_v51  ;;  %v122_v51 = vld [vmem:[%s6930_s0 + $0x340] sm:$0xff]  ;;  %v124_v61 = vld [vmem:[%s6930_s0 + $0x350] sm:$0xff]  ;;  %v4679_v7 = vld [vmem:[%s6930_s0 + $0x478] sm:$0xff] }
  0x35   :  { %495 = vadd.xlane.f32.xlu0 %v494_v37  ;;  %v514_v46 = vadd.f32 %v513_v14, %v4477_v63  ;;  %v4664_v37 = vpack.c.bf16 %v4646_v49, %v4651_v52  ;;  %v130_v62 = vld [vmem:[%s6930_s0 + $0x380] sm:$0xff]  ;;  %v524_v14 = vadd.f32 %v523_v3, %v4512_v21  ;;  %v132_v21 = vld [vmem:[%s6930_s0 + $0x390] sm:$0xff]  ;;  %v139_v50 = vld [vmem:[%s6930_s0 + $0x3c8] sm:$0xff] }
  0x36   :  { %v876_v32 = vld [vmem:[%s6929_s1 + $0xd0] sm:$0xff]  ;;  %v552_v48 = vadd.f32 %v139_v50, %v138_v29  ;;  %v150_v3 = vld [vmem:[%s6930_s0 + $0x420] sm:$0xff] }
  0x37   :  { %510 = vadd.xlane.f32.xlu1 %v509_v13  ;;  %7101 = vst [vmem:[#allocation17_spill] sm:$0xff] %v4664_v37  ;;  %v4684_v13 = vld [vmem:[%s6930_s0 + $0x458] sm:$0xff]  ;;  %v140_v53 = vld [vmem:[%s6930_s0 + $0x3d0] sm:$0xff] }
  0x38   :  { %v4698_v26 = vpack.c.bf16 %v4679_v7, %v4684_v13 }
  0x39   :  { %505 = vadd.xlane.f32.xlu0 %v504_v23  ;;  %v142_v23 = vld [vmem:[%s6930_s0 + $0x3e0] sm:$0xff] }
  0x3a   :  { %3353 = vmatmul.mubr.bf16.gmra.mrb[12].mxu1 %v921_v15  ;;  %v527_v15 = vadd.f32 %v119_v1, %v118_v0  ;;  %v131_v0 = vld [vmem:[%s6930_s0 + $0x388] sm:$0xff]  ;;  %v925_v1 = vpack.c.bf16 %v873_v36, %v872_v19  ;;  %7102 = vst [vmem:[#allocation18_spill] sm:$0xff] %v4698_v26  ;;  %v539_v36 = vadd.f32 %v538_v5, %v4535_v41 }
  0x3b   :  { %3356 = vmatprep.mubr.bf16.mxu1 %v922_v34  ;;  %v123_v34 = vld [vmem:[%s6930_s0 + $0x348] sm:$0xff]  ;;  %520 = vadd.xlane.f32.xlu1 %v519_v40 }
  0x3c   :  { %v528_v47 = vadd.f32 %v527_v15, %v120_v25  ;;  %v532_v63 = vadd.f32 %v123_v34, %v122_v51  ;;  %v143_v25 = vld [vmem:[%s6930_s0 + $0x3e8] sm:$0xff]  ;;  %v877_v51 = vld [vmem:[%s6929_s1 + $0xd8] sm:$0xff]  ;;  %v878_v34 = vld [vmem:[%s6929_s1 + $0xe0] sm:$0xff] }
  0x3d   :  { %515 = vadd.xlane.f32.xlu0 %v514_v46  ;;  %v879_v19 = vld [vmem:[%s6929_s1 + $0xe8] sm:$0xff]  ;;  %v557_v40 = vadd.f32 %v143_v25, %v142_v23  ;;  %v880_v25 = vld [vmem:[%s6929_s1 + $0xf0] sm:$0xff] }
  0x3e   :  { %v529_v4 = vadd.f32 %v528_v47, %v4507_v18  ;;  %v533_v15 = vadd.f32 %v532_v63, %v124_v61  ;;  %v136_v18 = vld [vmem:[%s6930_s0 + $0x3b0] sm:$0xff]  ;;  %v151_v41 = vld [vmem:[%s6930_s0 + $0x428] sm:$0xff] }
  0x3f   :  { %v144_v47 = vld [vmem:[%s6930_s0 + $0x3f0] sm:$0xff]  ;;  %v147_v63 = vld [vmem:[%s6930_s0 + $0x408] sm:$0xff] }
  0x40   :  { %530 = vadd.xlane.f32.xlu1 %v529_v4  ;;  %v534_v20 = vadd.f32 %v533_v15, %v4540_v42  ;;  %v146_v42 = vld [vmem:[%s6930_s0 + $0x400] sm:$0xff]  ;;  %v558_v61 = vadd.f32 %v557_v40, %v144_v47  ;;  %v152_v4 = vld [vmem:[%s6930_s0 + $0x430] sm:$0xff]  ;;  %v155_v15 = vld [vmem:[%s6930_s0 + $0x448] sm:$0xff] }
  0x41   :  { %525 = vadd.xlane.f32.xlu0 %v524_v14  ;;  %v562_v5 = vadd.f32 %v147_v63, %v146_v42  ;;  %v148_v14 = vld [vmem:[%s6930_s0 + $0x410] sm:$0xff]  ;;  %v890_v63 = vld [vmem:[%s6929_s1 + $0x140] sm:$0xff] }
  0x42   :  { %3357 = vmatmul.mubr.bf16.gmra.mrb[16].mxu1 %v923_v6  ;;  %v547_v6 = vadd.f32 %v135_v56, %v134_v54  ;;  %v927_v54 = vpack.c.bf16 %v877_v51, %v876_v32  ;;  %v160_v32 = vld [vmem:[%s6930_s0 + $0x470] sm:$0xff]  ;;  %v882_v51 = vld [vmem:[%s6929_s1 + $0x100] sm:$0xff] }
  0x43   :  { %3360 = vmatprep.mubr.bf16.mxu1 %v924_v22  ;;  %v542_v22 = vadd.f32 %v131_v0, %v130_v62  ;;  %v567_v62 = vadd.f32 %v151_v41, %v150_v3  ;;  %v928_v0 = vpack.c.bf16 %v879_v19, %v878_v34  ;;  %v563_v50 = vadd.f32 %v562_v5, %v148_v14  ;;  %v883_v34 = vld [vmem:[%s6929_s1 + $0x108] sm:$0xff]  ;;  %v156_v19 = vld [vmem:[%s6930_s0 + $0x450] sm:$0xff]  ;;  %v885_v3 = vld [vmem:[%s6929_s1 + $0x118] sm:$0xff] }
  0x44   :  { %v548_v39 = vadd.f32 %v547_v6, %v136_v18  ;;  %540 = vadd.xlane.f32.xlu1 %v539_v36  ;;  %v158_v6 = vld [vmem:[%s6930_s0 + $0x460] sm:$0xff]  ;;  %v559_v18 = vadd.f32 %v558_v61, %v4598_v9  ;;  %v930_v40 = vpack.c.bf16 %v883_v34, %v882_v51  ;;  %v888_v42 = vld [vmem:[%s6929_s1 + $0x130] sm:$0xff] }
  0x45   :  { %v543_v46 = vadd.f32 %v542_v22, %v132_v21  ;;  %535 = vadd.xlane.f32.xlu0 %v534_v20  ;;  %v568_v22 = vadd.f32 %v567_v62, %v152_v4  ;;  %v881_v21 = vld [vmem:[%s6929_s1 + $0xf8] sm:$0xff]  ;;  %v564_v20 = vadd.f32 %v563_v50, %v4651_v52  ;;  %v886_v52 = vld [vmem:[%s6929_s1 + $0x120] sm:$0xff]  ;;  %v892_v62 = vld [vmem:[%s6929_s1 + $0x150] sm:$0xff] }
  0x46   :  { %v549_v56 = vadd.f32 %v548_v39, %v4565_v58  ;;  %v159_v58 = vld [vmem:[%s6930_s0 + $0x468] sm:$0xff]  ;;  %v929_v36 = vpack.c.bf16 %v881_v21, %v880_v25  ;;  %v168_v5 = vld [vmem:[%s6930_s0 + $0x4b0] sm:$0xff]  ;;  %v162_v14 = vld [vmem:[%s6930_s0 + $0x480] sm:$0xff]  ;;  %v6933_v25 = vmov 0  }
  0x47   :  { %v577_v23 = vadd.f32 %v159_v58, %v158_v6  ;;  %v167_v4 = vld [vmem:[%s6930_s0 + $0x4a8] sm:$0xff]  ;;  %v169_v6 = vld [vmem:[%s6930_s0 + $0x4b8] sm:$0xff]  ;;  %1395 = vmatprep.subr.bf16.mxu1 %v6933_v25 }
  0x48   :  { %550 = vadd.xlane.f32.xlu1 %v549_v56  ;;  %v895_v50 = vld [vmem:[%s6929_s1 + $0x168] sm:$0xff] }
  0x49   :  { %v578_v39 = vadd.f32 %v577_v23, %v160_v32  ;;  %v894_v23 = vld [vmem:[%s6929_s1 + $0x160] sm:$0xff]  ;;  %v896_v32 = vld [vmem:[%s6929_s1 + $0x170] sm:$0xff] }
  0x4a   :  { %3361 = vmatmul.mubr.bf16.gmra.mrb[20].mxu1 %v925_v1  ;;  %v544_v1 = vadd.f32 %v543_v46, %v4570_v59  ;;  %v154_v59 = vld [vmem:[%s6930_s0 + $0x440] sm:$0xff]  ;;  %v936_v34 = vpack.c.bf16 %v895_v50, %v894_v23  ;;  %v180_v23 = vld [vmem:[%s6930_s0 + $0x510] sm:$0xff] }
  0x4b   :  { %3364 = vmatprep.mubr.bf16.mxu1 %v926_v38  ;;  %v553_v38 = vadd.f32 %v552_v48, %v140_v53  ;;  %v572_v9 = vadd.f32 %v155_v15, %v154_v59  ;;  %v579_v47 = vadd.f32 %v578_v39, %v4679_v7  ;;  %v884_v48 = vld [vmem:[%s6929_s1 + $0x110] sm:$0xff]  ;;  %v887_v7 = vld [vmem:[%s6929_s1 + $0x128] sm:$0xff] }
  0x4c   :  { %545 = vadd.xlane.f32.xlu0 %v544_v1  ;;  %560 = vadd.xlane.f32.xlu1 %v559_v18  ;;  %v931_v41 = vpack.c.bf16 %v885_v3, %v884_v48  ;;  %v932_v53 = vpack.c.bf16 %v887_v7, %v886_v52  ;;  %v163_v59 = vld [vmem:[%s6930_s0 + $0x488] sm:$0xff]  ;;  %v164_v15 = vld [vmem:[%s6930_s0 + $0x490] sm:$0xff]  ;;  %v165_v18 = vld [vmem:[%s6930_s0 + $0x498] sm:$0xff] }
  0x4d   :  { %v554_v29 = vadd.f32 %v553_v38, %v4603_v12  ;;  %v569_v12 = vadd.f32 %v568_v22, %v4646_v49  ;;  %v573_v46 = vadd.f32 %v572_v9, %v156_v19  ;;  %v166_v38 = vld [vmem:[%s6930_s0 + $0x4a0] sm:$0xff]  ;;  %v582_v22 = vadd.f32 %v163_v59, %v162_v14  ;;  %v897_v9 = vld [vmem:[%s6929_s1 + $0x178] sm:$0xff]  ;;  %v176_v39 = vld [vmem:[%s6930_s0 + $0x4f0] sm:$0xff] }
  0x4e   :  { %v587_v58 = vadd.f32 %v167_v4, %v166_v38  ;;  %v937_v19 = vpack.c.bf16 %v897_v9, %v896_v32  ;;  %v177_v3 = vld [vmem:[%s6930_s0 + $0x4f8] sm:$0xff]  ;;  %v902_v38 = vld [vmem:[%s6929_s1 + $0x1a0] sm:$0xff]  ;;  %v903_v4 = vld [vmem:[%s6929_s1 + $0x1a8] sm:$0xff] }
  0x4f   :  { %v574_v49 = vadd.f32 %v573_v46, %v4684_v13  ;;  %v889_v13 = vld [vmem:[%s6929_s1 + $0x138] sm:$0xff]  ;;  %v583_v51 = vadd.f32 %v582_v22, %v164_v15  ;;  %v170_v46 = vld [vmem:[%s6930_s0 + $0x4c0] sm:$0xff]  ;;  %v940_v14 = vpack.c.bf16 %v903_v4, %v902_v38  ;;  %v179_v22 = vld [vmem:[%s6930_s0 + $0x508] sm:$0xff] }
  0x50   :  { %555 = vadd.xlane.f32.xlu0 %v554_v29  ;;  %570 = vadd.xlane.f32.xlu1 %v569_v12  ;;  %v933_v56 = vpack.c.bf16 %v889_v13, %v888_v42  ;;  %v588_v21 = vadd.f32 %v587_v58, %v168_v5  ;;  %v4843_v29 = vpack.c.bf16 %v169_v6, %v165_v18  ;;  %v175_v12 = vld [vmem:[%s6930_s0 + $0x4e8] sm:$0xff]  ;;  %v173_v52 = vld [vmem:[%s6930_s0 + $0x4d8] sm:$0xff]  ;;  %v182_v5 = vld [vmem:[%s6930_s0 + $0x520] sm:$0xff] }
  0x51   :  { %v584_v48 = vadd.f32 %v583_v51, %v165_v18  ;;  %v184_v58 = vld [vmem:[%s6930_s0 + $0x530] sm:$0xff]  ;;  %v185_v59 = vld [vmem:[%s6930_s0 + $0x538] sm:$0xff]  ;;  %v178_v18 = vld [vmem:[%s6930_s0 + $0x500] sm:$0xff] }
  0x52   :  { %3365 = vmatmul.mubr.bf16.gmra.mrb[24].mxu1 %v927_v54  ;;  %v891_v54 = vld [vmem:[%s6929_s1 + $0x148] sm:$0xff]  ;;  %7103 = vst [vmem:[#allocation19_spill] sm:$0xff] %v4843_v29  ;;  %v602_v50 = vadd.f32 %v179_v22, %v178_v18  ;;  %v190_v32 = vld [vmem:[%s6930_s0 + $0x560] sm:$0xff]  ;;  %v909_v38 = vld [vmem:[%s6929_s1 + $0x1d8] sm:$0xff] }
  0x53   :  { %3368 = vmatprep.mubr.bf16.mxu1 %v928_v0  ;;  %v934_v61 = vpack.c.bf16 %v891_v54, %v890_v63  ;;  %v893_v0 = vld [vmem:[%s6929_s1 + $0x158] sm:$0xff]  ;;  %v898_v54 = vld [vmem:[%s6929_s1 + $0x180] sm:$0xff]  ;;  %v199_v22 = vld [vmem:[%s6930_s0 + $0x5a8] sm:$0xff] }
  0x54   :  { %565 = vadd.xlane.f32.xlu0 %v564_v20  ;;  %580 = vadd.xlane.f32.xlu1 %v579_v47  ;;  %v935_v1 = vpack.c.bf16 %v893_v0, %v892_v62  ;;  %v171_v47 = vld [vmem:[%s6930_s0 + $0x4c8] sm:$0xff]  ;;  %v900_v62 = vld [vmem:[%s6929_s1 + $0x190] sm:$0xff]  ;;  %v901_v0 = vld [vmem:[%s6929_s1 + $0x198] sm:$0xff] }
  0x55   :  { %v592_v7 = vadd.f32 %v171_v47, %v170_v46  ;;  %v188_v46 = vld [vmem:[%s6930_s0 + $0x550] sm:$0xff]  ;;  %v198_v18 = vld [vmem:[%s6930_s0 + $0x5a0] sm:$0xff] }
  0x58   :  { %575 = vadd.xlane.f32.xlu0 %v574_v49  ;;  %v172_v49 = vld [vmem:[%s6930_s0 + $0x4d0] sm:$0xff] }
  0x59   :  { %v593_v42 = vadd.f32 %v592_v7, %v172_v49  ;;  %v904_v49 = vld [vmem:[%s6929_s1 + $0x1b0] sm:$0xff] }
  0x5a   :  { %3369 = vmatmul.mubr.bf16.gmra.mrb[28].mxu1 %v929_v36  ;;  %v174_v36 = vld [vmem:[%s6930_s0 + $0x4e0] sm:$0xff] }
  0x5b   :  { %3372 = vmatprep.mubr.bf16.mxu1 %v930_v40  ;;  %v589_v40 = vadd.f32 %v588_v21, %v169_v6  ;;  %v597_v20 = vadd.f32 %v175_v12, %v174_v36  ;;  %v594_v63 = vadd.f32 %v593_v42, %v173_v52  ;;  %v183_v6 = vld [vmem:[%s6930_s0 + $0x528] sm:$0xff]  ;;  %v181_v21 = vld [vmem:[%s6930_s0 + $0x518] sm:$0xff]  ;;  %v603_v12 = vadd.f32 %v602_v50, %v180_v23  ;;  %v200_v23 = vld [vmem:[%s6930_s0 + $0x5b0] sm:$0xff] }
  0x5c   :  { %585 = vadd.xlane.f32.xlu0 %v584_v48  ;;  %v607_v15 = vadd.f32 %v183_v6, %v182_v5  ;;  %v4925_v51 = vpack.c.bf16 %v185_v59, %v181_v21  ;;  %v193_v36 = vld [vmem:[%s6930_s0 + $0x578] sm:$0xff]  ;;  %v910_v5 = vld [vmem:[%s6929_s1 + $0x1e0] sm:$0xff]  ;;  %v911_v6 = vld [vmem:[%s6929_s1 + $0x1e8] sm:$0xff] }
  0x5d   :  { %590 = vadd.xlane.f32.xlu1 %v589_v40  ;;  %v186_v40 = vld [vmem:[%s6930_s0 + $0x540] sm:$0xff]  ;;  %v189_v48 = vld [vmem:[%s6930_s0 + $0x558] sm:$0xff]  ;;  %v604_v7 = vadd.f32 %v603_v12, %v181_v21  ;;  %v627_v21 = vadd.f32 %v199_v22, %v198_v18  ;;  %v215_v22 = vld [vmem:[%s6930_s0 + $0x628] sm:$0xff] }
  0x5e   :  { %v608_v9 = vadd.f32 %v607_v15, %v184_v58  ;;  %7105 = vst [vmem:[#allocation21_spill] sm:$0xff] %v4925_v51  ;;  %v4954_v42 = vpack.c.bf16 %v193_v36, %v189_v48  ;;  %v944_v58 = vpack.c.bf16 %v911_v6, %v910_v5  ;;  %v194_v50 = vld [vmem:[%s6930_s0 + $0x580] sm:$0xff] }
  0x5f   :  { %v214_v18 = vld [vmem:[%s6930_s0 + $0x620] sm:$0xff] }
  0x60   :  { %595 = vadd.xlane.f32.xlu0 %v594_v63  ;;  %v609_v47 = vadd.f32 %v608_v9, %v185_v59  ;;  %7106 = vst [vmem:[#allocation22_spill] sm:$0xff] %v4954_v42  ;;  %v913_v59 = vld [vmem:[%s6929_s1 + $0x1f8] sm:$0xff] }
  0x61   :  { %v201_v9 = vld [vmem:[%s6930_s0 + $0x5b8] sm:$0xff] }
  0x62   :  { %3373 = vmatmul.mubr.bf16.gmra.mrb[32].mxu1 %v931_v41  ;;  %v598_v41 = vadd.f32 %v597_v20, %v176_v39  ;;  %v187_v20 = vld [vmem:[%s6930_s0 + $0x548] sm:$0xff] }
  0x63   :  { %3376 = vmatprep.mubr.bf16.mxu1 %v932_v53  ;;  %v4878_v53 = vpack.c.bf16 %v177_v3, %v173_v52  ;;  %v905_v52 = vld [vmem:[%s6929_s1 + $0x1b8] sm:$0xff] }
  0x64   :  { %v599_v13 = vadd.f32 %v598_v41, %v177_v3  ;;  %v612_v3 = vadd.f32 %v187_v20, %v186_v40  ;;  %605 = vadd.xlane.f32.xlu0 %v604_v7 }
  0x65   :  { %7104 = vst [vmem:[#allocation20_spill] sm:$0xff] %v4878_v53 }
  0x66   :  { %600 = vadd.xlane.f32.xlu1 %v599_v13  ;;  %v941_v13 = vpack.c.bf16 %v905_v52, %v904_v49  ;;  %v613_v63 = vadd.f32 %v612_v3, %v188_v46  ;;  %v208_v3 = vld [vmem:[%s6930_s0 + $0x5f0] sm:$0xff]  ;;  %v3885_v49 = vld [vmem:[%s6930_s0 + $0x8] sm:$0xff] }
  0x67   :  { %v5023_v52 = vpack.c.bf16 %v4184_v35, %v3885_v49  ;;  %v204_v35 = vld [vmem:[%s6930_s0 + $0x5d0] sm:$0xff]  ;;  %v223_v49 = vld [vmem:[%s6930_s0 + $0x668] sm:$0xff] }
  0x69   :  { %7108 = vst [vmem:[#allocation24_spill] sm:$0xff] %v5023_v52 }
  0x6a   :  { %3377 = vmatmul.mubr.bf16.gmra.mrb[36].mxu1 %v933_v56  ;;  %v899_v56 = vld [vmem:[%s6929_s1 + $0x188] sm:$0xff]  ;;  %610 = vadd.xlane.f32.xlu1 %v609_v47  ;;  %v206_v47 = vld [vmem:[%s6930_s0 + $0x5e0] sm:$0xff] }
  0x6b   :  { %3380 = vmatprep.mubr.bf16.mxu1 %v934_v61  ;;  %v938_v61 = vpack.c.bf16 %v899_v56, %v898_v54  ;;  %v906_v54 = vld [vmem:[%s6929_s1 + $0x1c0] sm:$0xff]  ;;  %v907_v56 = vld [vmem:[%s6929_s1 + $0x1c8] sm:$0xff] }
  0x72   :  { %3381 = vmatmul.mubr.bf16.gmra.mrb[40].mxu1 %v935_v1  ;;  %v939_v1 = vpack.c.bf16 %v901_v0, %v900_v62  ;;  %v942_v62 = vpack.c.bf16 %v907_v56, %v906_v54  ;;  %v614_v0 = vadd.f32 %v613_v63, %v189_v48  ;;  %v207_v48 = vld [vmem:[%s6930_s0 + $0x5e8] sm:$0xff]  ;;  %v209_v56 = vld [vmem:[%s6930_s0 + $0x5f8] sm:$0xff] }
  0x73   :  { %3384 = vmatprep.mubr.bf16.mxu1 %v936_v34  ;;  %v191_v34 = vld [vmem:[%s6930_s0 + $0x568] sm:$0xff] }
  0x74   :  { %v617_v39 = vadd.f32 %v191_v34, %v190_v32  ;;  %615 = vadd.xlane.f32.xlu0 %v614_v0  ;;  %v195_v32 = vld [vmem:[%s6930_s0 + $0x588] sm:$0xff]  ;;  %v196_v34 = vld [vmem:[%s6930_s0 + $0x590] sm:$0xff] }
  0x75   :  { %v203_v63 = vld [vmem:[%s6930_s0 + $0x5c8] sm:$0xff] }
  0x7a   :  { %3385 = vmatmul.mubr.bf16.gmra.mrb[44].mxu1 %v937_v19  ;;  %v192_v19 = vld [vmem:[%s6930_s0 + $0x570] sm:$0xff] }
  0x7b   :  { %3388 = vmatprep.mubr.bf16.mxu1 %v938_v61  ;;  %v618_v41 = vadd.f32 %v617_v39, %v192_v19  ;;  %v197_v19 = vld [vmem:[%s6930_s0 + $0x598] sm:$0xff]  ;;  %v628_v39 = vadd.f32 %v627_v21, %v200_v23  ;;  %v210_v23 = vld [vmem:[%s6930_s0 + $0x600] sm:$0xff] }
  0x7c   :  { %v5006_v40 = vpack.c.bf16 %v201_v9, %v197_v19 }
  0x7d   :  { %v619_v61 = vadd.f32 %v618_v41, %v193_v36  ;;  %v622_v36 = vadd.f32 %v195_v32, %v194_v50  ;;  %v629_v7 = vadd.f32 %v628_v39, %v201_v9  ;;  %v637_v41 = vadd.f32 %v207_v48, %v206_v47  ;;  %v211_v32 = vld [vmem:[%s6930_s0 + $0x608] sm:$0xff]  ;;  %v216_v9 = vld [vmem:[%s6930_s0 + $0x630] sm:$0xff]  ;;  %v217_v39 = vld [vmem:[%s6930_s0 + $0x638] sm:$0xff] }
  0x7e   :  { %7107 = vst [vmem:[#allocation23_spill] sm:$0xff] %v5006_v40  ;;  %v647_v50 = vadd.f32 %v215_v22, %v214_v18  ;;  %v222_v48 = vld [vmem:[%s6930_s0 + $0x660] sm:$0xff]  ;;  %v231_v22 = vld [vmem:[%s6930_s0 + $0x6a8] sm:$0xff] }
  0x7f   :  { %620 = vadd.xlane.f32.xlu1 %v619_v61  ;;  %v623_v46 = vadd.f32 %v622_v36, %v196_v34  ;;  %v205_v61 = vld [vmem:[%s6930_s0 + $0x5d8] sm:$0xff]  ;;  %v638_v0 = vadd.f32 %v637_v41, %v208_v3  ;;  %v212_v34 = vld [vmem:[%s6930_s0 + $0x610] sm:$0xff]  ;;  %v219_v41 = vld [vmem:[%s6930_s0 + $0x648] sm:$0xff] }
  0x80   :  { %v648_v36 = vadd.f32 %v647_v50, %v216_v9  ;;  %v230_v18 = vld [vmem:[%s6930_s0 + $0x6a0] sm:$0xff]  ;;  %v227_v50 = vld [vmem:[%s6930_s0 + $0x688] sm:$0xff] }
  0x81   :  { %v624_v54 = vadd.f32 %v623_v46, %v197_v19  ;;  %v639_v5 = vadd.f32 %v638_v0, %v209_v56  ;;  %v642_v19 = vadd.f32 %v211_v32, %v210_v23  ;;  %v213_v46 = vld [vmem:[%s6930_s0 + $0x618] sm:$0xff]  ;;  %v226_v23 = vld [vmem:[%s6930_s0 + $0x680] sm:$0xff] }
  0x82   :  { %3389 = vmatmul.mubr.bf16.gmra.mrb[48].mxu1 %v939_v1  ;;  %v908_v1 = vld [vmem:[%s6929_s1 + $0x1d0] sm:$0xff]  ;;  %v649_v3 = vadd.f32 %v648_v36, %v217_v39  ;;  %v225_v0 = vld [vmem:[%s6930_s0 + $0x678] sm:$0xff]  ;;  %v5119_v32 = vpack.c.bf16 %v217_v39, %v213_v46 }
  0x83   :  { %3392 = vmatprep.mubr.bf16.mxu1 %v940_v14  ;;  %v943_v4 = vpack.c.bf16 %v909_v38, %v908_v1  ;;  %v912_v14 = vld [vmem:[%s6929_s1 + $0x1f0] sm:$0xff]  ;;  %630 = vadd.xlane.f32.xlu1 %v629_v7  ;;  %v5041_v1 = vpack.c.bf16 %v209_v56, %v205_v61  ;;  %v643_v47 = vadd.f32 %v642_v19, %v212_v34  ;;  %v218_v7 = vld [vmem:[%s6930_s0 + $0x640] sm:$0xff]  ;;  %v5134_v39 = vld [vmem:[%s6930_s0 + $0x6b8] sm:$0xff] }
  0x84   :  { %v945_v15 = vpack.c.bf16 %v913_v59, %v912_v14  ;;  %625 = vadd.xlane.f32.xlu0 %v624_v54  ;;  %v224_v54 = vld [vmem:[%s6930_s0 + $0x670] sm:$0xff]  ;;  %v657_v56 = vadd.f32 %v223_v49, %v222_v48  ;;  %7110 = vst [vmem:[#allocation26_spill] sm:$0xff] %v5119_v32  ;;  %v662_v49 = vadd.f32 %v227_v50, %v226_v23  ;;  %v5166_v23 = vld [vmem:[%s6930_s0 + $0x6f8] sm:$0xff] }
  0x85   :  { %7109 = vst [vmem:[#allocation25_spill] sm:$0xff] %v5041_v1  ;;  %v232_v36 = vld [vmem:[%s6930_s0 + $0x6b0] sm:$0xff] }
  0x87   :  { %640 = vadd.xlane.f32.xlu1 %v639_v5  ;;  %v221_v5 = vld [vmem:[%s6930_s0 + $0x658] sm:$0xff] }
  0x88   :  { %v5121_v34 = vpack.c.bf16 %v225_v0, %v221_v5 }
  0x8a   :  { %3393 = vmatmul.mubr.bf16.gmra.mrb[52].mxu1 %v941_v13  ;;  %v202_v13 = vld [vmem:[%s6930_s0 + $0x5c0] sm:$0xff]  ;;  %7111 = vst [vmem:[#allocation27_spill] sm:$0xff] %v5121_v34 }
  0x8b   :  { %3396 = vmatprep.mubr.bf16.mxu1 %v942_v62  ;;  %v632_v62 = vadd.f32 %v203_v63, %v202_v13  ;;  %v644_v63 = vadd.f32 %v643_v47, %v213_v46  ;;  %650 = vadd.xlane.f32.xlu1 %v649_v3  ;;  %v228_v47 = vld [vmem:[%s6930_s0 + $0x690] sm:$0xff]  ;;  %v667_v46 = vadd.f32 %v231_v22, %v230_v18  ;;  %v5139_v3 = vld [vmem:[%s6930_s0 + $0x698] sm:$0xff] }
  0x8d   :  { %v633_v38 = vadd.f32 %v632_v62, %v204_v35  ;;  %v220_v35 = vld [vmem:[%s6930_s0 + $0x650] sm:$0xff] }
  0x92   :  { %3397 = vmatmul.mubr.bf16.gmra.mrb[56].mxu1 %v943_v4 }
  0x93   :  { %3400 = vmatprep.mubr.bf16.mxu1 %v944_v58  ;;  %v634_v58 = vadd.f32 %v633_v38, %v205_v61  ;;  %v652_v61 = vadd.f32 %v219_v41, %v218_v7  ;;  %v658_v38 = vadd.f32 %v657_v56, %v224_v54  ;;  %v238_v7 = vld [vmem:[%s6930_s0 + $0x6e0] sm:$0xff]  ;;  %v235_v56 = vld [vmem:[%s6930_s0 + $0x6c8] sm:$0xff] }
  0x94   :  { %v234_v54 = vld [vmem:[%s6930_s0 + $0x6c0] sm:$0xff] }
  0x95   :  { %635 = vadd.xlane.f32.xlu0 %v634_v58  ;;  %v653_v58 = vadd.f32 %v652_v61, %v220_v35  ;;  %v659_v9 = vadd.f32 %v658_v38, %v225_v0  ;;  %v668_v35 = vadd.f32 %v667_v46, %v232_v36  ;;  %v663_v61 = vadd.f32 %v662_v49, %v228_v47  ;;  %v240_v0 = vld [vmem:[%s6930_s0 + $0x6f0] sm:$0xff]  ;;  %v247_v47 = vld [vmem:[%s6930_s0 + $0x728] sm:$0xff]  ;;  %v242_v46 = vld [vmem:[%s6930_s0 + $0x700] sm:$0xff] }
  0x96   :  { %v243_v49 = vld [vmem:[%s6930_s0 + $0x708] sm:$0xff] }
  0x97   :  { %v654_v19 = vadd.f32 %v653_v58, %v221_v5  ;;  %660 = vadd.xlane.f32.xlu1 %v659_v9  ;;  %v236_v5 = vld [vmem:[%s6930_s0 + $0x6d0] sm:$0xff]  ;;  %v672_v58 = vadd.f32 %v235_v56, %v234_v54  ;;  %v669_v18 = vadd.f32 %v668_v35, %v5134_v39  ;;  %v664_v22 = vadd.f32 %v663_v61, %v5139_v3  ;;  %v5171_v9 = vld [vmem:[%s6930_s0 + $0x6d8] sm:$0xff] }
  0x98   :  { %v5004_v12 = vpop.xlane.xlu1 %415  ;;  %v248_v54 = vld [vmem:[%s6930_s0 + $0x730] sm:$0xff] }
  0x99   :  { %645 = vadd.xlane.f32.xlu0 %v644_v63  ;;  %v239_v63 = vld [vmem:[%s6930_s0 + $0x6e8] sm:$0xff]  ;;  %v673_v36 = vadd.f32 %v672_v58, %v236_v5  ;;  %v244_v35 = vld [vmem:[%s6930_s0 + $0x710] sm:$0xff]  ;;  %v5200_v5 = vld [vmem:[%s6930_s0 + $0x738] sm:$0xff]  ;;  %v724_v1 = vmax.f32 %v5004_v12, 1.0 }
  0x9a   :  { %3401 = vmatmul.mubr.bf16.gmra.mrb[60].mxu1 %v945_v15  ;;  %v5008_v20 = vpop.xlane.xlu0 %405  ;;  %v677_v38 = vadd.f32 %v239_v63, %v238_v7  ;;  %v271_v12 = vld [vmem:[%s6930_s0 + $0x7e8] sm:$0xff] }
  0x9b   :  { %1427 = vmatprep.mubr.bf16.mxu1 %v5023_v52  ;;  %670 = vadd.xlane.f32.xlu1 %v669_v18  ;;  %v5205_v18 = vld [vmem:[%s6930_s0 + $0x718] sm:$0xff]  ;;  %v260_v52 = vld [vmem:[%s6930_s0 + $0x790] sm:$0xff]  ;;  %3757 = vrsqrt.f32 %v724_v1 }
  0x9c   :  { %v5043_v4 = vpop.xlane.xlu1 %420  ;;  %v678_v50 = vadd.f32 %v677_v38, %v240_v0  ;;  %v674_v0 = vadd.f32 %v673_v36, %v5171_v9  ;;  %v682_v38 = vadd.f32 %v243_v49, %v242_v46  ;;  %v250_v36 = vld [vmem:[%s6930_s0 + $0x740] sm:$0xff]  ;;  %v256_v49 = vld [vmem:[%s6930_s0 + $0x770] sm:$0xff] }
  0x9d   :  { %655 = vadd.xlane.f32.xlu0 %v654_v19  ;;  %v246_v19 = vld [vmem:[%s6930_s0 + $0x720] sm:$0xff] }
  0x9e   :  { %v5045_v6 = vpop.xlane.xlu0 %410  ;;  %v679_v63 = vadd.f32 %v678_v50, %v5166_v23  ;;  %v687_v56 = vadd.f32 %v247_v47, %v246_v19  ;;  %v683_v50 = vadd.f32 %v682_v38, %v244_v35  ;;  %v255_v19 = vld [vmem:[%s6930_s0 + $0x768] sm:$0xff] }
  0x9f   :  { %v251_v47 = vld [vmem:[%s6930_s0 + $0x748] sm:$0xff]  ;;  %v723_v40 = vmax.f32 %v5045_v6, 1.0 }
  0xa0   :  { %v5047_v14 = vpop.xlane.xlu1 %430  ;;  %v688_v58 = vadd.f32 %v687_v56, %v248_v54  ;;  %680 = vadd.xlane.f32.xlu1 %v679_v63  ;;  %v252_v56 = vld [vmem:[%s6930_s0 + $0x750] sm:$0xff]  ;;  %v692_v35 = vadd.f32 %v251_v47, %v250_v36  ;;  %v684_v38 = vadd.f32 %v683_v50, %v5205_v18  ;;  %v5232_v63 = vld [vmem:[%s6930_s0 + $0x778] sm:$0xff]  ;;  %v263_v50 = vld [vmem:[%s6930_s0 + $0x7a8] sm:$0xff] }
  0xa1   :  { %665 = vadd.xlane.f32.xlu0 %v664_v22  ;;  %v254_v22 = vld [vmem:[%s6930_s0 + $0x760] sm:$0xff] }
  0xa2   :  { %v5049_v59 = vpop.xlane.xlu0 %425  ;;  %v689_v46 = vadd.f32 %v688_v58, %v5200_v5  ;;  %v697_v54 = vadd.f32 %v255_v19, %v254_v22  ;;  %v5237_v58 = vld [vmem:[%s6930_s0 + $0x758] sm:$0xff]  ;;  %v693_v22 = vadd.f32 %v692_v35, %v252_v56  ;;  %v262_v19 = vld [vmem:[%s6930_s0 + $0x7a0] sm:$0xff]  ;;  %v264_v35 = vld [vmem:[%s6930_s0 + $0x7b0] sm:$0xff] }
  0xa3   :  { %v258_v47 = vld [vmem:[%s6930_s0 + $0x780] sm:$0xff]  ;;  %v707_v34 = vadd.f32 %v263_v50, %v262_v19 }
  0xa4   :  { %v5051_v15 = vpop.xlane.xlu1 %440  ;;  %690 = vadd.xlane.f32.xlu1 %v689_v46  ;;  %v694_v56 = vadd.f32 %v693_v22, %v5237_v58  ;;  %v5265_v46 = vld [vmem:[%s6930_s0 + $0x7b8] sm:$0xff]  ;;  %v725_v22 = vmax.f32 %v5043_v4, 1.0 }
  0xa5   :  { %675 = vadd.xlane.f32.xlu0 %v674_v0  ;;  %v698_v0 = vadd.f32 %v697_v54, %v256_v49  ;;  %v259_v49 = vld [vmem:[%s6930_s0 + $0x788] sm:$0xff]  ;;  %v708_v19 = vadd.f32 %v707_v34, %v264_v35 }
  0xa6   :  { %v5062_v21 = vpop.xlane.xlu0 %435  ;;  %v702_v32 = vadd.f32 %v259_v49, %v258_v47  ;;  %v266_v47 = vld [vmem:[%s6930_s0 + $0x7c0] sm:$0xff]  ;;  %v267_v49 = vld [vmem:[%s6930_s0 + $0x7c8] sm:$0xff]  ;;  %3759 = vrsqrt.f32 %v725_v22  ;;  %v726_v22 = vmax.f32 %v5049_v59, 1.0 }
  0xa7   :  { %v699_v54 = vadd.f32 %v698_v0, %v5232_v63  ;;  %v270_v0 = vld [vmem:[%s6930_s0 + $0x7e0] sm:$0xff]  ;;  %v712_v34 = vadd.f32 %v267_v49, %v266_v47  ;;  %v709_v51 = vadd.f32 %v708_v19, %v5265_v46  ;;  %3761 = vrsqrt.f32 %v723_v40 }
  0xa8   :  { %v703_v50 = vadd.f32 %v702_v32, %v260_v52  ;;  %v272_v52 = vld [vmem:[%s6930_s0 + $0x7f0] sm:$0xff]  ;;  %v717_v4 = vadd.f32 %v271_v12, %v270_v0  ;;  %v5307_v12 = vld [vmem:[%s6930_s0 + $0x7d8] sm:$0xff]  ;;  %v727_v19 = vmax.f32 %v5047_v14, 1.0  ;;  %v5325_v14 = vpack.c.bf16 %v5134_v39, %v5139_v3 }
  0xa9   :  { %685 = vadd.xlane.f32.xlu0 %v684_v38  ;;  %v5270_v38 = vld [vmem:[%s6930_s0 + $0x798] sm:$0xff]  ;;  %700 = vadd.xlane.f32.xlu1 %v699_v54  ;;  %v268_v32 = vld [vmem:[%s6930_s0 + $0x7d0] sm:$0xff]  ;;  %v722_v54 = vmax.f32 %v5008_v20, 1.0 }
  0xaa   :  { %v5099_v62 = vpop.xlane.xlu0 %445  ;;  %v704_v6 = vadd.f32 %v703_v50, %v5270_v38  ;;  %v718_v0 = vadd.f32 %v717_v4, %v272_v52  ;;  %v713_v47 = vadd.f32 %v712_v34, %v268_v32  ;;  %v729_v50 = vmax.f32 %v5051_v15, 1.0  ;;  %7112 = vst [vmem:[#allocation28_spill] sm:$0xff] %v5325_v14 }
  0xab   :  { %v5091_v13 = vpop.xlane.xlu1 %450  ;;  %3763 = vrsqrt.f32 %v722_v54  ;;  %v728_v52 = vmax.f32 %v5062_v21, 1.0  ;;  %v5329_v15 = vpack.c.bf16 %v5166_v23, %v5171_v9 }
  0xac   :  { %v714_v20 = vadd.f32 %v713_v47, %v5307_v12  ;;  %3765 = vrsqrt.f32 %v727_v19  ;;  %v731_v32 = vmax.f32 %v5091_v13, 1.0 }
  0xad   :  { %695 = vadd.xlane.f32.xlu0 %v694_v56  ;;  %v5302_v56 = vld [vmem:[%s6930_s0 + $0x7f8] sm:$0xff]  ;;  %710 = vadd.xlane.f32.xlu1 %v709_v51  ;;  %3767 = vrsqrt.f32 %v729_v50  ;;  %v5319_v51 = vpop.eup %3757  ;;  %7113 = vst [vmem:[#allocation29_spill] sm:$0xff] %v5329_v15 }
  0xae   :  { %v5144_v41 = vpop.xlane.xlu0 %455  ;;  %v719_v1 = vadd.f32 %v718_v0, %v5302_v56  ;;  %3769 = vrsqrt.f32 %v728_v52 }
  0xaf   :  { %v5129_v48 = vpop.xlane.xlu1 %460  ;;  %3771 = vrsqrt.f32 %v726_v22  ;;  %v732_v39 = vmax.f32 %v5144_v41, 1.0 }
  0xb0   :  { %v5331_v21 = vpop.eup %3759  ;;  %v733_v0 = vmax.f32 %v5129_v48, 1.0  ;;  %3773 = vrsqrt.f32 %v731_v32 }
  0xb1   :  { %705 = vadd.xlane.f32.xlu0 %v704_v6  ;;  %720 = vadd.xlane.f32.xlu1 %v719_v1  ;;  %7114 = vst [vmem:[#allocation30_spill] sm:$0xff] %v5331_v21  ;;  %v5336_v6 = vpop.eup %3761 }
  0xb2   :  { %v5194_v61 = vpop.xlane.xlu0 %465  ;;  %7115 = vst [vmem:[#allocation31_spill] sm:$0xff] %v5336_v6  ;;  %3775 = vrsqrt.f32 %v733_v0 }
  0xb3   :  { %3777 = vrsqrt.f32 %v732_v39 }
  0xb4   :  { %v5185_v7 = vpop.xlane.xlu1 %470 }
  0xb5   :  { %715 = vadd.xlane.f32.xlu0 %v714_v20  ;;  %v5340_v3 = vpop.eup %3763  ;;  %v730_v20 = vmax.f32 %v5099_v62, 1.0 }
  0xb6   :  { %7116 = vst [vmem:[#allocation32_spill] sm:$0xff] %v5340_v3  ;;  %v5349_v52 = vpop.eup %3765 }
  0xb7   :  { %7117 = vst [vmem:[#allocation33_spill] sm:$0xff] %v5349_v52  ;;  %3779 = vrsqrt.f32 %v730_v20 }
  0xb8   :  { %v5227_v25 = vpop.xlane.xlu1 %480 }
  0xba   :  { %v5242_v36 = vpop.xlane.xlu0 %475 }
  0xbb   :  { %v736_v39 = vmax.f32 %v5242_v36, 1.0 }
  0xbc   :  { %v5286_v42 = vpop.xlane.xlu1 %490 }
  0xbe   :  { %v5294_v35 = vpop.xlane.xlu0 %485 }
  0xc0   :  { %v5313_v49 = vpop.xlane.xlu1 %500 }
  0xc2   :  { %v5316_v4 = vpop.xlane.xlu0 %495 }
  0xc4   :  { %v5321_v40 = vpop.xlane.xlu1 %510 }
  0xc6   :  { %v5334_v34 = vpop.xlane.xlu0 %505 }
  0xc8   :  { %v5347_v48 = vpop.xlane.xlu1 %520 }
  0xca   :  { %v5351_v22 = vpop.xlane.xlu0 %515 }
  0xf5   :  { %v3342_v59 = vpop.f32.mrb[0].mxu1 }
  0xf6   :  { %v1044_v54 = vpop.f32.mrb[1].mxu1  ;;  %v1301_v23 = vmul.f32 %v5319_v51, %v3342_v59  ;;  %v5353_v59 = vpop.eup %3767 }
  0xf7   :  { %v3343_v47 = vpop.f32.mrb[2].mxu1  ;;  %v1299_v13 = vmul.f32 %v5340_v3, %v1044_v54  ;;  %7118 = vst [vmem:[#allocation34_spill] sm:$0xff] %v5353_v59  ;;  %v735_v54 = vmax.f32 %v5185_v7, 1.0 }
  0xf8   :  { %v1302_v9 = vmul.f32 %v5331_v21, %v3343_v47  ;;  %v1047_v1 = vpop.f32.mrb[3].mxu1  ;;  %v5355_v47 = vpop.eup %3769 }
  0xf9   :  { %v1300_v19 = vmul.f32 %v5336_v6, %v1047_v1  ;;  %v5358_v32 = vpop.eup %3771  ;;  %v734_v6 = vmax.f32 %v5194_v61, 1.0  ;;  %3781 = vrsqrt.f32 %v735_v54  ;;  %v5370_v21 = vpop.xlane.xlu0 %525 }
  0xfa   :  { %v1364_v50 = vpack.c.bf16 %v1302_v9, %v1301_v23  ;;  %7119 = vst [vmem:[#allocation35_spill] sm:$0xff] %v5358_v32  ;;  %v7120_v23 = vmov 0   ;;  %v737_v9 = vmax.f32 %v5227_v25, 1.0  ;;  %v5373_v36 = vpop.eup %3773 }
  0xfb   :  { %v1363_v41 = vpack.c.bf16 %v1300_v19, %v1299_v13  ;;  %7121 = vst [vmem:[#allocation36_spill] sm:$0xff] %v5373_v36 }
  0xfc   :  { %3783 = vrsqrt.f32 %v737_v9  ;;  %v741_v9 = vmax.f32 %v5313_v49, 1.0 }
  0xfd   :  { %v3346_v62 = vpop.f32.mrb[4].mxu1  ;;  %1396 = vmatpush1.bf16.msra.mxu1 %v1363_v41  ;;  %v5366_v41 = vpop.xlane.xlu1 %530  ;;  %3785 = vrsqrt.f32 %v736_v39  ;;  %v740_v39 = vmax.f32 %v5316_v4, 1.0 }
  0xfe   :  { %v1060_v0 = vpop.f32.mrb[5].mxu1  ;;  %1397 = vmatprep.subr.bf16.mxu1 %v7120_v23  ;;  %v1305_v13 = vmul.f32 %v5355_v47, %v3346_v62  ;;  %3787 = vrsqrt.f32 %v734_v6 }
  0xff   :  { %v3347_v1 = vpop.f32.mrb[6].mxu1  ;;  %v1303_v7 = vmul.f32 %v5358_v32, %v1060_v0 }
 0x100   :  { %v1306_v20 = vmul.f32 %v5353_v59, %v3347_v1  ;;  %v1063_v19 = vpop.f32.mrb[7].mxu1  ;;  %v5375_v1 = vpop.eup %3775 }
 0x101   :  { %v1304_v3 = vmul.f32 %v5349_v52, %v1063_v19  ;;  %1398 = vmatpush1.bf16.msra.mxu1 %v1364_v50  ;;  %v5377_v61 = vpop.eup %3777  ;;  %v739_v50 = vmax.f32 %v5286_v42, 1.0  ;;  %v738_v42 = vmax.f32 %v5294_v35, 1.0  ;;  %v5403_v35 = vpack.c.bf16 %v5200_v5, %v5205_v18 }
 0x102   :  { %v1366_v25 = vpack.c.bf16 %v1306_v20, %v1305_v13  ;;  %1399 = vmatprep.subr.bf16.mxu1 %v7120_v23  ;;  %v5380_v54 = vpop.eup %3779  ;;  %v5384_v13 = vpop.xlane.xlu1 %540  ;;  %v745_v5 = vmax.f32 %v5347_v48, 1.0 }
 0x103   :  { %v1365_v62 = vpack.c.bf16 %v1304_v3, %v1303_v7  ;;  %v5387_v20 = vpop.xlane.xlu0 %535  ;;  %3789 = vrsqrt.f32 %v739_v50  ;;  %v5395_v4 = vpop.eup %3781  ;;  %7123 = vst [vmem:[#allocation38_spill] sm:$0xff] %v5403_v35 }
 0x104   :  { %3791 = vrsqrt.f32 %v741_v9  ;;  %7122 = vst [vmem:[#allocation37_spill] sm:$0xff] %v5395_v4 }
 0x105   :  { %v3350_v0 = vpop.f32.mrb[8].mxu1  ;;  %1400 = vmatpush1.bf16.msra.mxu1 %v1365_v62  ;;  %3793 = vrsqrt.f32 %v740_v39 }
 0x106   :  { %v1076_v19 = vpop.f32.mrb[9].mxu1  ;;  %1401 = vmatprep.subr.bf16.mxu1 %v7120_v23  ;;  %v1309_v6 = vmul.f32 %v5377_v61, %v3350_v0  ;;  %v5397_v0 = vpop.eup %3783  ;;  %3795 = vrsqrt.f32 %v738_v42 }
 0x107   :  { %v3351_v3 = vpop.f32.mrb[10].mxu1  ;;  %v1307_v52 = vmul.f32 %v5380_v54, %v1076_v19  ;;  %v5409_v50 = vpop.eup %3785 }
 0x108   :  { %v1310_v7 = vmul.f32 %v5375_v1, %v3351_v3  ;;  %v1079_v62 = vpop.f32.mrb[11].mxu1  ;;  %v5399_v3 = vpop.xlane.xlu1 %550 }
 0x109   :  { %v1308_v32 = vmul.f32 %v5373_v36, %v1079_v62  ;;  %1402 = vmatpush1.bf16.msra.mxu1 %v1366_v25  ;;  %v5407_v25 = vpack.c.bf16 %v5232_v63, %v5237_v58  ;;  %v5414_v9 = vpop.eup %3787 }
 0x10a   :  { %v1368_v49 = vpack.c.bf16 %v1310_v7, %v1309_v6  ;;  %1403 = vmatprep.subr.bf16.mxu1 %v7120_v23  ;;  %v744_v6 = vmax.f32 %v5351_v22, 1.0 }
 0x10b   :  { %v1367_v59 = vpack.c.bf16 %v1308_v32, %v1307_v52  ;;  %7124 = vst [vmem:[#allocation39_spill] sm:$0xff] %v5407_v25  ;;  %v743_v52 = vmax.f32 %v5321_v40, 1.0  ;;  %v5412_v32 = vpop.xlane.xlu0 %545 }
 0x10c   :  { %v561_v48 = vpop.xlane.xlu1 %560 }
 0x10d   :  { %v3354_v19 = vpop.f32.mrb[12].mxu1  ;;  %1404 = vmatpush1.bf16.msra.mxu1 %v1367_v59  ;;  %v742_v59 = vmax.f32 %v5334_v34, 1.0  ;;  %3797 = vrsqrt.f32 %v743_v52  ;;  %v5425_v36 = vpop.eup %3789  ;;  %v5431_v34 = vpack.c.bf16 %v5265_v46, %v5270_v38  ;;  %v748_v38 = vmax.f32 %v5387_v20, 1.0 }
 0x10e   :  { %v1092_v39 = vpop.f32.mrb[13].mxu1  ;;  %1405 = vmatprep.subr.bf16.mxu1 %v7120_v23  ;;  %v1313_v63 = vmul.f32 %v5409_v50, %v3354_v19  ;;  %3799 = vrsqrt.f32 %v745_v5  ;;  %7125 = vst [vmem:[#allocation40_spill] sm:$0xff] %v5425_v36  ;;  %v747_v5 = vmax.f32 %v5366_v41, 1.0  ;;  %v746_v41 = vmax.f32 %v5370_v21, 1.0 }
 0x10f   :  { %v3355_v18 = vpop.f32.mrb[14].mxu1  ;;  %v1311_v40 = vmul.f32 %v5414_v9, %v1092_v39  ;;  %3801 = vrsqrt.f32 %v744_v6  ;;  %v556_v19 = vpop.xlane.xlu0 %555  ;;  %7127 = vst [vmem:[#allocation42_spill] sm:$0xff] %v5431_v34 }
 0x110   :  { %v1314_v58 = vmul.f32 %v5397_v0, %v3355_v18  ;;  %v1095_v7 = vpop.f32.mrb[15].mxu1  ;;  %v5427_v18 = vpop.eup %3791  ;;  %3803 = vrsqrt.f32 %v742_v59 }
 0x111   :  { %v1312_v62 = vmul.f32 %v5395_v4, %v1095_v7  ;;  %1406 = vmatpush1.bf16.msra.mxu1 %v1368_v49  ;;  %7126 = vst [vmem:[#allocation41_spill] sm:$0xff] %v5427_v18  ;;  %v5435_v49 = vpack.c.bf16 %v5302_v56, %v5307_v12  ;;  %v5437_v52 = vpop.eup %3793  ;;  %v5444_v7 = vpop.xlane.xlu1 %570  ;;  %3805 = vrsqrt.f32 %v747_v5 }
 0x112   :  { %v1370_v42 = vpack.c.bf16 %v1314_v58, %v1313_v63  ;;  %1407 = vmatprep.subr.bf16.mxu1 %v7120_v23  ;;  %v5440_v63 = vpop.eup %3795  ;;  %v749_v58 = vmax.f32 %v5384_v13, 1.0 }
 0x113   :  { %v1369_v22 = vpack.c.bf16 %v1312_v62, %v1311_v40  ;;  %7128 = vst [vmem:[#allocation43_spill] sm:$0xff] %v5435_v49  ;;  %v5447_v56 = vpop.xlane.xlu0 %565 }
 0x114   :  { %3807 = vrsqrt.f32 %v749_v58  ;;  %v753_v58 = vmax.f32 %v561_v48, 1.0 }
 0x115   :  { %v3358_v39 = vpop.f32.mrb[16].mxu1  ;;  %1408 = vmatpush1.bf16.msra.mxu1 %v1369_v22  ;;  %3809 = vrsqrt.f32 %v748_v38 }
 0x116   :  { %v1108_v6 = vpop.f32.mrb[17].mxu1  ;;  %1409 = vmatprep.subr.bf16.mxu1 %v7120_v23  ;;  %v1317_v12 = vmul.f32 %v5437_v52, %v3358_v39  ;;  %3811 = vrsqrt.f32 %v746_v41 }
 0x117   :  { %v3359_v46 = vpop.f32.mrb[18].mxu1  ;;  %v1315_v62 = vmul.f32 %v5440_v63, %v1108_v6  ;;  %v5455_v20 = vpop.eup %3797  ;;  %v751_v6 = vmax.f32 %v5399_v3, 1.0 }
 0x118   :  { %v1318_v59 = vmul.f32 %v5427_v18, %v3359_v46  ;;  %v1111_v40 = vpop.f32.mrb[19].mxu1  ;;  %7129 = vst [vmem:[#allocation44_spill] sm:$0xff] %v5455_v20  ;;  %v5457_v39 = vpop.eup %3799 }
 0x119   :  { %v1316_v22 = vmul.f32 %v5425_v36, %v1111_v40  ;;  %1410 = vmatpush1.bf16.msra.mxu1 %v1370_v42  ;;  %7130 = vst [vmem:[#allocation45_spill] sm:$0xff] %v5457_v39  ;;  %v581_v46 = vpop.xlane.xlu1 %580  ;;  %v5459_v18 = vpop.eup %3801  ;;  %v752_v40 = vmax.f32 %v556_v19, 1.0  ;;  %3813 = vrsqrt.f32 %v751_v6 }
 0x11a   :  { %v1372_v13 = vpack.c.bf16 %v1318_v59, %v1317_v12  ;;  %1411 = vmatprep.subr.bf16.mxu1 %v7120_v23  ;;  %7131 = vst [vmem:[#allocation46_spill] sm:$0xff] %v5459_v18  ;;  %v576_v42 = vpop.xlane.xlu0 %575  ;;  %v5462_v5 = vpop.eup %3803  ;;  %3815 = vrsqrt.f32 %v753_v58  ;;  %v754_v58 = vmax.f32 %v5447_v56, 1.0 }
 0x11b   :  { %v1371_v4 = vpack.c.bf16 %v1316_v22, %v1315_v62  ;;  %7132 = vst [vmem:[#allocation47_spill] sm:$0xff] %v5462_v5  ;;  %v750_v22 = vmax.f32 %v5412_v32, 1.0  ;;  %v5473_v19 = vpop.eup %3805  ;;  %3817 = vrsqrt.f32 %v752_v40 }
 0x11c   :  { %7133 = vst [vmem:[#allocation48_spill] sm:$0xff] %v5473_v19 }
 0x11d   :  { %v3362_v21 = vpop.f32.mrb[20].mxu1  ;;  %1412 = vmatpush1.bf16.msra.mxu1 %v1371_v4  ;;  %v5471_v48 = vpop.xlane.xlu1 %590  ;;  %3819 = vrsqrt.f32 %v750_v22  ;;  %v755_v22 = vmax.f32 %v5444_v7, 1.0 }
 0x11e   :  { %v1124_v12 = vpop.f32.mrb[21].mxu1  ;;  %1413 = vmatprep.subr.bf16.mxu1 %v7120_v23  ;;  %v1321_v38 = vmul.f32 %v5459_v18, %v3362_v21 }
 0x11f   :  { %v3363_v59 = vpop.f32.mrb[22].mxu1  ;;  %v1319_v4 = vmul.f32 %v5462_v5, %v1124_v12 }
 0x120   :  { %v1322_v41 = vmul.f32 %v5457_v39, %v3363_v59  ;;  %v1127_v62 = vpop.f32.mrb[23].mxu1  ;;  %v586_v59 = vpop.xlane.xlu0 %585 }
 0x121   :  { %v1320_v3 = vmul.f32 %v5455_v20, %v1127_v62  ;;  %1414 = vmatpush1.bf16.msra.mxu1 %v1372_v13  ;;  %v5475_v39 = vpop.eup %3807  ;;  %v756_v13 = vmax.f32 %v576_v42, 1.0  ;;  %v757_v62 = vmax.f32 %v581_v46, 1.0  ;;  %v601_v20 = vpop.xlane.xlu1 %600 }
 0x122   :  { %v1374_v36 = vpack.c.bf16 %v1322_v41, %v1321_v38  ;;  %1415 = vmatprep.subr.bf16.mxu1 %v7120_v23  ;;  %v5477_v32 = vpop.eup %3809 }
 0x123   :  { %v1373_v21 = vpack.c.bf16 %v1320_v3, %v1319_v4  ;;  %v5479_v6 = vpop.eup %3811  ;;  %3821 = vrsqrt.f32 %v756_v13  ;;  %v758_v13 = vmax.f32 %v586_v59, 1.0 }
 0x124   :  { %7134 = vst [vmem:[#allocation49_spill] sm:$0xff] %v5479_v6  ;;  %v596_v5 = vpop.xlane.xlu0 %595  ;;  %3823 = vrsqrt.f32 %v754_v58  ;;  %v5489_v56 = vpop.eup %3813 }
 0x125   :  { %v3366_v12 = vpop.f32.mrb[24].mxu1  ;;  %1416 = vmatpush1.bf16.msra.mxu1 %v1373_v21  ;;  %7135 = vst [vmem:[#allocation50_spill] sm:$0xff] %v5489_v56  ;;  %3825 = vrsqrt.f32 %v757_v62 }
 0x126   :  { %v1140_v38 = vpop.f32.mrb[25].mxu1  ;;  %1417 = vmatprep.subr.bf16.mxu1 %v7120_v23  ;;  %v1325_v40 = vmul.f32 %v5477_v32, %v3366_v12  ;;  %v5491_v12 = vpop.eup %3815  ;;  %3827 = vrsqrt.f32 %v755_v22 }
 0x127   :  { %v3367_v41 = vpop.f32.mrb[26].mxu1  ;;  %v1323_v21 = vmul.f32 %v5479_v6, %v1140_v38  ;;  %v5493_v7 = vpop.eup %3817  ;;  %v760_v38 = vmax.f32 %v596_v5, 1.0 }
 0x128   :  { %v1326_v4 = vmul.f32 %v5475_v39, %v3367_v41  ;;  %v1143_v3 = vpop.f32.mrb[27].mxu1  ;;  %7136 = vst [vmem:[#allocation51_spill] sm:$0xff] %v5493_v7 }
 0x129   :  { %v1324_v42 = vmul.f32 %v5473_v19, %v1143_v3  ;;  %1418 = vmatpush1.bf16.msra.mxu1 %v1374_v36  ;;  %v5495_v3 = vpop.eup %3819  ;;  %v606_v19 = vpop.xlane.xlu0 %605  ;;  %3829 = vrsqrt.f32 %v760_v38 }
 0x12a   :  { %v1376_v18 = vpack.c.bf16 %v1326_v4, %v1325_v40  ;;  %1419 = vmatprep.subr.bf16.mxu1 %v7120_v23  ;;  %v611_v40 = vpop.xlane.xlu1 %610  ;;  %v761_v4 = vmax.f32 %v601_v20, 1.0  ;;  %3831 = vrsqrt.f32 %v758_v13 }
 0x12b   :  { %v1375_v46 = vpack.c.bf16 %v1324_v42, %v1323_v21  ;;  %v759_v42 = vmax.f32 %v5471_v48, 1.0 }
 0x12c   :  { %3833 = vrsqrt.f32 %v761_v4 }
 0x12d   :  { %v3370_v41 = vpop.f32.mrb[28].mxu1  ;;  %1420 = vmatpush1.bf16.msra.mxu1 %v1375_v46  ;;  %v5504_v59 = vpop.eup %3821  ;;  %3835 = vrsqrt.f32 %v759_v42 }
 0x12e   :  { %v1156_v36 = vpop.f32.mrb[29].mxu1  ;;  %1421 = vmatprep.subr.bf16.mxu1 %v7120_v23  ;;  %v1329_v62 = vmul.f32 %v5493_v7, %v3370_v41  ;;  %7137 = vst [vmem:[#allocation52_spill] sm:$0xff] %v5504_v59  ;;  %v616_v41 = vpop.xlane.xlu0 %615 }
 0x12f   :  { %v3371_v58 = vpop.f32.mrb[30].mxu1  ;;  %v1327_v46 = vmul.f32 %v5495_v3, %v1156_v36  ;;  %v5506_v7 = vpop.eup %3823 }
 0x130   :  { %v1330_v21 = vmul.f32 %v5491_v12, %v3371_v58  ;;  %v1159_v22 = vpop.f32.mrb[31].mxu1  ;;  %7138 = vst [vmem:[#allocation53_spill] sm:$0xff] %v5506_v7  ;;  %v621_v58 = vpop.xlane.xlu1 %620 }
 0x131   :  { %v1328_v5 = vmul.f32 %v5489_v56, %v1159_v22  ;;  %1422 = vmatpush1.bf16.msra.mxu1 %v1376_v18  ;;  %v5508_v48 = vpop.eup %3825  ;;  %v764_v22 = vmax.f32 %v616_v41, 1.0  ;;  %v763_v56 = vmax.f32 %v611_v40, 1.0  ;;  %v3887_v41 = vld [vmem:[%s6930_s0 + $0x68] sm:$0xff] }
 0x132   :  { %v1378_v6 = vpack.c.bf16 %v1330_v21, %v1329_v62  ;;  %1423 = vmatprep.subr.bf16.mxu1 %v7120_v23  ;;  %7139 = vst [vmem:[#allocation54_spill] sm:$0xff] %v5508_v48  ;;  %v5510_v18 = vpop.eup %3827  ;;  %v762_v62 = vmax.f32 %v606_v19, 1.0 }
 0x133   :  { %v1377_v20 = vpack.c.bf16 %v1328_v5, %v1327_v46  ;;  %7140 = vst [vmem:[#allocation55_spill] sm:$0xff] %v5510_v18  ;;  %v765_v46 = vmax.f32 %v621_v58, 1.0  ;;  %3837 = vrsqrt.f32 %v764_v22  ;;  %v5526_v58 = vpop.eup %3829 }
 0x134   :  { %3839 = vrsqrt.f32 %v762_v62  ;;  %7141 = vst [vmem:[#allocation56_spill] sm:$0xff] %v5526_v58  ;;  %v5528_v40 = vpop.eup %3831 }
 0x135   :  { %1424 = vmatpush1.bf16.msra.mxu1 %v1377_v20  ;;  %v3374_v36 = vpop.f32.mrb[32].mxu1  ;;  %v3886_v20 = vld [vmem:[%s6930_s0 + $0x48] sm:$0xff]  ;;  %3841 = vrsqrt.f32 %v765_v46  ;;  %7142 = vst [vmem:[#allocation57_spill] sm:$0xff] %v5528_v40 }
 0x136   :  { %1425 = vmatprep.subr.bf16.mxu1 %v7120_v23  ;;  %v1333_v38 = vmul.f32 %v5504_v59, %v3374_v36  ;;  %v1172_v13 = vpop.f32.mrb[33].mxu1  ;;  %v5522_v36 = vpack.c.bf16 %v3887_v41, %v3886_v20  ;;  %3843 = vrsqrt.f32 %v763_v56  ;;  %v3888_v56 = vld [vmem:[%s6930_s0 + $0x40] sm:$0xff] }
 0x137   :  { %v1331_v4 = vmul.f32 %v5506_v7, %v1172_v13  ;;  %v3375_v21 = vpop.f32.mrb[34].mxu1 }
 0x138   :  { %v1334_v42 = vmul.f32 %v5508_v48, %v3375_v21  ;;  %v1175_v5 = vpop.f32.mrb[35].mxu1  ;;  %v5531_v21 = vpop.eup %3833 }
 0x139   :  { %1426 = vmatpush1.bf16.msra.mxu1 %v1378_v6  ;;  %v1332_v19 = vmul.f32 %v5510_v18, %v1175_v5  ;;  %7143 = vst [vmem:[#allocation58_spill] sm:$0xff] %v5531_v21  ;;  %v5534_v22 = vpop.eup %3835 }
 0x13a   :  { %v1380_v13 = vpack.c.bf16 %v1334_v42, %v1333_v38  ;;  %1684 = vmatprep.subr.bf16.mxu1 %v7120_v23  ;;  %7144 = vst [vmem:[#allocation59_spill] sm:$0xff] %v5534_v22  ;;  %v3889_v42 = vld [vmem:[%s6930_s0 + $0x60] sm:$0xff] }
 0x13b   :  { %v1379_v6 = vpack.c.bf16 %v1332_v19, %v1331_v4  ;;  %v5545_v20 = vpack.c.bf16 %v3889_v42, %v3888_v56 }
 0x13c   :  { %1428 = vmatmul.mubr.bf16.vlgmr.msra.gmra.mrb[64].mxu1 %v4166_v27 }
 0x13d   :  { %1435 = vmatprep.mubr.bf16.mxu1 %v5522_v36  ;;  %1685 = vmatpush1.bf16.msra.mxu1 %v1379_v6  ;;  %v3378_v5 = vpop.f32.mrb[36].mxu1  ;;  %7145 = vst [vmem:[#allocation60_spill] sm:$0xff] %v5545_v20  ;;  %v3890_v6 = vld [vmem:[%s6930_s0 + $0xa8] sm:$0xff]  ;;  %v5558_v56 = vpop.eup %3837 }
 0x13e   :  { %1686 = vmatprep.subr.bf16.mxu1 %v7120_v23  ;;  %v1337_v38 = vmul.f32 %v5526_v58, %v3378_v5  ;;  %v1188_v62 = vpop.f32.mrb[37].mxu1  ;;  %v3891_v5 = vld [vmem:[%s6930_s0 + $0x88] sm:$0xff]  ;;  %7147 = vst [vmem:[#allocation62_spill] sm:$0xff] %v5558_v56  ;;  %v5560_v42 = vpop.eup %3839 }
 0x13f   :  { %v1335_v4 = vmul.f32 %v5528_v40, %v1188_v62  ;;  %v3379_v46 = vpop.f32.mrb[38].mxu1  ;;  %v5554_v62 = vpack.c.bf16 %v3890_v6, %v3891_v5  ;;  %7148 = vst [vmem:[#allocation63_spill] sm:$0xff] %v5560_v42 }
 0x140   :  { %v1338_v41 = vmul.f32 %v5531_v21, %v3379_v46  ;;  %v1191_v19 = vpop.f32.mrb[39].mxu1  ;;  %v5563_v21 = vpop.eup %3841 }
 0x141   :  { %7146 = vst [vmem:[#allocation61_spill] sm:$0xff] %v5554_v62  ;;  %1687 = vmatpush1.bf16.msra.mxu1 %v1380_v13  ;;  %v1336_v40 = vmul.f32 %v5534_v22, %v1191_v19  ;;  %7149 = vst [vmem:[#allocation64_spill] sm:$0xff] %v5563_v21  ;;  %v5566_v5 = vpop.eup %3843  ;;  %v3893_v19 = vld [vmem:[%s6930_s0 + $0x80] sm:$0xff] }
 0x142   :  { %v1382_v58 = vpack.c.bf16 %v1338_v41, %v1337_v38  ;;  %1688 = vmatprep.subr.bf16.mxu1 %v7120_v23  ;;  %7150 = vst [vmem:[#allocation65_spill] sm:$0xff] %v5566_v5 }
 0x143   :  { %v1381_v46 = vpack.c.bf16 %v1336_v40, %v1335_v4  ;;  %v3892_v4 = vld [vmem:[%s6930_s0 + $0xa0] sm:$0xff] }
 0x144   :  { %1436 = vmatmul.mubr.bf16.gmra.mrb[68].mxu1 %v5545_v20  ;;  %v631_v20 = vpop.xlane.xlu1 %630 }
 0x145   :  { %1443 = vmatprep.mubr.bf16.mxu1 %v5554_v62  ;;  %1689 = vmatpush1.bf16.msra.mxu1 %v1381_v46  ;;  %v3382_v6 = vpop.f32.mrb[40].mxu1  ;;  %v5577_v46 = vpack.c.bf16 %v3892_v4, %v3893_v19  ;;  %v767_v4 = vmax.f32 %v631_v20, 1.0  ;;  %v3897_v20 = vld [vmem:[%s6930_s0 + $0xc0] sm:$0xff] }
 0x146   :  { %1690 = vmatprep.subr.bf16.mxu1 %v7120_v23  ;;  %v1341_v13 = vmul.f32 %v5558_v56, %v3382_v6  ;;  %v1204_v38 = vpop.f32.mrb[41].mxu1  ;;  %v3894_v6 = vld [vmem:[%s6930_s0 + $0xe8] sm:$0xff] }
 0x147   :  { %v1339_v41 = vmul.f32 %v5560_v42, %v1204_v38  ;;  %v3383_v40 = vpop.f32.mrb[42].mxu1  ;;  %7151 = vst [vmem:[#allocation66_spill] sm:$0xff] %v5577_v46  ;;  %v3895_v38 = vld [vmem:[%s6930_s0 + $0xc8] sm:$0xff]  ;;  %3845 = vrsqrt.f32 %v767_v4 }
 0x148   :  { %v1342_v22 = vmul.f32 %v5563_v21, %v3383_v40  ;;  %v1207_v62 = vpop.f32.mrb[43].mxu1  ;;  %v5586_v42 = vpack.c.bf16 %v3894_v6, %v3895_v38  ;;  %v626_v40 = vpop.xlane.xlu0 %625 }
 0x149   :  { %1691 = vmatpush1.bf16.msra.mxu1 %v1382_v58  ;;  %v1340_v56 = vmul.f32 %v5566_v5, %v1207_v62  ;;  %v766_v21 = vmax.f32 %v626_v40, 1.0  ;;  %v641_v6 = vpop.xlane.xlu1 %640  ;;  %v3903_v5 = vld [vmem:[%s6930_s0 + $0x148] sm:$0xff] }
 0x14a   :  { %7152 = vst [vmem:[#allocation67_spill] sm:$0xff] %v5586_v42  ;;  %v1384_v18 = vpack.c.bf16 %v1342_v22, %v1341_v13  ;;  %1692 = vmatprep.subr.bf16.mxu1 %v7120_v23  ;;  %v769_v58 = vmax.f32 %v641_v6, 1.0  ;;  %v3896_v22 = vld [vmem:[%s6930_s0 + $0xe0] sm:$0xff]  ;;  %v3899_v13 = vld [vmem:[%s6930_s0 + $0x108] sm:$0xff] }
 0x14b   :  { %v1383_v19 = vpack.c.bf16 %v1340_v56, %v1339_v41  ;;  %3847 = vrsqrt.f32 %v766_v21  ;;  %v5599_v56 = vpack.c.bf16 %v3896_v22, %v3897_v20  ;;  %v3898_v21 = vld [vmem:[%s6930_s0 + $0x128] sm:$0xff]  ;;  %v3900_v22 = vld [vmem:[%s6930_s0 + $0x120] sm:$0xff] }
 0x14c   :  { %1444 = vmatmul.mubr.bf16.gmra.mrb[72].mxu1 %v5577_v46  ;;  %v636_v62 = vpop.xlane.xlu0 %635  ;;  %3849 = vrsqrt.f32 %v769_v58  ;;  %v5607_v41 = vpack.c.bf16 %v3898_v21, %v3899_v13  ;;  %v3902_v13 = vld [vmem:[%s6930_s0 + $0x168] sm:$0xff] }
 0x14d   :  { %1451 = vmatprep.mubr.bf16.mxu1 %v5586_v42  ;;  %1693 = vmatpush1.bf16.msra.mxu1 %v1383_v19  ;;  %v768_v38 = vmax.f32 %v636_v62, 1.0  ;;  %7153 = vst [vmem:[#allocation68_spill] sm:$0xff] %v5599_v56  ;;  %v3386_v4 = vpop.f32.mrb[44].mxu1 }
 0x14e   :  { %1694 = vmatprep.subr.bf16.mxu1 %v7120_v23  ;;  %7154 = vst [vmem:[#allocation69_spill] sm:$0xff] %v5607_v41  ;;  %v1220_v40 = vpop.f32.mrb[45].mxu1 }
 0x14f   :  { %3851 = vrsqrt.f32 %v768_v38  ;;  %v3387_v6 = vpop.f32.mrb[46].mxu1 }
 0x150   :  { %v1223_v62 = vpop.f32.mrb[47].mxu1 }
 0x151   :  { %1695 = vmatpush1.bf16.msra.mxu1 %v1384_v18  ;;  %v5612_v19 = vpop.eup %3845  ;;  %v3901_v18 = vld [vmem:[%s6930_s0 + $0x100] sm:$0xff] }
 0x152   :  { %1696 = vmatprep.subr.bf16.mxu1 %v7120_v23  ;;  %7155 = vst [vmem:[#allocation70_spill] sm:$0xff] %v5612_v19  ;;  %v5622_v38 = vpack.c.bf16 %v3900_v22, %v3901_v18  ;;  %v1344_v21 = vmul.f32 %v5612_v19, %v1223_v62  ;;  %v651_v18 = vpop.xlane.xlu1 %650 }
 0x154   :  { %1452 = vmatmul.mubr.bf16.gmra.mrb[76].mxu1 %v5599_v56  ;;  %7157 = vst [vmem:[#allocation72_spill] sm:$0xff] %v5622_v38 }
 0x155   :  { %1459 = vmatprep.mubr.bf16.mxu1 %v5607_v41  ;;  %v5614_v58 = vpop.eup %3847  ;;  %v5632_v41 = vpack.c.bf16 %v3902_v13, %v3903_v5  ;;  %v771_v5 = vmax.f32 %v651_v18, 1.0  ;;  %v646_v13 = vpop.xlane.xlu0 %645 }
 0x156   :  { %7156 = vst [vmem:[#allocation71_spill] sm:$0xff] %v5614_v58  ;;  %v1343_v20 = vmul.f32 %v5614_v58, %v1220_v40  ;;  %v5634_v56 = vpop.eup %3849  ;;  %v661_v18 = vpop.xlane.xlu1 %660 }
 0x157   :  { %7158 = vst [vmem:[#allocation73_spill] sm:$0xff] %v5632_v41  ;;  %7159 = vst [vmem:[#allocation74_spill] sm:$0xff] %v5634_v56  ;;  %v1346_v22 = vmul.f32 %v5634_v56, %v3387_v6  ;;  %v3905_v6 = vld [vmem:[%s6930_s0 + $0x140] sm:$0xff]  ;;  %3853 = vrsqrt.f32 %v771_v5 }
 0x158   :  { %v1385_v42 = vpack.c.bf16 %v1344_v21, %v1343_v20  ;;  %v3904_v20 = vld [vmem:[%s6930_s0 + $0x160] sm:$0xff] }
 0x159   :  { %v5636_v46 = vpop.eup %3851  ;;  %v5649_v21 = vpack.c.bf16 %v3904_v20, %v3905_v6  ;;  %v773_v20 = vmax.f32 %v661_v18, 1.0  ;;  %v3911_v18 = vld [vmem:[%s6930_s0 + $0x1c8] sm:$0xff] }
 0x15a   :  { %7160 = vst [vmem:[#allocation75_spill] sm:$0xff] %v5636_v46  ;;  %v1345_v40 = vmul.f32 %v5636_v46, %v3386_v4  ;;  %1697 = vmatpush1.bf16.msra.mxu1 %v1385_v42  ;;  %v770_v4 = vmax.f32 %v646_v13, 1.0  ;;  %v3906_v42 = vld [vmem:[%s6930_s0 + $0x1a8] sm:$0xff]  ;;  %v656_v13 = vpop.xlane.xlu0 %655 }
 0x15b   :  { %1698 = vmatprep.subr.bf16.mxu1 %v7120_v23  ;;  %7161 = vst [vmem:[#allocation76_spill] sm:$0xff] %v5649_v21  ;;  %v772_v6 = vmax.f32 %v656_v13, 1.0 }
 0x15c   :  { %1460 = vmatmul.mubr.bf16.gmra.mrb[80].mxu1 %v5622_v38  ;;  %v1386_v62 = vpack.c.bf16 %v1346_v22, %v1345_v40  ;;  %v3907_v22 = vld [vmem:[%s6930_s0 + $0x188] sm:$0xff]  ;;  %3855 = vrsqrt.f32 %v770_v4  ;;  %v3390_v4 = vpop.f32.mrb[48].mxu1 }
 0x15d   :  { %1467 = vmatprep.mubr.bf16.mxu1 %v5632_v41  ;;  %v5657_v40 = vpack.c.bf16 %v3906_v42, %v3907_v22  ;;  %3857 = vrsqrt.f32 %v773_v20  ;;  %v3908_v42 = vld [vmem:[%s6930_s0 + $0x1a0] sm:$0xff]  ;;  %v3910_v22 = vld [vmem:[%s6930_s0 + $0x1e8] sm:$0xff]  ;;  %v1236_v13 = vpop.f32.mrb[49].mxu1 }
 0x15e   :  { %1699 = vmatpush1.bf16.msra.mxu1 %v1386_v62  ;;  %3859 = vrsqrt.f32 %v772_v6  ;;  %v3909_v62 = vld [vmem:[%s6930_s0 + $0x180] sm:$0xff]  ;;  %v5676_v20 = vpack.c.bf16 %v3910_v22, %v3911_v18  ;;  %v671_v6 = vpop.xlane.xlu1 %670  ;;  %v3391_v19 = vpop.f32.mrb[50].mxu1 }
 0x15f   :  { %7162 = vst [vmem:[#allocation77_spill] sm:$0xff] %v5657_v40  ;;  %1700 = vmatprep.subr.bf16.mxu1 %v7120_v23  ;;  %v5668_v5 = vpack.c.bf16 %v3908_v42, %v3909_v62  ;;  %v775_v58 = vmax.f32 %v671_v6, 1.0  ;;  %v666_v56 = vpop.xlane.xlu0 %665  ;;  %v1239_v42 = vpop.f32.mrb[51].mxu1 }
 0x160   :  { %7164 = vst [vmem:[#allocation79_spill] sm:$0xff] %v5676_v20  ;;  %v774_v62 = vmax.f32 %v666_v56, 1.0  ;;  %v3912_v56 = vld [vmem:[%s6930_s0 + $0x1e0] sm:$0xff] }
 0x161   :  { %7163 = vst [vmem:[#allocation78_spill] sm:$0xff] %v5668_v5  ;;  %v5678_v46 = vpop.eup %3853  ;;  %3861 = vrsqrt.f32 %v775_v58  ;;  %v3913_v58 = vld [vmem:[%s6930_s0 + $0x1c0] sm:$0xff] }
 0x162   :  { %7165 = vst [vmem:[#allocation80_spill] sm:$0xff] %v5678_v46  ;;  %3863 = vrsqrt.f32 %v774_v62  ;;  %v681_v18 = vpop.xlane.xlu1 %680  ;;  %v3915_v62 = vld [vmem:[%s6930_s0 + $0x208] sm:$0xff] }
 0x163   :  { %v777_v41 = vmax.f32 %v681_v18, 1.0  ;;  %v676_v6 = vpop.xlane.xlu0 %675 }
 0x164   :  { %1468 = vmatmul.mubr.bf16.gmra.mrb[84].mxu1 %v5649_v21  ;;  %v1348_v21 = vmul.f32 %v5678_v46, %v1239_v42  ;;  %v776_v7 = vmax.f32 %v676_v6, 1.0  ;;  %v5694_v42 = vpack.c.bf16 %v3912_v56, %v3913_v58 }
 0x165   :  { %1475 = vmatprep.mubr.bf16.mxu1 %v5657_v40  ;;  %3865 = vrsqrt.f32 %v777_v41 }
 0x166   :  { %v5680_v40 = vpop.eup %3855  ;;  %7168 = vst [vmem:[#allocation83_spill] sm:$0xff] %v5694_v42  ;;  %3867 = vrsqrt.f32 %v776_v7  ;;  %v691_v6 = vpop.xlane.xlu1 %690 }
 0x167   :  { %7166 = vst [vmem:[#allocation81_spill] sm:$0xff] %v5680_v40  ;;  %v1347_v22 = vmul.f32 %v5680_v40, %v1236_v13  ;;  %v5686_v48 = vpop.eup %3857  ;;  %v779_v41 = vmax.f32 %v691_v6, 1.0  ;;  %v686_v58 = vpop.xlane.xlu0 %685 }
 0x168   :  { %7167 = vst [vmem:[#allocation82_spill] sm:$0xff] %v5686_v48  ;;  %v5696_v13 = vpop.eup %3859  ;;  %v1350_v18 = vmul.f32 %v5686_v48, %v3391_v19  ;;  %v778_v46 = vmax.f32 %v686_v58, 1.0 }
 0x169   :  { %v1387_v38 = vpack.c.bf16 %v1348_v21, %v1347_v22  ;;  %7169 = vst [vmem:[#allocation84_spill] sm:$0xff] %v5696_v13  ;;  %v3914_v21 = vld [vmem:[%s6930_s0 + $0x228] sm:$0xff]  ;;  %v1349_v56 = vmul.f32 %v5696_v13, %v3390_v4  ;;  %3869 = vrsqrt.f32 %v779_v41 }
 0x16a   :  { %v5704_v22 = vpack.c.bf16 %v3914_v21, %v3915_v62  ;;  %v3394_v21 = vpop.f32.mrb[52].mxu1  ;;  %3871 = vrsqrt.f32 %v778_v46  ;;  %v701_v62 = vpop.xlane.xlu1 %700  ;;  %v3917_v46 = vld [vmem:[%s6930_s0 + $0x200] sm:$0xff] }
 0x16b   :  { %1701 = vmatpush1.bf16.msra.mxu1 %v1387_v38  ;;  %v1388_v40 = vpack.c.bf16 %v1350_v18, %v1349_v56  ;;  %v5711_v19 = vpop.eup %3861  ;;  %v1252_v7 = vpop.f32.mrb[53].mxu1  ;;  %v781_v38 = vmax.f32 %v701_v62, 1.0  ;;  %v3916_v18 = vld [vmem:[%s6930_s0 + $0x220] sm:$0xff]  ;;  %v3918_v62 = vld [vmem:[%s6930_s0 + $0x268] sm:$0xff] }
 0x16c   :  { %1476 = vmatmul.mubr.bf16.gmra.mrb[88].mxu1 %v5668_v5  ;;  %7170 = vst [vmem:[#allocation85_spill] sm:$0xff] %v5704_v22  ;;  %1702 = vmatprep.subr.bf16.mxu1 %v7120_v23  ;;  %7171 = vst [vmem:[#allocation86_spill] sm:$0xff] %v5711_v19  ;;  %v696_v4 = vpop.xlane.xlu0 %695  ;;  %v5713_v48 = vpop.eup %3863  ;;  %v5722_v56 = vpack.c.bf16 %v3916_v18, %v3917_v46 }
 0x16d   :  { %1483 = vmatprep.mubr.bf16.mxu1 %v5676_v20  ;;  %7172 = vst [vmem:[#allocation87_spill] sm:$0xff] %v5713_v48  ;;  %v3395_v6 = vpop.f32.mrb[54].mxu1  ;;  %v780_v58 = vmax.f32 %v696_v4, 1.0  ;;  %3873 = vrsqrt.f32 %v781_v38  ;;  %v3919_v4 = vld [vmem:[%s6930_s0 + $0x248] sm:$0xff] }
 0x16e   :  { %v1255_v41 = vpop.f32.mrb[55].mxu1  ;;  %v5731_v13 = vpack.c.bf16 %v3918_v62, %v3919_v4 }
 0x16f   :  { %1703 = vmatpush1.bf16.msra.mxu1 %v1388_v40  ;;  %v1351_v40 = vmul.f32 %v5713_v48, %v1252_v7  ;;  %3875 = vrsqrt.f32 %v780_v58  ;;  %v5734_v18 = vpop.eup %3865  ;;  %v3398_v58 = vpop.f32.mrb[56].mxu1 }
 0x170   :  { %1704 = vmatprep.subr.bf16.mxu1 %v7120_v23  ;;  %7173 = vst [vmem:[#allocation88_spill] sm:$0xff] %v5734_v18  ;;  %v706_v7 = vpop.xlane.xlu0 %705  ;;  %v5736_v48 = vpop.eup %3867  ;;  %v1354_v38 = vmul.f32 %v5734_v18, %v3395_v6 }
 0x171   :  { %7174 = vst [vmem:[#allocation89_spill] sm:$0xff] %v5736_v48  ;;  %v782_v5 = vmax.f32 %v706_v7, 1.0  ;;  %v1353_v59 = vmul.f32 %v5736_v48, %v3394_v21  ;;  %v1268_v4 = vpop.f32.mrb[57].mxu1  ;;  %v3920_v21 = vld [vmem:[%s6930_s0 + $0x260] sm:$0xff] }
 0x172   :  { %v3399_v7 = vpop.f32.mrb[58].mxu1 }
 0x173   :  { %v5742_v62 = vpop.eup %3869 }
 0x174   :  { %1484 = vmatmul.mubr.bf16.gmra.mrb[92].mxu1 %v5694_v42  ;;  %v711_v42 = vpop.xlane.xlu1 %710  ;;  %7175 = vst [vmem:[#allocation90_spill] sm:$0xff] %v5742_v62 }
 0x175   :  { %1491 = vmatprep.mubr.bf16.mxu1 %v5704_v22  ;;  %v1352_v22 = vmul.f32 %v5711_v19, %v1255_v41  ;;  %v783_v46 = vmax.f32 %v711_v42, 1.0  ;;  %v1390_v42 = vpack.c.bf16 %v1354_v38, %v1353_v59  ;;  %v3922_v38 = vld [vmem:[%s6930_s0 + $0x2a8] sm:$0xff] }
 0x177   :  { %v1389_v20 = vpack.c.bf16 %v1352_v22, %v1351_v40  ;;  %3877 = vrsqrt.f32 %v783_v46  ;;  %v716_v22 = vpop.xlane.xlu0 %715  ;;  %v5745_v40 = vpop.eup %3871 }
 0x178   :  { %3879 = vrsqrt.f32 %v782_v5  ;;  %v721_v41 = vpop.xlane.xlu1 %720  ;;  %7176 = vst [vmem:[#allocation91_spill] sm:$0xff] %v5745_v40  ;;  %v784_v19 = vmax.f32 %v716_v22, 1.0  ;;  %v3921_v5 = vld [vmem:[%s6930_s0 + $0x240] sm:$0xff]  ;;  %v1355_v59 = vmul.f32 %v5745_v40, %v1268_v4  ;;  %v1271_v46 = vpop.f32.mrb[59].mxu1 }
 0x179   :  { %1705 = vmatpush1.bf16.msra.mxu1 %v1389_v20  ;;  %v785_v6 = vmax.f32 %v721_v41, 1.0  ;;  %v5753_v20 = vpack.c.bf16 %v3920_v21, %v3921_v5  ;;  %v3923_v41 = vld [vmem:[%s6930_s0 + $0x288] sm:$0xff]  ;;  %v1356_v18 = vmul.f32 %v5742_v62, %v1271_v46  ;;  %v5765_v21 = vpop.eup %3873 }
 0x17a   :  { %1706 = vmatprep.subr.bf16.mxu1 %v7120_v23  ;;  %v5762_v22 = vpack.c.bf16 %v3922_v38, %v3923_v41  ;;  %7177 = vst [vmem:[#allocation92_spill] sm:$0xff] %v5765_v21  ;;  %v5768_v4 = vpop.eup %3875  ;;  %v3402_v38 = vpop.f32.mrb[60].mxu1 }
 0x17b   :  { %3881 = vrsqrt.f32 %v785_v6  ;;  %7178 = vst [vmem:[#allocation93_spill] sm:$0xff] %v5768_v4  ;;  %v1358_v6 = vmul.f32 %v5765_v21, %v3399_v7  ;;  %v1391_v5 = vpack.c.bf16 %v1356_v18, %v1355_v59  ;;  %v1357_v40 = vmul.f32 %v5768_v4, %v3398_v58  ;;  %v1284_v46 = vpop.f32.mrb[61].mxu1  ;;  %v3924_v18 = vld [vmem:[%s6930_s0 + $0x2a0] sm:$0xff] }
 0x17c   :  { %1492 = vmatmul.mubr.bf16.gmra.mrb[96].mxu1 %v5722_v56  ;;  %3883 = vrsqrt.f32 %v784_v19  ;;  %v3403_v62 = vpop.f32.mrb[62].mxu1  ;;  %v3925_v58 = vld [vmem:[%s6930_s0 + $0x280] sm:$0xff] }
 0x17d   :  { %1499 = vmatprep.mubr.bf16.mxu1 %v5731_v13  ;;  %1707 = vmatpush1.bf16.msra.mxu1 %v1390_v42  ;;  %v1392_v42 = vpack.c.bf16 %v1358_v6, %v1357_v40  ;;  %v5785_v7 = vpack.c.bf16 %v3924_v18, %v3925_v58  ;;  %v3926_v40 = vld [vmem:[%s6930_s0 + $0x2e8] sm:$0xff] }
 0x17e   :  { %1708 = vmatprep.subr.bf16.mxu1 %v7120_v23  ;;  %v3927_v6 = vld [vmem:[%s6930_s0 + $0x2c8] sm:$0xff] }
 0x17f   :  { %v5794_v21 = vpack.c.bf16 %v3926_v40, %v3927_v6  ;;  %v3933_v6 = vld [vmem:[%s6930_s0 + $0x300] sm:$0xff] }
 0x181   :  { %1709 = vmatpush1.bf16.msra.mxu1 %v1391_v5  ;;  %v5774_v19 = vpop.eup %3877  ;;  %v1287_v5 = vpop.f32.mrb[63].mxu1 }
 0x182   :  { %7179 = vst [vmem:[#allocation94_spill] sm:$0xff] %v5774_v19  ;;  %1710 = vmatprep.subr.bf16.mxu1 %v7120_v23  ;;  %v5777_v41 = vpop.eup %3879  ;;  %v1360_v4 = vmul.f32 %v5774_v19, %v1287_v5  ;;  %v3929_v5 = vld [vmem:[%s6930_s0 + $0x2c0] sm:$0xff]  ;;  %v3942_v19 = vld [vmem:[%s6930_s0 + $0x3e8] sm:$0xff] }
 0x183   :  { %7180 = vst [vmem:[#allocation95_spill] sm:$0xff] %v5777_v41  ;;  %v1359_v59 = vmul.f32 %v5777_v41, %v1284_v46 }
 0x184   :  { %1500 = vmatmul.mubr.bf16.gmra.mrb[100].mxu1 %v5753_v20 }
 0x185   :  { %1507 = vmatprep.mubr.bf16.mxu1 %v5762_v22  ;;  %1711 = vmatpush1.bf16.msra.mxu1 %v1392_v42  ;;  %v5797_v48 = vpop.eup %3881  ;;  %v1393_v58 = vpack.c.bf16 %v1360_v4, %v1359_v59  ;;  %v3928_v42 = vld [vmem:[%s6930_s0 + $0x2e0] sm:$0xff]  ;;  %v3930_v4 = vld [vmem:[%s6930_s0 + $0x328] sm:$0xff] }
 0x186   :  { %7181 = vst [vmem:[#allocation96_spill] sm:$0xff] %v5797_v48  ;;  %1712 = vmatprep.subr.bf16.mxu1 %v7120_v23  ;;  %v5800_v18 = vpop.eup %3883  ;;  %v1362_v46 = vmul.f32 %v5797_v48, %v3403_v62  ;;  %v5813_v62 = vpack.c.bf16 %v3928_v42, %v3929_v5  ;;  %v3932_v59 = vld [vmem:[%s6930_s0 + $0x320] sm:$0xff] }
 0x187   :  { %7182 = vst [vmem:[#allocation97_spill] sm:$0xff] %v5800_v18  ;;  %v1361_v41 = vmul.f32 %v5800_v18, %v3402_v38  ;;  %v3931_v38 = vld [vmem:[%s6930_s0 + $0x308] sm:$0xff]  ;;  %v3936_v5 = vld [vmem:[%s6930_s0 + $0x360] sm:$0xff] }
 0x188   :  { %v3944_v48 = vld [vmem:[%s6930_s0 + $0x3e0] sm:$0xff]  ;;  %v3946_v18 = vld [vmem:[%s6930_s0 + $0x428] sm:$0xff] }
 0x189   :  { %1713 = vmatpush1.bf16.msra.mxu1 %v1393_v58  ;;  %v1394_v40 = vpack.c.bf16 %v1362_v46, %v1361_v41  ;;  %v5821_v41 = vpack.c.bf16 %v3930_v4, %v3931_v38  ;;  %v5831_v46 = vpack.c.bf16 %v3932_v59, %v3933_v6  ;;  %v3934_v58 = vld [vmem:[%s6930_s0 + $0x368] sm:$0xff]  ;;  %v3937_v4 = vld [vmem:[%s6930_s0 + $0x340] sm:$0xff] }
 0x18a   :  { %1714 = vmatprep.subr.bf16.mxu1 %v7120_v23  ;;  %v5849_v38 = vpack.c.bf16 %v3936_v5, %v3937_v4  ;;  %v3938_v59 = vld [vmem:[%s6930_s0 + $0x3a8] sm:$0xff]  ;;  %v3941_v5 = vld [vmem:[%s6930_s0 + $0x380] sm:$0xff] }
 0x18b   :  { %v3939_v6 = vld [vmem:[%s6930_s0 + $0x388] sm:$0xff] }
 0x18c   :  { %1508 = vmatmul.mubr.bf16.gmra.mrb[104].mxu1 %v5785_v7 }
 0x18d   :  { %1515 = vmatprep.mubr.bf16.mxu1 %v5794_v21  ;;  %1715 = vmatpush1.bf16.msra.mxu1 %v1394_v40  ;;  %v3935_v40 = vld [vmem:[%s6930_s0 + $0x348] sm:$0xff] }
 0x18e   :  { %v5839_v42 = vpack.c.bf16 %v3934_v58, %v3935_v40  ;;  %v5857_v58 = vpack.c.bf16 %v3938_v59, %v3939_v6  ;;  %v3940_v40 = vld [vmem:[%s6930_s0 + $0x3a0] sm:$0xff]  ;;  %v3943_v59 = vld [vmem:[%s6930_s0 + $0x3c8] sm:$0xff] }
 0x18f   :  { %v5867_v4 = vpack.c.bf16 %v3940_v40, %v3941_v5  ;;  %v5875_v6 = vpack.c.bf16 %v3942_v19, %v3943_v59  ;;  %v3945_v40 = vld [vmem:[%s6930_s0 + $0x3c0] sm:$0xff]  ;;  %v3947_v19 = vld [vmem:[%s6930_s0 + $0x408] sm:$0xff] }
 0x190   :  { %v5885_v5 = vpack.c.bf16 %v3944_v48, %v3945_v40  ;;  %v5893_v59 = vpack.c.bf16 %v3946_v18, %v3947_v19  ;;  %v3949_v48 = vld [vmem:[%s6930_s0 + $0x400] sm:$0xff]  ;;  %v3951_v18 = vld [vmem:[%s6930_s0 + $0x448] sm:$0xff] }
 0x191   :  { %7183 = vst [vmem:[#allocation98_spill] sm:$0xff] %v5867_v4  ;;  %7184 = vst [vmem:[#allocation99_spill] sm:$0xff] %v5875_v6 }
 0x192   :  { %7185 = vst [vmem:[#allocation100_spill] sm:$0xff] %v5885_v5  ;;  %7186 = vst [vmem:[#allocation101_spill] sm:$0xff] %v5893_v59 }
 0x194   :  { %1516 = vmatmul.mubr.bf16.gmra.mrb[108].mxu1 %v5813_v62 }
 0x195   :  { %1523 = vmatprep.mubr.bf16.mxu1 %v5821_v41 }
 0x19c   :  { %1524 = vmatmul.mubr.bf16.gmra.mrb[112].mxu1 %v5831_v46 }
 0x19d   :  { %1531 = vmatprep.mubr.bf16.mxu1 %v5839_v42 }
 0x1a4   :  { %1532 = vmatmul.mubr.bf16.gmra.mrb[116].mxu1 %v5849_v38 }
 0x1a5   :  { %1539 = vmatprep.mubr.bf16.mxu1 %v5857_v58 }
 0x1ac   :  { %1540 = vmatmul.mubr.bf16.gmra.mrb[120].mxu1 %v5867_v4  ;;  %v3950_v4 = vld [vmem:[%s6930_s0 + $0x468] sm:$0xff] }
 0x1ad   :  { %1547 = vmatprep.mubr.bf16.mxu1 %v5875_v6  ;;  %v3948_v6 = vld [vmem:[%s6930_s0 + $0x420] sm:$0xff]  ;;  %v5911_v19 = vpack.c.bf16 %v3950_v4, %v3951_v18  ;;  %v3955_v4 = vld [vmem:[%s6930_s0 + $0x488] sm:$0xff] }
 0x1ae   :  { %v5903_v40 = vpack.c.bf16 %v3948_v6, %v3949_v48  ;;  %v3953_v6 = vld [vmem:[%s6930_s0 + $0x440] sm:$0xff] }
 0x1af   :  { %7188 = vst [vmem:[#allocation103_spill] sm:$0xff] %v5911_v19 }
 0x1b0   :  { %7187 = vst [vmem:[#allocation102_spill] sm:$0xff] %v5903_v40 }
 0x1b4   :  { %1548 = vmatmul.mubr.bf16.gmra.mrb[124].mxu1 %v5885_v5  ;;  %v3954_v5 = vld [vmem:[%s6930_s0 + $0x4a8] sm:$0xff] }
 0x1b5   :  { %1555 = vmatprep.mubr.bf16.mxu1 %v5893_v59  ;;  %v3952_v59 = vld [vmem:[%s6930_s0 + $0x460] sm:$0xff]  ;;  %v5929_v18 = vpack.c.bf16 %v3954_v5, %v3955_v4  ;;  %v3959_v5 = vld [vmem:[%s6930_s0 + $0x4c8] sm:$0xff] }
 0x1b6   :  { %v5921_v48 = vpack.c.bf16 %v3952_v59, %v3953_v6  ;;  %v3957_v59 = vld [vmem:[%s6930_s0 + $0x480] sm:$0xff] }
 0x1b7   :  { %7190 = vst [vmem:[#allocation105_spill] sm:$0xff] %v5929_v18 }
 0x1b8   :  { %7189 = vst [vmem:[#allocation104_spill] sm:$0xff] %v5921_v48 }
 0x1bc   :  { %1556 = vmatmul.mubr.bf16.gmra.mrb[128].mxu1 %v5903_v40  ;;  %v3958_v40 = vld [vmem:[%s6930_s0 + $0x4e8] sm:$0xff] }
 0x1bd   :  { %1563 = vmatprep.mubr.bf16.mxu1 %v5911_v19  ;;  %v3956_v19 = vld [vmem:[%s6930_s0 + $0x4a0] sm:$0xff]  ;;  %v5947_v4 = vpack.c.bf16 %v3958_v40, %v3959_v5  ;;  %v3963_v40 = vld [vmem:[%s6930_s0 + $0x508] sm:$0xff] }
 0x1be   :  { %v5939_v6 = vpack.c.bf16 %v3956_v19, %v3957_v59  ;;  %v3961_v19 = vld [vmem:[%s6930_s0 + $0x4c0] sm:$0xff] }
 0x1bf   :  { %7192 = vst [vmem:[#allocation107_spill] sm:$0xff] %v5947_v4 }
 0x1c0   :  { %7191 = vst [vmem:[#allocation106_spill] sm:$0xff] %v5939_v6 }
 0x1c4   :  { %1564 = vmatmul.mubr.bf16.gmra.mrb[132].mxu1 %v5921_v48  ;;  %v3962_v48 = vld [vmem:[%s6930_s0 + $0x528] sm:$0xff] }
 0x1c5   :  { %1571 = vmatprep.mubr.bf16.mxu1 %v5929_v18  ;;  %v3960_v18 = vld [vmem:[%s6930_s0 + $0x4e0] sm:$0xff]  ;;  %v5965_v5 = vpack.c.bf16 %v3962_v48, %v3963_v40  ;;  %v3967_v48 = vld [vmem:[%s6930_s0 + $0x548] sm:$0xff] }
 0x1c6   :  { %v5957_v59 = vpack.c.bf16 %v3960_v18, %v3961_v19  ;;  %v3965_v18 = vld [vmem:[%s6930_s0 + $0x500] sm:$0xff] }
 0x1c7   :  { %7194 = vst [vmem:[#allocation109_spill] sm:$0xff] %v5965_v5 }
 0x1c8   :  { %7193 = vst [vmem:[#allocation108_spill] sm:$0xff] %v5957_v59 }
 0x1cc   :  { %1572 = vmatmul.mubr.bf16.gmra.mrb[136].mxu1 %v5939_v6  ;;  %v3966_v6 = vld [vmem:[%s6930_s0 + $0x568] sm:$0xff] }
 0x1cd   :  { %1579 = vmatprep.mubr.bf16.mxu1 %v5947_v4  ;;  %v3964_v4 = vld [vmem:[%s6930_s0 + $0x520] sm:$0xff]  ;;  %v5983_v40 = vpack.c.bf16 %v3966_v6, %v3967_v48  ;;  %v3971_v6 = vld [vmem:[%s6930_s0 + $0x588] sm:$0xff] }
 0x1ce   :  { %v5975_v19 = vpack.c.bf16 %v3964_v4, %v3965_v18  ;;  %v3969_v4 = vld [vmem:[%s6930_s0 + $0x540] sm:$0xff] }
 0x1cf   :  { %7196 = vst [vmem:[#allocation111_spill] sm:$0xff] %v5983_v40 }
 0x1d0   :  { %7195 = vst [vmem:[#allocation110_spill] sm:$0xff] %v5975_v19 }
 0x1d4   :  { %1580 = vmatmul.mubr.bf16.gmra.mrb[140].mxu1 %v5957_v59  ;;  %v3970_v59 = vld [vmem:[%s6930_s0 + $0x5a8] sm:$0xff] }
 0x1d5   :  { %1587 = vmatprep.mubr.bf16.mxu1 %v5965_v5  ;;  %v3968_v5 = vld [vmem:[%s6930_s0 + $0x560] sm:$0xff]  ;;  %v6001_v48 = vpack.c.bf16 %v3970_v59, %v3971_v6  ;;  %v3975_v59 = vld [vmem:[%s6930_s0 + $0x5c8] sm:$0xff] }
 0x1d6   :  { %v5993_v18 = vpack.c.bf16 %v3968_v5, %v3969_v4  ;;  %v3973_v5 = vld [vmem:[%s6930_s0 + $0x580] sm:$0xff] }
 0x1d7   :  { %7198 = vst [vmem:[#allocation113_spill] sm:$0xff] %v6001_v48 }
 0x1d8   :  { %7197 = vst [vmem:[#allocation112_spill] sm:$0xff] %v5993_v18 }
 0x1dc   :  { %1588 = vmatmul.mubr.bf16.gmra.mrb[144].mxu1 %v5975_v19  ;;  %v3974_v19 = vld [vmem:[%s6930_s0 + $0x5e8] sm:$0xff] }
 0x1dd   :  { %1595 = vmatprep.mubr.bf16.mxu1 %v5983_v40  ;;  %v3972_v40 = vld [vmem:[%s6930_s0 + $0x5a0] sm:$0xff]  ;;  %v6019_v6 = vpack.c.bf16 %v3974_v19, %v3975_v59  ;;  %v3979_v19 = vld [vmem:[%s6930_s0 + $0x608] sm:$0xff] }
 0x1de   :  { %v6011_v4 = vpack.c.bf16 %v3972_v40, %v3973_v5  ;;  %v3977_v40 = vld [vmem:[%s6930_s0 + $0x5c0] sm:$0xff] }
 0x1df   :  { %7200 = vst [vmem:[#allocation115_spill] sm:$0xff] %v6019_v6 }
 0x1e0   :  { %7199 = vst [vmem:[#allocation114_spill] sm:$0xff] %v6011_v4 }
 0x1e4   :  { %1596 = vmatmul.mubr.bf16.gmra.mrb[148].mxu1 %v5993_v18  ;;  %v3978_v18 = vld [vmem:[%s6930_s0 + $0x628] sm:$0xff] }
 0x1e5   :  { %1603 = vmatprep.mubr.bf16.mxu1 %v6001_v48  ;;  %v3976_v48 = vld [vmem:[%s6930_s0 + $0x5e0] sm:$0xff]  ;;  %v6037_v59 = vpack.c.bf16 %v3978_v18, %v3979_v19  ;;  %v3983_v18 = vld [vmem:[%s6930_s0 + $0x648] sm:$0xff] }
 0x1e6   :  { %v6029_v5 = vpack.c.bf16 %v3976_v48, %v3977_v40  ;;  %v3981_v48 = vld [vmem:[%s6930_s0 + $0x600] sm:$0xff] }
 0x1e7   :  { %7202 = vst [vmem:[#allocation117_spill] sm:$0xff] %v6037_v59 }
 0x1e8   :  { %7201 = vst [vmem:[#allocation116_spill] sm:$0xff] %v6029_v5 }
 0x1ec   :  { %1604 = vmatmul.mubr.bf16.gmra.mrb[152].mxu1 %v6011_v4  ;;  %v3982_v4 = vld [vmem:[%s6930_s0 + $0x668] sm:$0xff] }
 0x1ed   :  { %1611 = vmatprep.mubr.bf16.mxu1 %v6019_v6  ;;  %v3980_v6 = vld [vmem:[%s6930_s0 + $0x620] sm:$0xff]  ;;  %v6055_v19 = vpack.c.bf16 %v3982_v4, %v3983_v18  ;;  %v3987_v4 = vld [vmem:[%s6930_s0 + $0x688] sm:$0xff] }
 0x1ee   :  { %v6047_v40 = vpack.c.bf16 %v3980_v6, %v3981_v48  ;;  %v3985_v6 = vld [vmem:[%s6930_s0 + $0x640] sm:$0xff] }
 0x1ef   :  { %7204 = vst [vmem:[#allocation119_spill] sm:$0xff] %v6055_v19 }
 0x1f0   :  { %7203 = vst [vmem:[#allocation118_spill] sm:$0xff] %v6047_v40 }
 0x1f4   :  { %1612 = vmatmul.mubr.bf16.gmra.mrb[156].mxu1 %v6029_v5  ;;  %v3986_v5 = vld [vmem:[%s6930_s0 + $0x6a8] sm:$0xff] }
 0x1f5   :  { %1619 = vmatprep.mubr.bf16.mxu1 %v6037_v59  ;;  %v3984_v59 = vld [vmem:[%s6930_s0 + $0x660] sm:$0xff]  ;;  %v6073_v18 = vpack.c.bf16 %v3986_v5, %v3987_v4  ;;  %v3991_v5 = vld [vmem:[%s6930_s0 + $0x6c8] sm:$0xff] }
 0x1f6   :  { %v6065_v48 = vpack.c.bf16 %v3984_v59, %v3985_v6  ;;  %v3989_v59 = vld [vmem:[%s6930_s0 + $0x680] sm:$0xff] }
 0x1f7   :  { %7206 = vst [vmem:[#allocation121_spill] sm:$0xff] %v6073_v18 }
 0x1f8   :  { %7205 = vst [vmem:[#allocation120_spill] sm:$0xff] %v6065_v48 }
 0x1fc   :  { %1620 = vmatmul.mubr.bf16.gmra.mrb[160].mxu1 %v6047_v40  ;;  %v3990_v40 = vld [vmem:[%s6930_s0 + $0x6e8] sm:$0xff] }
 0x1fd   :  { %1627 = vmatprep.mubr.bf16.mxu1 %v6055_v19  ;;  %v3988_v19 = vld [vmem:[%s6930_s0 + $0x6a0] sm:$0xff]  ;;  %v6091_v4 = vpack.c.bf16 %v3990_v40, %v3991_v5  ;;  %v3995_v40 = vld [vmem:[%s6930_s0 + $0x708] sm:$0xff] }
 0x1fe   :  { %v6083_v6 = vpack.c.bf16 %v3988_v19, %v3989_v59  ;;  %v3993_v19 = vld [vmem:[%s6930_s0 + $0x6c0] sm:$0xff] }
 0x1ff   :  { %7208 = vst [vmem:[#allocation123_spill] sm:$0xff] %v6091_v4 }
 0x200   :  { %7207 = vst [vmem:[#allocation122_spill] sm:$0xff] %v6083_v6 }
 0x204   :  { %1628 = vmatmul.mubr.bf16.gmra.mrb[164].mxu1 %v6065_v48  ;;  %v3994_v48 = vld [vmem:[%s6930_s0 + $0x728] sm:$0xff] }
 0x205   :  { %1635 = vmatprep.mubr.bf16.mxu1 %v6073_v18  ;;  %v3992_v18 = vld [vmem:[%s6930_s0 + $0x6e0] sm:$0xff]  ;;  %v6109_v5 = vpack.c.bf16 %v3994_v48, %v3995_v40  ;;  %v3999_v48 = vld [vmem:[%s6930_s0 + $0x748] sm:$0xff] }
 0x206   :  { %v6101_v59 = vpack.c.bf16 %v3992_v18, %v3993_v19  ;;  %v3997_v18 = vld [vmem:[%s6930_s0 + $0x700] sm:$0xff] }
 0x207   :  { %7210 = vst [vmem:[#allocation125_spill] sm:$0xff] %v6109_v5 }
 0x208   :  { %7209 = vst [vmem:[#allocation124_spill] sm:$0xff] %v6101_v59 }
 0x20c   :  { %1636 = vmatmul.mubr.bf16.gmra.mrb[168].mxu1 %v6083_v6  ;;  %v3998_v6 = vld [vmem:[%s6930_s0 + $0x768] sm:$0xff] }
 0x20d   :  { %1643 = vmatprep.mubr.bf16.mxu1 %v6091_v4  ;;  %v3996_v4 = vld [vmem:[%s6930_s0 + $0x720] sm:$0xff]  ;;  %v6127_v40 = vpack.c.bf16 %v3998_v6, %v3999_v48  ;;  %v4003_v6 = vld [vmem:[%s6930_s0 + $0x788] sm:$0xff] }
 0x20e   :  { %v6119_v19 = vpack.c.bf16 %v3996_v4, %v3997_v18  ;;  %v4001_v4 = vld [vmem:[%s6930_s0 + $0x740] sm:$0xff] }
 0x20f   :  { %7212 = vst [vmem:[#allocation127_spill] sm:$0xff] %v6127_v40 }
 0x210   :  { %7211 = vst [vmem:[#allocation126_spill] sm:$0xff] %v6119_v19 }
 0x214   :  { %1644 = vmatmul.mubr.bf16.gmra.mrb[172].mxu1 %v6101_v59  ;;  %v4002_v59 = vld [vmem:[%s6930_s0 + $0x7a8] sm:$0xff] }
 0x215   :  { %1651 = vmatprep.mubr.bf16.mxu1 %v6109_v5  ;;  %v4000_v5 = vld [vmem:[%s6930_s0 + $0x760] sm:$0xff]  ;;  %v6145_v48 = vpack.c.bf16 %v4002_v59, %v4003_v6  ;;  %v4007_v59 = vld [vmem:[%s6930_s0 + $0x7c8] sm:$0xff] }
 0x216   :  { %v6137_v18 = vpack.c.bf16 %v4000_v5, %v4001_v4  ;;  %v4005_v5 = vld [vmem:[%s6930_s0 + $0x780] sm:$0xff] }
 0x217   :  { %7213 = vst [vmem:[#allocation128_spill] sm:$0xff] %v6145_v48 }
 0x21c   :  { %1652 = vmatmul.mubr.bf16.gmra.mrb[176].mxu1 %v6119_v19  ;;  %v4006_v19 = vld [vmem:[%s6930_s0 + $0x7e8] sm:$0xff] }
 0x21d   :  { %1659 = vmatprep.mubr.bf16.mxu1 %v6127_v40  ;;  %v4004_v40 = vld [vmem:[%s6930_s0 + $0x7a0] sm:$0xff]  ;;  %v6163_v6 = vpack.c.bf16 %v4006_v19, %v4007_v59  ;;  %v4010_v19 = vld [vmem:[%s6930_s0 + $0x50] sm:$0xff] }
 0x21e   :  { %v6155_v4 = vpack.c.bf16 %v4004_v40, %v4005_v5  ;;  %v4009_v40 = vld [vmem:[%s6930_s0 + $0x7c0] sm:$0xff]  ;;  %v4011_v59 = vld [vmem:[%s6930_s0 + $0x70] sm:$0xff] }
 0x21f   :  { %7214 = vst [vmem:[#allocation129_spill] sm:$0xff] %v6163_v6 }
 0x224   :  { %1660 = vmatmul.mubr.bf16.gmra.mrb[180].mxu1 %v6137_v18 }
 0x225   :  { %1667 = vmatprep.mubr.bf16.mxu1 %v6145_v48  ;;  %v4008_v48 = vld [vmem:[%s6930_s0 + $0x7e0] sm:$0xff] }
 0x226   :  { %v6173_v5 = vpack.c.bf16 %v4008_v48, %v4009_v40  ;;  %v4012_v48 = vld [vmem:[%s6930_s0 + $0xb0] sm:$0xff] }
 0x227   :  { %v4013_v40 = vld [vmem:[%s6930_s0 + $0x90] sm:$0xff] }
 0x22c   :  { %1668 = vmatmul.mubr.bf16.gmra.mrb[184].mxu1 %v6155_v4 }
 0x22d   :  { %1675 = vmatprep.mubr.bf16.mxu1 %v6163_v6  ;;  %v6185_v6 = vpack.c.bf16 %v4011_v59, %v4010_v19  ;;  %v4014_v19 = vld [vmem:[%s6930_s0 + $0xf0] sm:$0xff] }
 0x22e   :  { %v4015_v59 = vld [vmem:[%s6930_s0 + $0xd0] sm:$0xff] }
 0x234   :  { %1676 = vmatmul.mubr.bf16.gmra.mrb[188].mxu1 %v6173_v5 }
 0x235   :  { %1716 = vmatprep.mubr.bf16.mxu1 %v4173_v31 }
 0x23c   :  { %1717 = vmatmul.mubr.bf16.vlgmr.msra.gmra.mrb[64].mxu1 %v4171_v30 }
 0x23d   :  { %1724 = vmatprep.mubr.bf16.mxu1 %v4140_v16  ;;  %v6195_v16 = vpack.c.bf16 %v4012_v48, %v4013_v40  ;;  %v4016_v48 = vld [vmem:[%s6930_s0 + $0x130] sm:$0xff] }
 0x23e   :  { %v4017_v40 = vld [vmem:[%s6930_s0 + $0x110] sm:$0xff] }
 0x244   :  { %1725 = vmatmul.mubr.bf16.gmra.mrb[68].mxu1 %v6185_v6 }
 0x245   :  { %1732 = vmatprep.mubr.bf16.mxu1 %v4230_v57  ;;  %v6205_v57 = vpack.c.bf16 %v4014_v19, %v4015_v59  ;;  %v4018_v19 = vld [vmem:[%s6930_s0 + $0x170] sm:$0xff] }
 0x246   :  { %v4019_v59 = vld [vmem:[%s6930_s0 + $0x150] sm:$0xff] }
 0x24c   :  { %1733 = vmatmul.mubr.bf16.gmra.mrb[72].mxu1 %v6195_v16 }
 0x24d   :  { %1740 = vmatprep.mubr.bf16.mxu1 %v4261_v11  ;;  %v6215_v11 = vpack.c.bf16 %v4016_v48, %v4017_v40  ;;  %v4020_v48 = vld [vmem:[%s6930_s0 + $0x1b0] sm:$0xff] }
 0x24e   :  { %v4021_v40 = vld [vmem:[%s6930_s0 + $0x190] sm:$0xff] }
 0x254   :  { %1741 = vmatmul.mubr.bf16.gmra.mrb[76].mxu1 %v6205_v57 }
 0x255   :  { %1748 = vmatprep.mubr.bf16.mxu1 %v4284_v24  ;;  %v6225_v24 = vpack.c.bf16 %v4018_v19, %v4019_v59  ;;  %v4022_v19 = vld [vmem:[%s6930_s0 + $0x1f0] sm:$0xff] }
 0x256   :  { %v4023_v59 = vld [vmem:[%s6930_s0 + $0x1d0] sm:$0xff] }
 0x25c   :  { %1749 = vmatmul.mubr.bf16.gmra.mrb[80].mxu1 %v6215_v11 }
 0x25d   :  { %1756 = vmatprep.mubr.bf16.mxu1 %v4316_v45  ;;  %v6235_v45 = vpack.c.bf16 %v4020_v48, %v4021_v40  ;;  %v4024_v48 = vld [vmem:[%s6930_s0 + $0x230] sm:$0xff] }
 0x25e   :  { %v4025_v40 = vld [vmem:[%s6930_s0 + $0x210] sm:$0xff] }
 0x264   :  { %1757 = vmatmul.mubr.bf16.gmra.mrb[84].mxu1 %v6225_v24 }
 0x265   :  { %1764 = vmatprep.mubr.bf16.mxu1 %v4342_v60  ;;  %v6245_v60 = vpack.c.bf16 %v4022_v19, %v4023_v59  ;;  %v3749_v19 = vld [vmem:[%s6931_s3] sm:$0xff]   ;;  %v3750_v59 = vld [vmem:[%s6931_s3 + $0x8] sm:$0xff]  }
 0x266   :  { %3404 = vmatprep.subr.bf16.mxu0 %v3749_v19 }
 0x267   :  { %3405 = vmatpush3.bf16.msra.mxu0 %v3749_v19  ;;  %v3752_v19 = vld [vmem:[%s6931_s3 + $0x18] sm:$0xff]  }
 0x268   :  { %3406 = vmatprep.subr.bf16.mxu0 %v3750_v59 }
 0x26b   :  { %3407 = vmatpush3.bf16.msra.mxu0 %v3750_v59  ;;  %v4029_v59 = vld [vmem:[%s6930_s0 + $0x290] sm:$0xff] }
 0x26c   :  { %1765 = vmatmul.mubr.bf16.gmra.mrb[88].mxu1 %v6235_v45 }
 0x26d   :  { %1772 = vmatprep.mubr.bf16.mxu1 %v4365_v8  ;;  %v6255_v8 = vpack.c.bf16 %v4024_v48, %v4025_v40  ;;  %v4027_v48 = vld [vmem:[%s6930_s0 + $0x250] sm:$0xff] }
 0x274   :  { %1773 = vmatmul.mubr.bf16.gmra.mrb[92].mxu1 %v6245_v60 }
 0x275   :  { %1780 = vmatprep.mubr.bf16.mxu1 %v4400_v28  ;;  %v4026_v28 = vld [vmem:[%s6930_s0 + $0x270] sm:$0xff] }
 0x276   :  { %v6271_v40 = vpack.c.bf16 %v4026_v28, %v4027_v48  ;;  %v4028_v28 = vld [vmem:[%s6930_s0 + $0x2b0] sm:$0xff] }
 0x277   :  { %v6287_v48 = vpack.c.bf16 %v4028_v28, %v4029_v59  ;;  %v4031_v28 = vld [vmem:[%s6930_s0 + $0x2d0] sm:$0xff] }
 0x278   :  { %7215 = vst [vmem:[#allocation130_spill] sm:$0xff] %v6271_v40 }
 0x279   :  { %7216 = vst [vmem:[#allocation131_spill] sm:$0xff] %v6287_v48 }
 0x27c   :  { %1781 = vmatmul.mubr.bf16.gmra.mrb[96].mxu1 %v6255_v8 }
 0x27d   :  { %1788 = vmatprep.mubr.bf16.mxu1 %v4429_v44  ;;  %v3751_v44 = vld [vmem:[%s6931_s3 + $0x10] sm:$0xff]  }
 0x27e   :  { %3408 = vmatprep.subr.bf16.mxu0 %v3751_v44 }
 0x27f   :  { %3409 = vmatpush3.bf16.msra.mxu0 %v3751_v44  ;;  %v4030_v44 = vld [vmem:[%s6930_s0 + $0x2f0] sm:$0xff] }
 0x280   :  { %3410 = vmatprep.subr.bf16.mxu0 %v3752_v19  ;;  %v6300_v59 = vpack.c.bf16 %v4030_v44, %v4031_v28  ;;  %v4032_v44 = vld [vmem:[%s6930_s0 + $0x330] sm:$0xff] }
 0x281   :  { %v4033_v28 = vld [vmem:[%s6930_s0 + $0x310] sm:$0xff] }
 0x282   :  { %7217 = vst [vmem:[#allocation132_spill] sm:$0xff] %v6300_v59 }
 0x283   :  { %3411 = vmatpush3.bf16.msra.mxu0 %v3752_v19  ;;  %v3754_v19 = vld [vmem:[%s6931_s3 + $0x28] sm:$0xff]  }
 0x284   :  { %1789 = vmatmul.mubr.bf16.gmra.mrb[100].mxu1 %v6271_v40 }
 0x285   :  { %1796 = vmatprep.mubr.bf16.mxu1 %v4455_v55  ;;  %v3753_v55 = vld [vmem:[%s6931_s3 + $0x20] sm:$0xff]  }
 0x286   :  { %3412 = vmatprep.subr.bf16.mxu0 %v3753_v55 }
 0x287   :  { %3413 = vmatpush3.bf16.msra.mxu0 %v3753_v55  ;;  %v3755_v55 = vld [vmem:[%s6931_s3 + $0x30] sm:$0xff]  }
 0x288   :  { %3414 = vmatprep.subr.bf16.mxu0 %v3754_v19 }
 0x28b   :  { %3415 = vmatpush3.bf16.msra.mxu0 %v3754_v19  ;;  %v3756_v19 = vld [vmem:[%s6931_s3 + $0x38] sm:$0xff]  }
 0x28c   :  { %1797 = vmatmul.mubr.bf16.gmra.mrb[104].mxu1 %v6287_v48  ;;  %3416 = vmatprep.subr.bf16.mxu0 %v3755_v55 }
 0x28d   :  { %1804 = vmatprep.mubr.bf16.mxu1 %v4490_v10  ;;  %v6316_v10 = vpack.c.bf16 %v4032_v44, %v4033_v28  ;;  %v4035_v44 = vld [vmem:[%s6930_s0 + $0x350] sm:$0xff] }
 0x28f   :  { %3417 = vmatpush3.bf16.msra.mxu0 %v3755_v55  ;;  %7218 = vst [vmem:[#allocation133_spill] sm:$0xff] %v6316_v10  ;;  %v4034_v55 = vld [vmem:[%s6930_s0 + $0x370] sm:$0xff] }
 0x290   :  { %3418 = vmatprep.subr.bf16.mxu0 %v3756_v19  ;;  %v6330_v28 = vpack.c.bf16 %v4034_v55, %v4035_v44  ;;  %v4038_v55 = vld [vmem:[%s6930_s0 + $0x3f0] sm:$0xff] }
 0x291   :  { %v4039_v44 = vld [vmem:[%s6930_s0 + $0x3d0] sm:$0xff] }
 0x292   :  { %7219 = vst [vmem:[#allocation134_spill] sm:$0xff] %v6330_v28 }
 0x293   :  { %3419 = vmatpush3.bf16.msra.mxu0 %v3756_v19  ;;  %v4036_v19 = vld [vmem:[%s6930_s0 + $0x3b0] sm:$0xff] }
 0x294   :  { %1805 = vmatmul.mubr.bf16.gmra.mrb[108].mxu1 %v6300_v59  ;;  %2518 = vmatprep.subr.bf16.mxu0 %v7120_v23 }
 0x295   :  { %1812 = vmatprep.mubr.bf16.mxu1 %v4526_v33 }
 0x29c   :  { %1813 = vmatmul.mubr.bf16.gmra.mrb[112].mxu1 %v6316_v10 }
 0x29d   :  { %1820 = vmatprep.mubr.bf16.mxu1 %v4547_v43  ;;  %v4037_v43 = vld [vmem:[%s6930_s0 + $0x390] sm:$0xff] }
 0x29e   :  { %v6340_v10 = vpack.c.bf16 %v4036_v19, %v4037_v43  ;;  %v4040_v43 = vld [vmem:[%s6930_s0 + $0x430] sm:$0xff] }
 0x29f   :  { %v4041_v19 = vld [vmem:[%s6930_s0 + $0x410] sm:$0xff] }
 0x2a0   :  { %7220 = vst [vmem:[#allocation135_spill] sm:$0xff] %v6340_v10 }
 0x2a4   :  { %1821 = vmatmul.mubr.bf16.gmra.mrb[116].mxu1 %v6330_v28 }
 0x2a5   :  { %1828 = vmatprep.mubr.bf16.mxu1 %v4584_v2  ;;  %v6350_v2 = vpack.c.bf16 %v4038_v55, %v4039_v44  ;;  %v4042_v55 = vld [vmem:[%s6930_s0 + $0x470] sm:$0xff] }
 0x2a6   :  { %v4043_v44 = vld [vmem:[%s6930_s0 + $0x450] sm:$0xff] }
 0x2a7   :  { %7221 = vst [vmem:[#allocation136_spill] sm:$0xff] %v6350_v2 }
 0x2ac   :  { %1829 = vmatmul.mubr.bf16.gmra.mrb[120].mxu1 %v6340_v10 }
 0x2ad   :  { %1836 = vmatprep.mubr.bf16.mxu1 %v4608_v17  ;;  %v6360_v17 = vpack.c.bf16 %v4040_v43, %v4041_v19  ;;  %v4044_v43 = vld [vmem:[%s6930_s0 + $0x4b0] sm:$0xff] }
 0x2ae   :  { %v4045_v19 = vld [vmem:[%s6930_s0 + $0x490] sm:$0xff] }
 0x2af   :  { %7222 = vst [vmem:[#allocation137_spill] sm:$0xff] %v6360_v17 }
 0x2b4   :  { %1837 = vmatmul.mubr.bf16.gmra.mrb[124].mxu1 %v6350_v2  ;;  %v4064_v2 = vld [vmem:[%s6930_s0 + $0x730] sm:$0xff] }
 0x2b5   :  { %1844 = vmatprep.mubr.bf16.mxu1 %v4664_v37  ;;  %v6370_v37 = vpack.c.bf16 %v4042_v55, %v4043_v44  ;;  %v4046_v55 = vld [vmem:[%s6930_s0 + $0x4f0] sm:$0xff] }
 0x2b6   :  { %v4047_v44 = vld [vmem:[%s6930_s0 + $0x4d0] sm:$0xff] }
 0x2b7   :  { %7223 = vst [vmem:[#allocation138_spill] sm:$0xff] %v6370_v37 }
 0x2bc   :  { %1845 = vmatmul.mubr.bf16.gmra.mrb[128].mxu1 %v6360_v17 }
 0x2bd   :  { %1852 = vmatprep.mubr.bf16.mxu1 %v4698_v26  ;;  %v6380_v26 = vpack.c.bf16 %v4044_v43, %v4045_v19  ;;  %v4048_v43 = vld [vmem:[%s6930_s0 + $0x530] sm:$0xff] }
 0x2be   :  { %v4049_v19 = vld [vmem:[%s6930_s0 + $0x510] sm:$0xff] }
 0x2bf   :  { %7224 = vst [vmem:[#allocation139_spill] sm:$0xff] %v6380_v26 }
 0x2c4   :  { %1853 = vmatmul.mubr.bf16.gmra.mrb[132].mxu1 %v6370_v37  ;;  %v7226_v37 = vld [vmem:[#allocation21_spill] sm:$0xff] }
 0x2c5   :  { %1860 = vmatprep.mubr.bf16.mxu1 %v4843_v29  ;;  %v6390_v29 = vpack.c.bf16 %v4046_v55, %v4047_v44  ;;  %v4050_v55 = vld [vmem:[%s6930_s0 + $0x570] sm:$0xff] }
 0x2c6   :  { %v4051_v44 = vld [vmem:[%s6930_s0 + $0x550] sm:$0xff] }
 0x2c7   :  { %7225 = vst [vmem:[#allocation140_spill] sm:$0xff] %v6390_v29 }
 0x2cc   :  { %1861 = vmatmul.mubr.bf16.gmra.mrb[136].mxu1 %v6380_v26  ;;  %v7228_v26 = vld [vmem:[#allocation22_spill] sm:$0xff] }
 0x2cd   :  { %1868 = vmatprep.mubr.bf16.mxu1 %v4878_v53  ;;  %v6400_v53 = vpack.c.bf16 %v4048_v43, %v4049_v19  ;;  %v4052_v43 = vld [vmem:[%s6930_s0 + $0x5b0] sm:$0xff] }
 0x2ce   :  { %v4053_v19 = vld [vmem:[%s6930_s0 + $0x590] sm:$0xff] }
 0x2cf   :  { %7227 = vst [vmem:[#allocation141_spill] sm:$0xff] %v6400_v53 }
 0x2d4   :  { %1869 = vmatmul.mubr.bf16.gmra.mrb[140].mxu1 %v6390_v29  ;;  %v7230_v29 = vld [vmem:[#allocation23_spill] sm:$0xff] }
 0x2d5   :  { %1876 = vmatprep.mubr.bf16.mxu1 %v7226_v37  ;;  %v6410_v37 = vpack.c.bf16 %v4050_v55, %v4051_v44  ;;  %v4054_v55 = vld [vmem:[%s6930_s0 + $0x5f0] sm:$0xff] }
 0x2d6   :  { %v4055_v44 = vld [vmem:[%s6930_s0 + $0x5d0] sm:$0xff] }
 0x2d7   :  { %7229 = vst [vmem:[#allocation142_spill] sm:$0xff] %v6410_v37 }
 0x2dc   :  { %1877 = vmatmul.mubr.bf16.gmra.mrb[144].mxu1 %v6400_v53  ;;  %v7232_v53 = vld [vmem:[#allocation25_spill] sm:$0xff] }
 0x2dd   :  { %1884 = vmatprep.mubr.bf16.mxu1 %v7228_v26  ;;  %v6420_v26 = vpack.c.bf16 %v4052_v43, %v4053_v19  ;;  %v4056_v43 = vld [vmem:[%s6930_s0 + $0x630] sm:$0xff] }
 0x2de   :  { %v4057_v19 = vld [vmem:[%s6930_s0 + $0x610] sm:$0xff] }
 0x2df   :  { %7231 = vst [vmem:[#allocation143_spill] sm:$0xff] %v6420_v26 }
 0x2e4   :  { %1885 = vmatmul.mubr.bf16.gmra.mrb[148].mxu1 %v6410_v37  ;;  %v7234_v37 = vld [vmem:[#allocation26_spill] sm:$0xff] }
 0x2e5   :  { %1892 = vmatprep.mubr.bf16.mxu1 %v7230_v29  ;;  %v6430_v29 = vpack.c.bf16 %v4054_v55, %v4055_v44  ;;  %v4058_v55 = vld [vmem:[%s6930_s0 + $0x670] sm:$0xff] }
 0x2e6   :  { %v4059_v44 = vld [vmem:[%s6930_s0 + $0x650] sm:$0xff] }
 0x2e7   :  { %7233 = vst [vmem:[#allocation144_spill] sm:$0xff] %v6430_v29 }
 0x2ec   :  { %1893 = vmatmul.mubr.bf16.gmra.mrb[152].mxu1 %v6420_v26  ;;  %v7236_v26 = vld [vmem:[#allocation27_spill] sm:$0xff] }
 0x2ed   :  { %1900 = vmatprep.mubr.bf16.mxu1 %v7232_v53  ;;  %v6440_v53 = vpack.c.bf16 %v4056_v43, %v4057_v19  ;;  %v4060_v43 = vld [vmem:[%s6930_s0 + $0x6b0] sm:$0xff] }
 0x2ee   :  { %v4061_v19 = vld [vmem:[%s6930_s0 + $0x690] sm:$0xff] }
 0x2ef   :  { %7235 = vst [vmem:[#allocation145_spill] sm:$0xff] %v6440_v53 }
 0x2f4   :  { %1901 = vmatmul.mubr.bf16.gmra.mrb[156].mxu1 %v6430_v29 }
 0x2f5   :  { %1908 = vmatprep.mubr.bf16.mxu1 %v7234_v37  ;;  %v6450_v37 = vpack.c.bf16 %v4058_v55, %v4059_v44 }
 0x2f7   :  { %7237 = vst [vmem:[#allocation146_spill] sm:$0xff] %v6450_v37 }
 0x2fc   :  { %1909 = vmatmul.mubr.bf16.gmra.mrb[160].mxu1 %v6440_v53 }
 0x2fd   :  { %1916 = vmatprep.mubr.bf16.mxu1 %v7236_v26  ;;  %v6460_v26 = vpack.c.bf16 %v4060_v43, %v4061_v19 }
 0x2ff   :  { %7238 = vst [vmem:[#allocation147_spill] sm:$0xff] %v6460_v26 }
 0x304   :  { %1917 = vmatmul.mubr.bf16.gmra.mrb[164].mxu1 %v6450_v37  ;;  %v4063_v37 = vld [vmem:[%s6930_s0 + $0x6d0] sm:$0xff] }
 0x305   :  { %1924 = vmatprep.mubr.bf16.mxu1 %v5325_v14  ;;  %v4062_v14 = vld [vmem:[%s6930_s0 + $0x6f0] sm:$0xff] }
 0x306   :  { %v6470_v53 = vpack.c.bf16 %v4062_v14, %v4063_v37  ;;  %v4065_v37 = vld [vmem:[%s6930_s0 + $0x710] sm:$0xff] }
 0x307   :  { %v6480_v14 = vpack.c.bf16 %v4064_v2, %v4065_v37  ;;  %v4067_v2 = vld [vmem:[%s6930_s0 + $0x750] sm:$0xff] }
 0x308   :  { %7239 = vst [vmem:[#allocation148_spill] sm:$0xff] %v6470_v53 }
 0x309   :  { %7240 = vst [vmem:[#allocation149_spill] sm:$0xff] %v6480_v14 }
 0x30c   :  { %1925 = vmatmul.mubr.bf16.gmra.mrb[168].mxu1 %v6460_v26 }
 0x30d   :  { %1932 = vmatprep.mubr.bf16.mxu1 %v5329_v15 }
 0x30f   :  { %v1718_v55 = vpop.f32.mrb[64].mxu1 }
 0x310   :  { %v1720_v44 = vpop.f32.mrb[65].mxu1  ;;  %v1973_v17 = vmax.f32 %v1718_v55, 0.0 }
 0x311   :  { %v1721_v29 = vpop.f32.mrb[66].mxu1 }
 0x312   :  { %v1974_v43 = vmax.f32 %v1721_v29, 0.0  ;;  %v1723_v19 = vpop.f32.mrb[67].mxu1 }
 0x314   :  { %1933 = vmatmul.mubr.bf16.gmra.mrb[172].mxu1 %v6470_v53  ;;  %v2037_v26 = vpack.c.bf16 %v1974_v43, %v1973_v17  ;;  %v4066_v43 = vld [vmem:[%s6930_s0 + $0x770] sm:$0xff] }
 0x315   :  { %1940 = vmatprep.mubr.bf16.mxu1 %v5403_v35  ;;  %v6490_v37 = vpack.c.bf16 %v4066_v43, %v4067_v2  ;;  %v4069_v43 = vld [vmem:[%s6930_s0 + $0x790] sm:$0xff] }
 0x316   :  { %3420 = vmatprep.mubr.bf16.mxu0 %v2037_v26 }
 0x317   :  { %v1726_v44 = vpop.f32.mrb[68].mxu1  ;;  %7241 = vst [vmem:[#allocation150_spill] sm:$0xff] %v6490_v37 }
 0x318   :  { %v1728_v15 = vpop.f32.mrb[69].mxu1  ;;  %v1975_v55 = vmax.f32 %v1726_v44, 0.0 }
 0x319   :  { %v1729_v29 = vpop.f32.mrb[70].mxu1 }
 0x31a   :  { %v1976_v19 = vmax.f32 %v1729_v29, 0.0  ;;  %v1731_v53 = vpop.f32.mrb[71].mxu1 }
 0x31c   :  { %v2038_v17 = vpack.c.bf16 %v1976_v19, %v1975_v55  ;;  %1941 = vmatmul.mubr.bf16.gmra.mrb[176].mxu1 %v6480_v14 }
 0x31d   :  { %1948 = vmatprep.mubr.bf16.mxu1 %v5407_v25  ;;  %v4068_v25 = vld [vmem:[%s6930_s0 + $0x7b0] sm:$0xff] }
 0x31e   :  { %3421 = vmatmul.mubr.bf16.vlgmr.msra.gmra.mrb[0].mxu0 %v2038_v17  ;;  %v6500_v2 = vpack.c.bf16 %v4068_v25, %v4069_v43  ;;  %v4071_v25 = vld [vmem:[%s6930_s0 + $0x7d0] sm:$0xff] }
 0x31f   :  { %v1734_v26 = vpop.f32.mrb[72].mxu1 }
 0x320   :  { %v1736_v15 = vpop.f32.mrb[73].mxu1  ;;  %v1977_v53 = vmax.f32 %v1734_v26, 0.0  ;;  %7242 = vst [vmem:[#allocation151_spill] sm:$0xff] %v6500_v2 }
 0x321   :  { %v1737_v44 = vpop.f32.mrb[74].mxu1 }
 0x322   :  { %v1978_v29 = vmax.f32 %v1737_v44, 0.0  ;;  %v1739_v55 = vpop.f32.mrb[75].mxu1 }
 0x324   :  { %v2039_v19 = vpack.c.bf16 %v1978_v29, %v1977_v53  ;;  %1949 = vmatmul.mubr.bf16.gmra.mrb[180].mxu1 %v6490_v37 }
 0x325   :  { %1956 = vmatprep.mubr.bf16.mxu1 %v5431_v34  ;;  %v4070_v34 = vld [vmem:[%s6930_s0 + $0x7f0] sm:$0xff] }
 0x326   :  { %3424 = vmatprep.mubr.bf16.mxu0 %v2039_v19  ;;  %v6510_v43 = vpack.c.bf16 %v4070_v34, %v4071_v25 }
 0x327   :  { %v1742_v17 = vpop.f32.mrb[76].mxu1 }
 0x328   :  { %v1744_v15 = vpop.f32.mrb[77].mxu1  ;;  %v1979_v44 = vmax.f32 %v1742_v17, 0.0  ;;  %7243 = vst [vmem:[#allocation152_spill] sm:$0xff] %v6510_v43 }
 0x329   :  { %v1745_v26 = vpop.f32.mrb[78].mxu1 }
 0x32a   :  { %v1980_v53 = vmax.f32 %v1745_v26, 0.0  ;;  %v1747_v29 = vpop.f32.mrb[79].mxu1 }
 0x32c   :  { %v2040_v55 = vpack.c.bf16 %v1980_v53, %v1979_v44  ;;  %1957 = vmatmul.mubr.bf16.gmra.mrb[184].mxu1 %v6500_v2 }
 0x32d   :  { %1964 = vmatprep.mubr.bf16.mxu1 %v5435_v49 }
 0x32e   :  { %3425 = vmatmul.mubr.bf16.gmra.mrb[4].mxu0 %v2040_v55 }
 0x32f   :  { %v1750_v19 = vpop.f32.mrb[80].mxu1 }
 0x330   :  { %v1752_v15 = vpop.f32.mrb[81].mxu1  ;;  %v1981_v26 = vmax.f32 %v1750_v19, 0.0 }
 0x331   :  { %v1753_v17 = vpop.f32.mrb[82].mxu1 }
 0x332   :  { %v1982_v44 = vmax.f32 %v1753_v17, 0.0  ;;  %v1755_v53 = vpop.f32.mrb[83].mxu1 }
 0x334   :  { %v2041_v29 = vpack.c.bf16 %v1982_v44, %v1981_v26  ;;  %1965 = vmatmul.mubr.bf16.gmra.mrb[188].mxu1 %v6510_v43 }
 0x336   :  { %3428 = vmatprep.mubr.bf16.mxu0 %v2041_v29 }
 0x337   :  { %v1758_v55 = vpop.f32.mrb[84].mxu1 }
 0x338   :  { %v1760_v15 = vpop.f32.mrb[85].mxu1  ;;  %v1983_v2 = vmax.f32 %v1758_v55, 0.0 }
 0x339   :  { %v1761_v49 = vpop.f32.mrb[86].mxu1 }
 0x33a   :  { %v1984_v37 = vmax.f32 %v1761_v49, 0.0  ;;  %v1763_v14 = vpop.f32.mrb[87].mxu1 }
 0x33c   :  { %v2042_v35 = vpack.c.bf16 %v1984_v37, %v1983_v2 }
 0x33e   :  { %3429 = vmatmul.mubr.bf16.gmra.mrb[8].mxu0 %v2042_v35 }
 0x33f   :  { %v1766_v10 = vpop.f32.mrb[88].mxu1 }
 0x340   :  { %v1768_v28 = vpop.f32.mrb[89].mxu1  ;;  %v1985_v25 = vmax.f32 %v1766_v10, 0.0 }
 0x341   :  { %v1769_v34 = vpop.f32.mrb[90].mxu1 }
 0x342   :  { %v1986_v33 = vmax.f32 %v1769_v34, 0.0  ;;  %v1771_v19 = vpop.f32.mrb[91].mxu1 }
 0x344   :  { %v2043_v17 = vpack.c.bf16 %v1986_v33, %v1985_v25 }
 0x346   :  { %3432 = vmatprep.mubr.bf16.mxu0 %v2043_v17 }
 0x347   :  { %v1774_v26 = vpop.f32.mrb[92].mxu1 }
 0x348   :  { %v1776_v44 = vpop.f32.mrb[93].mxu1  ;;  %v1987_v29 = vmax.f32 %v1774_v26, 0.0 }
 0x349   :  { %v1777_v53 = vpop.f32.mrb[94].mxu1 }
 0x34a   :  { %v1988_v43 = vmax.f32 %v1777_v53, 0.0  ;;  %v1779_v15 = vpop.f32.mrb[95].mxu1 }
 0x34c   :  { %v2044_v59 = vpack.c.bf16 %v1988_v43, %v1987_v29 }
 0x34e   :  { %3433 = vmatmul.mubr.bf16.gmra.mrb[12].mxu0 %v2044_v59 }
 0x34f   :  { %v1782_v49 = vpop.f32.mrb[96].mxu1 }
 0x350   :  { %v1784_v14 = vpop.f32.mrb[97].mxu1  ;;  %v1989_v35 = vmax.f32 %v1782_v49, 0.0 }
 0x351   :  { %v1785_v37 = vpop.f32.mrb[98].mxu1 }
 0x352   :  { %v1990_v2 = vmax.f32 %v1785_v37, 0.0  ;;  %v1787_v28 = vpop.f32.mrb[99].mxu1 }
 0x354   :  { %v2045_v55 = vpack.c.bf16 %v1990_v2, %v1989_v35 }
 0x356   :  { %3436 = vmatprep.mubr.bf16.mxu0 %v2045_v55 }
 0x357   :  { %v1790_v10 = vpop.f32.mrb[100].mxu1 }
 0x358   :  { %v1792_v34 = vpop.f32.mrb[101].mxu1  ;;  %v1991_v25 = vmax.f32 %v1790_v10, 0.0 }
 0x359   :  { %v1793_v33 = vpop.f32.mrb[102].mxu1 }
 0x35a   :  { %v1992_v19 = vmax.f32 %v1793_v33, 0.0  ;;  %v1795_v17 = vpop.f32.mrb[103].mxu1 }
 0x35c   :  { %v2046_v44 = vpack.c.bf16 %v1992_v19, %v1991_v25 }
 0x35e   :  { %3437 = vmatmul.mubr.bf16.gmra.mrb[16].mxu0 %v2046_v44 }
 0x35f   :  { %v1798_v26 = vpop.f32.mrb[104].mxu1 }
 0x360   :  { %v1800_v53 = vpop.f32.mrb[105].mxu1  ;;  %v1993_v59 = vmax.f32 %v1798_v26, 0.0 }
 0x361   :  { %v1801_v43 = vpop.f32.mrb[106].mxu1 }
 0x362   :  { %v1994_v29 = vmax.f32 %v1801_v43, 0.0  ;;  %v1803_v15 = vpop.f32.mrb[107].mxu1 }
 0x364   :  { %v2047_v14 = vpack.c.bf16 %v1994_v29, %v1993_v59 }
 0x366   :  { %3440 = vmatprep.mubr.bf16.mxu0 %v2047_v14 }
 0x367   :  { %v1806_v49 = vpop.f32.mrb[108].mxu1 }
 0x368   :  { %v1808_v37 = vpop.f32.mrb[109].mxu1  ;;  %v1995_v2 = vmax.f32 %v1806_v49, 0.0 }
 0x369   :  { %v1809_v35 = vpop.f32.mrb[110].mxu1 }
 0x36a   :  { %v1996_v28 = vmax.f32 %v1809_v35, 0.0  ;;  %v1811_v55 = vpop.f32.mrb[111].mxu1 }
 0x36c   :  { %v2048_v34 = vpack.c.bf16 %v1996_v28, %v1995_v2 }
 0x36e   :  { %3441 = vmatmul.mubr.bf16.gmra.mrb[20].mxu0 %v2048_v34 }
 0x36f   :  { %v1814_v10 = vpop.f32.mrb[112].mxu1 }
 0x370   :  { %v1816_v33 = vpop.f32.mrb[113].mxu1  ;;  %v1997_v19 = vmax.f32 %v1814_v10, 0.0 }
 0x371   :  { %v1817_v25 = vpop.f32.mrb[114].mxu1 }
 0x372   :  { %v1998_v17 = vmax.f32 %v1817_v25, 0.0  ;;  %v1819_v44 = vpop.f32.mrb[115].mxu1 }
 0x374   :  { %v2049_v53 = vpack.c.bf16 %v1998_v17, %v1997_v19 }
 0x376   :  { %3444 = vmatprep.mubr.bf16.mxu0 %v2049_v53 }
 0x377   :  { %v1822_v26 = vpop.f32.mrb[116].mxu1 }
 0x378   :  { %v1824_v43 = vpop.f32.mrb[117].mxu1  ;;  %v1999_v29 = vmax.f32 %v1822_v26, 0.0 }
 0x379   :  { %v1825_v59 = vpop.f32.mrb[118].mxu1 }
 0x37a   :  { %v2000_v15 = vmax.f32 %v1825_v59, 0.0  ;;  %v1827_v14 = vpop.f32.mrb[119].mxu1 }
 0x37c   :  { %v2050_v37 = vpack.c.bf16 %v2000_v15, %v1999_v29 }
 0x37e   :  { %3445 = vmatmul.mubr.bf16.gmra.mrb[24].mxu0 %v2050_v37 }
 0x37f   :  { %v1830_v49 = vpop.f32.mrb[120].mxu1 }
 0x380   :  { %v1832_v35 = vpop.f32.mrb[121].mxu1  ;;  %v2001_v28 = vmax.f32 %v1830_v49, 0.0 }
 0x381   :  { %v1833_v2 = vpop.f32.mrb[122].mxu1 }
 0x382   :  { %v2002_v55 = vmax.f32 %v1833_v2, 0.0  ;;  %v1835_v34 = vpop.f32.mrb[123].mxu1 }
 0x384   :  { %v2051_v33 = vpack.c.bf16 %v2002_v55, %v2001_v28 }
 0x386   :  { %3448 = vmatprep.mubr.bf16.mxu0 %v2051_v33 }
 0x387   :  { %v1838_v10 = vpop.f32.mrb[124].mxu1 }
 0x388   :  { %v1840_v25 = vpop.f32.mrb[125].mxu1  ;;  %v2003_v17 = vmax.f32 %v1838_v10, 0.0 }
 0x389   :  { %v1841_v19 = vpop.f32.mrb[126].mxu1 }
 0x38a   :  { %v2004_v44 = vmax.f32 %v1841_v19, 0.0  ;;  %v1843_v53 = vpop.f32.mrb[127].mxu1 }
 0x38c   :  { %v2052_v43 = vpack.c.bf16 %v2004_v44, %v2003_v17 }
 0x38e   :  { %3449 = vmatmul.mubr.bf16.gmra.mrb[28].mxu0 %v2052_v43 }
 0x38f   :  { %v1846_v26 = vpop.f32.mrb[128].mxu1 }
 0x390   :  { %v1848_v59 = vpop.f32.mrb[129].mxu1  ;;  %v2005_v15 = vmax.f32 %v1846_v26, 0.0 }
 0x391   :  { %v1849_v29 = vpop.f32.mrb[130].mxu1 }
 0x392   :  { %v2006_v14 = vmax.f32 %v1849_v29, 0.0  ;;  %v1851_v37 = vpop.f32.mrb[131].mxu1 }
 0x394   :  { %v2053_v35 = vpack.c.bf16 %v2006_v14, %v2005_v15 }
 0x396   :  { %3452 = vmatprep.mubr.bf16.mxu0 %v2053_v35 }
 0x397   :  { %v1854_v49 = vpop.f32.mrb[132].mxu1 }
 0x398   :  { %v1856_v2 = vpop.f32.mrb[133].mxu1  ;;  %v2007_v55 = vmax.f32 %v1854_v49, 0.0 }
 0x399   :  { %v1857_v28 = vpop.f32.mrb[134].mxu1 }
 0x39a   :  { %v2008_v34 = vmax.f32 %v1857_v28, 0.0  ;;  %v1859_v33 = vpop.f32.mrb[135].mxu1 }
 0x39c   :  { %v2054_v25 = vpack.c.bf16 %v2008_v34, %v2007_v55 }
 0x39e   :  { %3453 = vmatmul.mubr.bf16.gmra.mrb[32].mxu0 %v2054_v25 }
 0x39f   :  { %v1862_v10 = vpop.f32.mrb[136].mxu1 }
 0x3a0   :  { %v1864_v19 = vpop.f32.mrb[137].mxu1  ;;  %v2009_v44 = vmax.f32 %v1862_v10, 0.0 }
 0x3a1   :  { %v1865_v17 = vpop.f32.mrb[138].mxu1 }
 0x3a2   :  { %v2010_v53 = vmax.f32 %v1865_v17, 0.0  ;;  %v1867_v43 = vpop.f32.mrb[139].mxu1 }
 0x3a4   :  { %v2055_v59 = vpack.c.bf16 %v2010_v53, %v2009_v44 }
 0x3a6   :  { %3456 = vmatprep.mubr.bf16.mxu0 %v2055_v59 }
 0x3a7   :  { %v1870_v26 = vpop.f32.mrb[140].mxu1 }
 0x3a8   :  { %v1872_v29 = vpop.f32.mrb[141].mxu1  ;;  %v2011_v14 = vmax.f32 %v1870_v26, 0.0 }
 0x3a9   :  { %v1873_v15 = vpop.f32.mrb[142].mxu1 }
 0x3aa   :  { %v2012_v37 = vmax.f32 %v1873_v15, 0.0  ;;  %v1875_v35 = vpop.f32.mrb[143].mxu1 }
 0x3ac   :  { %v2056_v2 = vpack.c.bf16 %v2012_v37, %v2011_v14 }
 0x3ae   :  { %3457 = vmatmul.mubr.bf16.gmra.mrb[36].mxu0 %v2056_v2 }
 0x3af   :  { %v1878_v49 = vpop.f32.mrb[144].mxu1 }
 0x3b0   :  { %v1880_v28 = vpop.f32.mrb[145].mxu1  ;;  %v2013_v34 = vmax.f32 %v1878_v49, 0.0 }
 0x3b1   :  { %v1881_v55 = vpop.f32.mrb[146].mxu1 }
 0x3b2   :  { %v2014_v33 = vmax.f32 %v1881_v55, 0.0  ;;  %v1883_v25 = vpop.f32.mrb[147].mxu1 }
 0x3b4   :  { %v2057_v19 = vpack.c.bf16 %v2014_v33, %v2013_v34 }
 0x3b6   :  { %3460 = vmatprep.mubr.bf16.mxu0 %v2057_v19 }
 0x3b7   :  { %v1886_v10 = vpop.f32.mrb[148].mxu1 }
 0x3b8   :  { %v1888_v17 = vpop.f32.mrb[149].mxu1  ;;  %v2015_v53 = vmax.f32 %v1886_v10, 0.0 }
 0x3b9   :  { %v1889_v44 = vpop.f32.mrb[150].mxu1 }
 0x3ba   :  { %v2016_v43 = vmax.f32 %v1889_v44, 0.0  ;;  %v1891_v59 = vpop.f32.mrb[151].mxu1 }
 0x3bc   :  { %v2058_v29 = vpack.c.bf16 %v2016_v43, %v2015_v53 }
 0x3be   :  { %3461 = vmatmul.mubr.bf16.gmra.mrb[40].mxu0 %v2058_v29 }
 0x3bf   :  { %v1894_v26 = vpop.f32.mrb[152].mxu1 }
 0x3c0   :  { %v1896_v15 = vpop.f32.mrb[153].mxu1  ;;  %v2017_v37 = vmax.f32 %v1894_v26, 0.0 }
 0x3c1   :  { %v1897_v14 = vpop.f32.mrb[154].mxu1 }
 0x3c2   :  { %v2018_v35 = vmax.f32 %v1897_v14, 0.0  ;;  %v1899_v2 = vpop.f32.mrb[155].mxu1 }
 0x3c4   :  { %v2059_v28 = vpack.c.bf16 %v2018_v35, %v2017_v37 }
 0x3c6   :  { %3464 = vmatprep.mubr.bf16.mxu0 %v2059_v28 }
 0x3c7   :  { %v1902_v49 = vpop.f32.mrb[156].mxu1 }
 0x3c8   :  { %v1904_v55 = vpop.f32.mrb[157].mxu1  ;;  %v2019_v33 = vmax.f32 %v1902_v49, 0.0 }
 0x3c9   :  { %v1905_v34 = vpop.f32.mrb[158].mxu1 }
 0x3ca   :  { %v2020_v25 = vmax.f32 %v1905_v34, 0.0  ;;  %v1907_v19 = vpop.f32.mrb[159].mxu1 }
 0x3cc   :  { %v2060_v17 = vpack.c.bf16 %v2020_v25, %v2019_v33 }
 0x3ce   :  { %3465 = vmatmul.mubr.bf16.gmra.mrb[44].mxu0 %v2060_v17 }
 0x3cf   :  { %v1910_v10 = vpop.f32.mrb[160].mxu1 }
 0x3d0   :  { %v1912_v44 = vpop.f32.mrb[161].mxu1  ;;  %v2021_v43 = vmax.f32 %v1910_v10, 0.0 }
 0x3d1   :  { %v1913_v53 = vpop.f32.mrb[162].mxu1 }
 0x3d2   :  { %v2022_v59 = vmax.f32 %v1913_v53, 0.0  ;;  %v1915_v29 = vpop.f32.mrb[163].mxu1 }
 0x3d4   :  { %v2061_v15 = vpack.c.bf16 %v2022_v59, %v2021_v43 }
 0x3d6   :  { %3468 = vmatprep.mubr.bf16.mxu0 %v2061_v15 }
 0x3d7   :  { %v1918_v26 = vpop.f32.mrb[164].mxu1 }
 0x3d8   :  { %v1920_v14 = vpop.f32.mrb[165].mxu1  ;;  %v2023_v35 = vmax.f32 %v1918_v26, 0.0 }
 0x3d9   :  { %v1921_v37 = vpop.f32.mrb[166].mxu1 }
 0x3da   :  { %v2024_v2 = vmax.f32 %v1921_v37, 0.0  ;;  %v1923_v28 = vpop.f32.mrb[167].mxu1 }
 0x3dc   :  { %v2062_v55 = vpack.c.bf16 %v2024_v2, %v2023_v35 }
 0x3de   :  { %3469 = vmatmul.mubr.bf16.gmra.mrb[48].mxu0 %v2062_v55 }
 0x3df   :  { %v1926_v49 = vpop.f32.mrb[168].mxu1 }
 0x3e0   :  { %v1928_v34 = vpop.f32.mrb[169].mxu1  ;;  %v2025_v25 = vmax.f32 %v1926_v49, 0.0 }
 0x3e1   :  { %v1929_v33 = vpop.f32.mrb[170].mxu1 }
 0x3e2   :  { %v2026_v19 = vmax.f32 %v1929_v33, 0.0  ;;  %v1931_v17 = vpop.f32.mrb[171].mxu1 }
 0x3e4   :  { %v2063_v44 = vpack.c.bf16 %v2026_v19, %v2025_v25  ;;  %v7244_v19 = vld [vmem:[#allocation30_spill] sm:$0xff] }
 0x3e6   :  { %3472 = vmatprep.mubr.bf16.mxu0 %v2063_v44 }
 0x3e7   :  { %v1934_v10 = vpop.f32.mrb[172].mxu1 }
 0x3e8   :  { %v1936_v53 = vpop.f32.mrb[173].mxu1  ;;  %v2027_v59 = vmax.f32 %v1934_v10, 0.0  ;;  %v7245_v10 = vld [vmem:[#allocation32_spill] sm:$0xff] }
 0x3e9   :  { %v1937_v43 = vpop.f32.mrb[174].mxu1 }
 0x3ea   :  { %v2028_v29 = vmax.f32 %v1937_v43, 0.0  ;;  %v1939_v15 = vpop.f32.mrb[175].mxu1 }
 0x3eb   :  { %v7246_v15 = vld [vmem:[#allocation31_spill] sm:$0xff] }
 0x3ec   :  { %v2064_v14 = vpack.c.bf16 %v2028_v29, %v2027_v59 }
 0x3ee   :  { %3473 = vmatmul.mubr.bf16.gmra.mrb[52].mxu0 %v2064_v14 }
 0x3ef   :  { %v1942_v26 = vpop.f32.mrb[176].mxu1 }
 0x3f0   :  { %v1944_v37 = vpop.f32.mrb[177].mxu1  ;;  %v2029_v28 = vmax.f32 %v1942_v26, 0.0 }
 0x3f1   :  { %v1945_v35 = vpop.f32.mrb[178].mxu1  ;;  %v3422_v2 = vpop.f32.mrb[0].mxu0 }
 0x3f2   :  { %v2030_v55 = vmax.f32 %v1945_v35, 0.0  ;;  %v1947_v34 = vpop.f32.mrb[179].mxu1  ;;  %v2167_v49 = vpop.f32.mrb[1].mxu0  ;;  %v2424_v25 = vmul.f32 %v5319_v51, %v3422_v2 }
 0x3f3   :  { %v3423_v33 = vpop.f32.mrb[2].mxu0  ;;  %v2422_v43 = vmul.f32 %v7245_v10, %v2167_v49 }
 0x3f4   :  { %v2065_v17 = vpack.c.bf16 %v2030_v55, %v2029_v28  ;;  %v2425_v44 = vmul.f32 %v7244_v19, %v3423_v33  ;;  %v2170_v53 = vpop.f32.mrb[3].mxu0 }
 0x3f5   :  { %v2423_v59 = vmul.f32 %v7246_v15, %v2170_v53  ;;  %v7248_v15 = vld [vmem:[#allocation35_spill] sm:$0xff] }
 0x3f6   :  { %v2487_v29 = vpack.c.bf16 %v2425_v44, %v2424_v25  ;;  %3476 = vmatprep.mubr.bf16.mxu0 %v2065_v17 }
 0x3f7   :  { %v2486_v14 = vpack.c.bf16 %v2423_v59, %v2422_v43  ;;  %v1950_v37 = vpop.f32.mrb[180].mxu1 }
 0x3f8   :  { %v1952_v48 = vpop.f32.mrb[181].mxu1  ;;  %v2031_v35 = vmax.f32 %v1950_v37, 0.0 }
 0x3f9   :  { %v1953_v26 = vpop.f32.mrb[182].mxu1  ;;  %2519 = vmatpush1.bf16.msra.mxu0 %v2486_v14 }
 0x3fa   :  { %v2032_v34 = vmax.f32 %v1953_v26, 0.0  ;;  %v1955_v40 = vpop.f32.mrb[183].mxu1  ;;  %2520 = vmatprep.subr.bf16.mxu0 %v7120_v23 }
 0x3fb   :  { %v7247_v40 = vld [vmem:[#allocation34_spill] sm:$0xff] }
 0x3fc   :  { %v2066_v51 = vpack.c.bf16 %v2032_v34, %v2031_v35 }
 0x3fd   :  { %2521 = vmatpush1.bf16.msra.mxu0 %v2487_v29  ;;  %v7249_v29 = vld [vmem:[#allocation33_spill] sm:$0xff] }
 0x3fe   :  { %3477 = vmatmul.mubr.bf16.gmra.mrb[56].mxu0 %v2066_v51  ;;  %2522 = vmatprep.subr.bf16.mxu0 %v7120_v23 }
 0x3ff   :  { %v1958_v2 = vpop.f32.mrb[184].mxu1 }
 0x400   :  { %v1960_v28 = vpop.f32.mrb[185].mxu1  ;;  %v2033_v33 = vmax.f32 %v1958_v2, 0.0 }
 0x401   :  { %v1961_v55 = vpop.f32.mrb[186].mxu1  ;;  %v3426_v49 = vpop.f32.mrb[4].mxu0 }
 0x402   :  { %v2034_v17 = vmax.f32 %v1961_v55, 0.0  ;;  %v1963_v25 = vpop.f32.mrb[187].mxu1  ;;  %v2183_v48 = vpop.f32.mrb[5].mxu0  ;;  %v2428_v53 = vmul.f32 %v5355_v47, %v3426_v49  ;;  %v7250_v49 = vld [vmem:[#allocation24_spill] sm:$0xff] }
 0x403   :  { %v3427_v19 = vpop.f32.mrb[6].mxu0  ;;  %v2426_v59 = vmul.f32 %v7248_v15, %v2183_v48 }
 0x404   :  { %v2067_v44 = vpack.c.bf16 %v2034_v17, %v2033_v33  ;;  %v2429_v10 = vmul.f32 %v7247_v40, %v3427_v19  ;;  %v2186_v43 = vpop.f32.mrb[7].mxu0  ;;  %v7251_v40 = vld [vmem:[#allocation36_spill] sm:$0xff] }
 0x405   :  { %v2427_v14 = vmul.f32 %v7249_v29, %v2186_v43 }
 0x406   :  { %v2489_v37 = vpack.c.bf16 %v2429_v10, %v2428_v53  ;;  %3480 = vmatprep.mubr.bf16.mxu0 %v2067_v44 }
 0x407   :  { %v2488_v26 = vpack.c.bf16 %v2427_v14, %v2426_v59  ;;  %v1966_v35 = vpop.f32.mrb[188].mxu1 }
 0x408   :  { %v1968_v34 = vpop.f32.mrb[189].mxu1  ;;  %v2035_v2 = vmax.f32 %v1966_v35, 0.0 }
 0x409   :  { %v1969_v51 = vpop.f32.mrb[190].mxu1  ;;  %2523 = vmatpush1.bf16.msra.mxu0 %v2488_v26  ;;  %v7252_v26 = vld [vmem:[#allocation37_spill] sm:$0xff] }
 0x40a   :  { %v2036_v28 = vmax.f32 %v1969_v51, 0.0  ;;  %v1971_v55 = vpop.f32.mrb[191].mxu1  ;;  %2524 = vmatprep.subr.bf16.mxu0 %v7120_v23 }
 0x40c   :  { %v2068_v47 = vpack.c.bf16 %v2036_v28, %v2035_v2 }
 0x40d   :  { %2525 = vmatpush1.bf16.msra.mxu0 %v2489_v37 }
 0x40e   :  { %3481 = vmatmul.mubr.bf16.gmra.mrb[60].mxu0 %v2068_v47  ;;  %2526 = vmatprep.subr.bf16.mxu0 %v7120_v23  ;;  %v7253_v47 = vld [vmem:[#allocation41_spill] sm:$0xff] }
 0x40f   :  { %2550 = vmatprep.mubr.bf16.mxu0 %v7250_v49 }
 0x411   :  { %v3430_v33 = vpop.f32.mrb[8].mxu0 }
 0x412   :  { %v2199_v17 = vpop.f32.mrb[9].mxu0  ;;  %v2432_v48 = vmul.f32 %v5377_v61, %v3430_v33  ;;  %v7254_v33 = vld [vmem:[#allocation40_spill] sm:$0xff] }
 0x413   :  { %v3431_v25 = vpop.f32.mrb[10].mxu0  ;;  %v2430_v53 = vmul.f32 %v5380_v54, %v2199_v17 }
 0x414   :  { %v2433_v19 = vmul.f32 %v5375_v1, %v3431_v25  ;;  %v2202_v44 = vpop.f32.mrb[11].mxu0 }
 0x415   :  { %v2431_v10 = vmul.f32 %v7251_v40, %v2202_v44  ;;  %v7255_v40 = vld [vmem:[#allocation46_spill] sm:$0xff] }
 0x416   :  { %v2491_v43 = vpack.c.bf16 %v2433_v19, %v2432_v48 }
 0x417   :  { %v2490_v15 = vpack.c.bf16 %v2431_v10, %v2430_v53  ;;  %v7256_v10 = vld [vmem:[#allocation45_spill] sm:$0xff] }
 0x419   :  { %2527 = vmatpush1.bf16.msra.mxu0 %v2490_v15 }
 0x41a   :  { %2528 = vmatprep.subr.bf16.mxu0 %v7120_v23 }
 0x41d   :  { %2529 = vmatpush1.bf16.msra.mxu0 %v2491_v43 }
 0x41e   :  { %2530 = vmatprep.subr.bf16.mxu0 %v7120_v23 }
 0x421   :  { %v3434_v59 = vpop.f32.mrb[12].mxu0 }
 0x422   :  { %v2215_v29 = vpop.f32.mrb[13].mxu0  ;;  %v2436_v61 = vmul.f32 %v5409_v50, %v3434_v59  ;;  %v7257_v59 = vld [vmem:[#allocation47_spill] sm:$0xff] }
 0x423   :  { %v3435_v14 = vpop.f32.mrb[14].mxu0  ;;  %v2434_v54 = vmul.f32 %v5414_v9, %v2215_v29  ;;  %v7258_v29 = vld [vmem:[#allocation44_spill] sm:$0xff] }
 0x424   :  { %v2437_v1 = vmul.f32 %v5397_v0, %v3435_v14  ;;  %v2218_v37 = vpop.f32.mrb[15].mxu0 }
 0x425   :  { %v2435_v35 = vmul.f32 %v7252_v26, %v2218_v37 }
 0x426   :  { %v2493_v34 = vpack.c.bf16 %v2437_v1, %v2436_v61 }
 0x427   :  { %v2492_v51 = vpack.c.bf16 %v2435_v35, %v2434_v54 }
 0x429   :  { %2531 = vmatpush1.bf16.msra.mxu0 %v2492_v51 }
 0x42a   :  { %2532 = vmatprep.subr.bf16.mxu0 %v7120_v23 }
 0x42d   :  { %2533 = vmatpush1.bf16.msra.mxu0 %v2493_v34 }
 0x42e   :  { %2534 = vmatprep.subr.bf16.mxu0 %v7120_v23 }
 0x431   :  { %v3438_v2 = vpop.f32.mrb[16].mxu0 }
 0x432   :  { %v2231_v28 = vpop.f32.mrb[17].mxu0  ;;  %v2440_v50 = vmul.f32 %v5437_v52, %v3438_v2  ;;  %v7259_v2 = vld [vmem:[#allocation49_spill] sm:$0xff] }
 0x433   :  { %v3439_v55 = vpop.f32.mrb[18].mxu0  ;;  %v2438_v9 = vmul.f32 %v5440_v63, %v2231_v28 }
 0x434   :  { %v2441_v0 = vmul.f32 %v7253_v47, %v3439_v55  ;;  %v2234_v49 = vpop.f32.mrb[19].mxu0  ;;  %v7260_v55 = vld [vmem:[#allocation48_spill] sm:$0xff] }
 0x435   :  { %v2439_v17 = vmul.f32 %v7254_v33, %v2234_v49 }
 0x436   :  { %v2495_v25 = vpack.c.bf16 %v2441_v0, %v2440_v50 }
 0x437   :  { %v2494_v48 = vpack.c.bf16 %v2439_v17, %v2438_v9  ;;  %v7261_v17 = vld [vmem:[#allocation51_spill] sm:$0xff] }
 0x439   :  { %2535 = vmatpush1.bf16.msra.mxu0 %v2494_v48 }
 0x43a   :  { %2536 = vmatprep.subr.bf16.mxu0 %v7120_v23 }
 0x43d   :  { %2537 = vmatpush1.bf16.msra.mxu0 %v2495_v25 }
 0x43e   :  { %2538 = vmatprep.subr.bf16.mxu0 %v7120_v23 }
 0x441   :  { %v3442_v19 = vpop.f32.mrb[20].mxu0 }
 0x442   :  { %v2247_v44 = vpop.f32.mrb[21].mxu0  ;;  %v2444_v52 = vmul.f32 %v7255_v40, %v3442_v19  ;;  %v7262_v19 = vld [vmem:[#allocation50_spill] sm:$0xff] }
 0x443   :  { %v3443_v53 = vpop.f32.mrb[22].mxu0  ;;  %v2442_v63 = vmul.f32 %v7257_v59, %v2247_v44 }
 0x444   :  { %v2445_v43 = vmul.f32 %v7256_v10, %v3443_v53  ;;  %v2250_v15 = vpop.f32.mrb[23].mxu0 }
 0x445   :  { %v2443_v14 = vmul.f32 %v7258_v29, %v2250_v15  ;;  %v7265_v29 = vld [vmem:[#allocation53_spill] sm:$0xff] }
 0x446   :  { %v2497_v61 = vpack.c.bf16 %v2445_v43, %v2444_v52  ;;  %v7263_v43 = vld [vmem:[#allocation52_spill] sm:$0xff] }
 0x447   :  { %v2496_v1 = vpack.c.bf16 %v2443_v14, %v2442_v63 }
 0x449   :  { %2539 = vmatpush1.bf16.msra.mxu0 %v2496_v1 }
 0x44a   :  { %2540 = vmatprep.subr.bf16.mxu0 %v7120_v23 }
 0x44d   :  { %2541 = vmatpush1.bf16.msra.mxu0 %v2497_v61  ;;  %v7266_v61 = vld [vmem:[#allocation55_spill] sm:$0xff] }
 0x44e   :  { %2542 = vmatprep.subr.bf16.mxu0 %v7120_v23 }
 0x451   :  { %v3446_v37 = vpop.f32.mrb[24].mxu0 }
 0x452   :  { %v2263_v54 = vpop.f32.mrb[25].mxu0  ;;  %v2448_v35 = vmul.f32 %v5477_v32, %v3446_v37 }
 0x453   :  { %v3447_v26 = vpop.f32.mrb[26].mxu0  ;;  %v2446_v28 = vmul.f32 %v7259_v2, %v2263_v54 }
 0x454   :  { %v2449_v34 = vmul.f32 %v5475_v39, %v3447_v26  ;;  %v2266_v51 = vpop.f32.mrb[27].mxu0  ;;  %v7267_v26 = vld [vmem:[#allocation60_spill] sm:$0xff] }
 0x455   :  { %v2447_v50 = vmul.f32 %v7260_v55, %v2266_v51 }
 0x456   :  { %v2499_v47 = vpack.c.bf16 %v2449_v34, %v2448_v35  ;;  %v7270_v34 = vld [vmem:[#allocation67_spill] sm:$0xff] }
 0x457   :  { %v2498_v0 = vpack.c.bf16 %v2447_v50, %v2446_v28  ;;  %v7271_v28 = vld [vmem:[#allocation56_spill] sm:$0xff]  ;;  %v7272_v50 = vld [vmem:[#allocation58_spill] sm:$0xff] }
 0x459   :  { %2543 = vmatpush1.bf16.msra.mxu0 %v2498_v0 }
 0x45a   :  { %2544 = vmatprep.subr.bf16.mxu0 %v7120_v23 }
 0x45d   :  { %2545 = vmatpush1.bf16.msra.mxu0 %v2499_v47 }
 0x45e   :  { %2546 = vmatprep.subr.bf16.mxu0 %v7120_v23 }
 0x461   :  { %v3450_v49 = vpop.f32.mrb[28].mxu0 }
 0x462   :  { %v2279_v9 = vpop.f32.mrb[29].mxu0  ;;  %v2452_v32 = vmul.f32 %v7261_v17, %v3450_v49  ;;  %v7273_v49 = vld [vmem:[#allocation57_spill] sm:$0xff] }
 0x463   :  { %v3451_v33 = vpop.f32.mrb[30].mxu0  ;;  %v2450_v48 = vmul.f32 %v5495_v3, %v2279_v9  ;;  %v7264_v3 = vld [vmem:[#allocation54_spill] sm:$0xff] }
 0x464   :  { %v2453_v39 = vmul.f32 %v5491_v12, %v3451_v33  ;;  %v2282_v25 = vpop.f32.mrb[31].mxu0  ;;  %v7274_v33 = vld [vmem:[#allocation59_spill] sm:$0xff] }
 0x465   :  { %v2451_v44 = vmul.f32 %v7262_v19, %v2282_v25  ;;  %v7275_v25 = vld [vmem:[#allocation68_spill] sm:$0xff] }
 0x466   :  { %v2501_v53 = vpack.c.bf16 %v2453_v39, %v2452_v32  ;;  %v7277_v19 = vld [vmem:[#allocation72_spill] sm:$0xff] }
 0x467   :  { %v2500_v40 = vpack.c.bf16 %v2451_v44, %v2450_v48  ;;  %v7276_v48 = vld [vmem:[#allocation69_spill] sm:$0xff] }
 0x469   :  { %2547 = vmatpush1.bf16.msra.mxu0 %v2500_v40 }
 0x46a   :  { %2548 = vmatprep.subr.bf16.mxu0 %v7120_v23 }
 0x46d   :  { %2549 = vmatpush1.bf16.msra.mxu0 %v2501_v53  ;;  %v7278_v53 = vld [vmem:[#allocation73_spill] sm:$0xff] }
 0x46e   :  { %2807 = vmatprep.subr.bf16.mxu0 %v7120_v23 }
 0x470   :  { %2551 = vmatmul.mubr.bf16.vlgmr.msra.gmra.mrb[64].mxu0 %v4166_v27  ;;  %v7268_v27 = vld [vmem:[#allocation61_spill] sm:$0xff] }
 0x471   :  { %v3454_v52 = vpop.f32.mrb[32].mxu0  ;;  %2558 = vmatprep.mubr.bf16.mxu0 %v5522_v36  ;;  %v7269_v36 = vld [vmem:[#allocation66_spill] sm:$0xff] }
 0x472   :  { %v2295_v10 = vpop.f32.mrb[33].mxu0  ;;  %v2456_v15 = vmul.f32 %v7263_v43, %v3454_v52  ;;  %v7280_v43 = vld [vmem:[#allocation64_spill] sm:$0xff] }
 0x473   :  { %v3455_v12 = vpop.f32.mrb[34].mxu0  ;;  %v2454_v14 = vmul.f32 %v7265_v29, %v2295_v10  ;;  %v7279_v10 = vld [vmem:[#allocation62_spill] sm:$0xff]  ;;  %v7282_v29 = vld [vmem:[#allocation65_spill] sm:$0xff] }
 0x474   :  { %v2457_v59 = vmul.f32 %v7264_v3, %v3455_v12  ;;  %v2298_v63 = vpop.f32.mrb[35].mxu0 }
 0x475   :  { %v2455_v1 = vmul.f32 %v7266_v61, %v2298_v63 }
 0x476   :  { %v2503_v37 = vpack.c.bf16 %v2457_v59, %v2456_v15  ;;  %v7281_v59 = vld [vmem:[#allocation63_spill] sm:$0xff] }
 0x477   :  { %v2502_v54 = vpack.c.bf16 %v2455_v1, %v2454_v14 }
 0x478   :  { %2559 = vmatmul.mubr.bf16.gmra.mrb[68].mxu0 %v7267_v26  ;;  %v7285_v26 = vld [vmem:[#allocation78_spill] sm:$0xff] }
 0x479   :  { %2808 = vmatpush1.bf16.msra.mxu0 %v2502_v54  ;;  %2566 = vmatprep.mubr.bf16.mxu0 %v7268_v27  ;;  %v7284_v54 = vld [vmem:[#allocation77_spill] sm:$0xff] }
 0x47a   :  { %2809 = vmatprep.subr.bf16.mxu0 %v7120_v23 }
 0x47d   :  { %2810 = vmatpush1.bf16.msra.mxu0 %v2503_v37  ;;  %v7283_v37 = vld [vmem:[#allocation76_spill] sm:$0xff] }
 0x47e   :  { %2811 = vmatprep.subr.bf16.mxu0 %v7120_v23 }
 0x480   :  { %2567 = vmatmul.mubr.bf16.gmra.mrb[72].mxu0 %v7269_v36  ;;  %v7286_v36 = vld [vmem:[#allocation79_spill] sm:$0xff] }
 0x481   :  { %v3458_v35 = vpop.f32.mrb[36].mxu0  ;;  %2574 = vmatprep.mubr.bf16.mxu0 %v7270_v34 }
 0x482   :  { %v2311_v51 = vpop.f32.mrb[37].mxu0  ;;  %v2460_v55 = vmul.f32 %v7271_v28, %v3458_v35  ;;  %v7288_v28 = vld [vmem:[#allocation74_spill] sm:$0xff] }
 0x483   :  { %v3459_v2 = vpop.f32.mrb[38].mxu0  ;;  %v2458_v9 = vmul.f32 %v7273_v49, %v2311_v51  ;;  %v7287_v51 = vld [vmem:[#allocation75_spill] sm:$0xff]  ;;  %v7290_v49 = vld [vmem:[#allocation70_spill] sm:$0xff] }
 0x484   :  { %v2461_v47 = vmul.f32 %v7272_v50, %v3459_v2  ;;  %v2314_v0 = vpop.f32.mrb[39].mxu0 }
 0x485   :  { %v2459_v17 = vmul.f32 %v7274_v33, %v2314_v0 }
 0x486   :  { %v2505_v32 = vpack.c.bf16 %v2461_v47, %v2460_v55  ;;  %v7289_v47 = vld [vmem:[#allocation71_spill] sm:$0xff] }
 0x487   :  { %v2504_v39 = vpack.c.bf16 %v2459_v17, %v2458_v9 }
 0x488   :  { %2575 = vmatmul.mubr.bf16.gmra.mrb[76].mxu0 %v7275_v25 }
 0x489   :  { %2812 = vmatpush1.bf16.msra.mxu0 %v2504_v39  ;;  %2582 = vmatprep.mubr.bf16.mxu0 %v7276_v48  ;;  %v7292_v39 = vld [vmem:[#allocation85_spill] sm:$0xff] }
 0x48a   :  { %2813 = vmatprep.subr.bf16.mxu0 %v7120_v23 }
 0x48d   :  { %2814 = vmatpush1.bf16.msra.mxu0 %v2505_v32  ;;  %v7291_v32 = vld [vmem:[#allocation83_spill] sm:$0xff] }
 0x48e   :  { %2815 = vmatprep.subr.bf16.mxu0 %v7120_v23 }
 0x490   :  { %2583 = vmatmul.mubr.bf16.gmra.mrb[80].mxu0 %v7277_v19 }
 0x491   :  { %v3462_v44 = vpop.f32.mrb[40].mxu0  ;;  %2590 = vmatprep.mubr.bf16.mxu0 %v7278_v53 }
 0x492   :  { %v2327_v40 = vpop.f32.mrb[41].mxu0  ;;  %v2464_v12 = vmul.f32 %v7279_v10, %v3462_v44  ;;  %v7293_v44 = vld [vmem:[#allocation84_spill] sm:$0xff] }
 0x493   :  { %v3463_v52 = vpop.f32.mrb[42].mxu0  ;;  %v2462_v63 = vmul.f32 %v7281_v59, %v2327_v40  ;;  %v7294_v40 = vld [vmem:[#allocation82_spill] sm:$0xff] }
 0x494   :  { %v2465_v15 = vmul.f32 %v7280_v43, %v3463_v52  ;;  %v2330_v3 = vpop.f32.mrb[43].mxu0 }
 0x495   :  { %v2463_v14 = vmul.f32 %v7282_v29, %v2330_v3 }
 0x496   :  { %v2507_v61 = vpack.c.bf16 %v2465_v15, %v2464_v12  ;;  %v7295_v12 = vld [vmem:[#allocation81_spill] sm:$0xff]  ;;  %v7296_v15 = vld [vmem:[#allocation80_spill] sm:$0xff] }
 0x497   :  { %v2506_v1 = vpack.c.bf16 %v2463_v14, %v2462_v63  ;;  %v7297_v14 = vld [vmem:[#allocation89_spill] sm:$0xff] }
 0x498   :  { %2591 = vmatmul.mubr.bf16.gmra.mrb[84].mxu0 %v7283_v37 }
 0x499   :  { %2816 = vmatpush1.bf16.msra.mxu0 %v2506_v1  ;;  %2598 = vmatprep.mubr.bf16.mxu0 %v7284_v54  ;;  %v7298_v1 = vld [vmem:[#allocation88_spill] sm:$0xff]  ;;  %v7299_v54 = vld [vmem:[#allocation87_spill] sm:$0xff] }
 0x49a   :  { %2817 = vmatprep.subr.bf16.mxu0 %v7120_v23 }
 0x49d   :  { %2818 = vmatpush1.bf16.msra.mxu0 %v2507_v61 }
 0x49e   :  { %2819 = vmatprep.subr.bf16.mxu0 %v7120_v23 }
 0x4a0   :  { %2599 = vmatmul.mubr.bf16.gmra.mrb[88].mxu0 %v7285_v26 }
 0x4a1   :  { %v3466_v27 = vpop.f32.mrb[44].mxu0  ;;  %2606 = vmatprep.mubr.bf16.mxu0 %v7286_v36 }
 0x4a2   :  { %v2343_v35 = vpop.f32.mrb[45].mxu0  ;;  %v2468_v2 = vmul.f32 %v7287_v51, %v3466_v27  ;;  %v7301_v51 = vld [vmem:[#allocation93_spill] sm:$0xff] }
 0x4a3   :  { %v3467_v34 = vpop.f32.mrb[46].mxu0  ;;  %v2466_v0 = vmul.f32 %v7289_v47, %v2343_v35 }
 0x4a4   :  { %v2469_v55 = vmul.f32 %v7288_v28, %v3467_v34  ;;  %v2346_v50 = vpop.f32.mrb[47].mxu0  ;;  %v7302_v28 = vld [vmem:[#allocation92_spill] sm:$0xff] }
 0x4a5   :  { %v2467_v9 = vmul.f32 %v7290_v49, %v2346_v50  ;;  %v7303_v50 = vld [vmem:[#allocation91_spill] sm:$0xff] }
 0x4a6   :  { %v2509_v33 = vpack.c.bf16 %v2469_v55, %v2468_v2 }
 0x4a7   :  { %v2508_v17 = vpack.c.bf16 %v2467_v9, %v2466_v0 }
 0x4a8   :  { %2607 = vmatmul.mubr.bf16.gmra.mrb[92].mxu0 %v7291_v32 }
 0x4a9   :  { %2820 = vmatpush1.bf16.msra.mxu0 %v2508_v17  ;;  %2614 = vmatprep.mubr.bf16.mxu0 %v7292_v39  ;;  %v7307_v39 = vld [vmem:[#allocation97_spill] sm:$0xff] }
 0x4aa   :  { %2821 = vmatprep.subr.bf16.mxu0 %v7120_v23 }
 0x4ad   :  { %2822 = vmatpush1.bf16.msra.mxu0 %v2509_v33  ;;  %v7306_v33 = vld [vmem:[#allocation99_spill] sm:$0xff] }
 0x4ae   :  { %2823 = vmatprep.subr.bf16.mxu0 %v7120_v23 }
 0x4b0   :  { %2615 = vmatmul.mubr.bf16.gmra.mrb[96].mxu0 %v5722_v56 }
 0x4b1   :  { %v3470_v25 = vpop.f32.mrb[48].mxu0  ;;  %2622 = vmatprep.mubr.bf16.mxu0 %v5731_v13 }
 0x4b2   :  { %v2359_v48 = vpop.f32.mrb[49].mxu0  ;;  %v2472_v53 = vmul.f32 %v7293_v44, %v3470_v25  ;;  %v7309_v44 = vld [vmem:[#allocation95_spill] sm:$0xff] }
 0x4b3   :  { %v3471_v19 = vpop.f32.mrb[50].mxu0  ;;  %v2470_v43 = vmul.f32 %v7295_v12, %v2359_v48  ;;  %v7308_v48 = vld [vmem:[#allocation96_spill] sm:$0xff] }
 0x4b4   :  { %v2473_v52 = vmul.f32 %v7294_v40, %v3471_v19  ;;  %v2362_v10 = vpop.f32.mrb[51].mxu0  ;;  %v7311_v12 = vld [vmem:[#allocation100_spill] sm:$0xff] }
 0x4b5   :  { %v2471_v3 = vmul.f32 %v7296_v15, %v2362_v10  ;;  %v7313_v15 = vld [vmem:[#allocation102_spill] sm:$0xff] }
 0x4b6   :  { %v2511_v59 = vpack.c.bf16 %v2473_v52, %v2472_v53 }
 0x4b7   :  { %v2510_v63 = vpack.c.bf16 %v2471_v3, %v2470_v43  ;;  %v7312_v43 = vld [vmem:[#allocation101_spill] sm:$0xff]  ;;  %v7314_v3 = vld [vmem:[#allocation103_spill] sm:$0xff] }
 0x4b8   :  { %2623 = vmatmul.mubr.bf16.gmra.mrb[100].mxu0 %v5753_v20 }
 0x4b9   :  { %2824 = vmatpush1.bf16.msra.mxu0 %v2510_v63  ;;  %2630 = vmatprep.mubr.bf16.mxu0 %v5762_v22  ;;  %v7300_v22 = vld [vmem:[#allocation86_spill] sm:$0xff]  ;;  %v7316_v63 = vld [vmem:[#allocation105_spill] sm:$0xff] }
 0x4ba   :  { %2825 = vmatprep.subr.bf16.mxu0 %v7120_v23 }
 0x4bd   :  { %2826 = vmatpush1.bf16.msra.mxu0 %v2511_v59  ;;  %v7315_v59 = vld [vmem:[#allocation104_spill] sm:$0xff] }
 0x4be   :  { %2827 = vmatprep.subr.bf16.mxu0 %v7120_v23 }
 0x4c0   :  { %2631 = vmatmul.mubr.bf16.gmra.mrb[104].mxu0 %v5785_v7 }
 0x4c1   :  { %v3474_v13 = vpop.f32.mrb[52].mxu0  ;;  %2638 = vmatprep.mubr.bf16.mxu0 %v5794_v21 }
 0x4c2   :  { %v2375_v56 = vpop.f32.mrb[53].mxu0  ;;  %v2476_v61 = vmul.f32 %v7297_v14, %v3474_v13  ;;  %v7317_v13 = vld [vmem:[#allocation106_spill] sm:$0xff]  ;;  %v7320_v14 = vld [vmem:[#allocation109_spill] sm:$0xff] }
 0x4c3   :  { %v3475_v29 = vpop.f32.mrb[54].mxu0  ;;  %v2474_v26 = vmul.f32 %v7299_v54, %v2375_v56  ;;  %v7318_v56 = vld [vmem:[#allocation107_spill] sm:$0xff] }
 0x4c4   :  { %v2477_v37 = vmul.f32 %v7298_v1, %v3475_v29  ;;  %v2378_v20 = vpop.f32.mrb[55].mxu0  ;;  %v7319_v29 = vld [vmem:[#allocation108_spill] sm:$0xff]  ;;  %v7326_v54 = vld [vmem:[#allocation115_spill] sm:$0xff] }
 0x4c5   :  { %v2475_v27 = vmul.f32 %v7300_v22, %v2378_v20  ;;  %v7323_v1 = vld [vmem:[#allocation112_spill] sm:$0xff]  ;;  %v7325_v20 = vld [vmem:[#allocation114_spill] sm:$0xff]  ;;  %v7328_v22 = vld [vmem:[#allocation117_spill] sm:$0xff] }
 0x4c6   :  { %v2513_v36 = vpack.c.bf16 %v2477_v37, %v2476_v61  ;;  %v7321_v61 = vld [vmem:[#allocation110_spill] sm:$0xff]  ;;  %v7324_v37 = vld [vmem:[#allocation113_spill] sm:$0xff] }
 0x4c7   :  { %v2512_v35 = vpack.c.bf16 %v2475_v27, %v2474_v26  ;;  %v7327_v26 = vld [vmem:[#allocation116_spill] sm:$0xff]  ;;  %v7329_v27 = vld [vmem:[#allocation118_spill] sm:$0xff] }
 0x4c8   :  { %2639 = vmatmul.mubr.bf16.gmra.mrb[108].mxu0 %v5813_v62 }
 0x4c9   :  { %2828 = vmatpush1.bf16.msra.mxu0 %v2512_v35  ;;  %2646 = vmatprep.mubr.bf16.mxu0 %v5821_v41  ;;  %v7304_v41 = vld [vmem:[#allocation90_spill] sm:$0xff]  ;;  %v7331_v35 = vld [vmem:[#allocation120_spill] sm:$0xff] }
 0x4ca   :  { %2829 = vmatprep.subr.bf16.mxu0 %v7120_v23 }
 0x4cd   :  { %2830 = vmatpush1.bf16.msra.mxu0 %v2513_v36  ;;  %v7330_v36 = vld [vmem:[#allocation119_spill] sm:$0xff] }
 0x4ce   :  { %2831 = vmatprep.subr.bf16.mxu0 %v7120_v23 }
 0x4d0   :  { %2647 = vmatmul.mubr.bf16.gmra.mrb[112].mxu0 %v5831_v46  ;;  %v7305_v46 = vld [vmem:[#allocation98_spill] sm:$0xff] }
 0x4d1   :  { %v3478_v21 = vpop.f32.mrb[56].mxu0  ;;  %2654 = vmatprep.mubr.bf16.mxu0 %v5839_v42 }
 0x4d2   :  { %v2391_v7 = vpop.f32.mrb[57].mxu0  ;;  %v2480_v2 = vmul.f32 %v7301_v51, %v3478_v21  ;;  %v7332_v21 = vld [vmem:[#allocation121_spill] sm:$0xff]  ;;  %v7335_v51 = vld [vmem:[#allocation124_spill] sm:$0xff] }
 0x4d3   :  { %v3479_v34 = vpop.f32.mrb[58].mxu0  ;;  %v2478_v47 = vmul.f32 %v7303_v50, %v2391_v7  ;;  %v7333_v7 = vld [vmem:[#allocation122_spill] sm:$0xff]  ;;  %v7340_v50 = vld [vmem:[#allocation129_spill] sm:$0xff] }
 0x4d4   :  { %v2481_v55 = vmul.f32 %v7302_v28, %v3479_v34  ;;  %v2394_v62 = vpop.f32.mrb[59].mxu0  ;;  %v7334_v34 = vld [vmem:[#allocation123_spill] sm:$0xff]  ;;  %v7337_v28 = vld [vmem:[#allocation126_spill] sm:$0xff] }
 0x4d5   :  { %v2479_v0 = vmul.f32 %v7304_v41, %v2394_v62  ;;  %v7339_v62 = vld [vmem:[#allocation128_spill] sm:$0xff]  ;;  %v7342_v41 = vld [vmem:[#allocation3_spill] sm:$0xff] }
 0x4d6   :  { %v2515_v49 = vpack.c.bf16 %v2481_v55, %v2480_v2  ;;  %v7336_v2 = vld [vmem:[#allocation125_spill] sm:$0xff]  ;;  %v7338_v55 = vld [vmem:[#allocation127_spill] sm:$0xff] }
 0x4d7   :  { %v2514_v9 = vpack.c.bf16 %v2479_v0, %v2478_v47  ;;  %v7341_v47 = vld [vmem:[#allocation2_spill] sm:$0xff]  ;;  %v7352_v0 = vld [vmem:[#allocation131_spill] sm:$0xff] }
 0x4d8   :  { %2655 = vmatmul.mubr.bf16.gmra.mrb[116].mxu0 %v5849_v38 }
 0x4d9   :  { %2832 = vmatpush1.bf16.msra.mxu0 %v2514_v9  ;;  %2662 = vmatprep.mubr.bf16.mxu0 %v5857_v58  ;;  %v7310_v58 = vld [vmem:[#allocation94_spill] sm:$0xff]  ;;  %v7356_v9 = vld [vmem:[#allocation133_spill] sm:$0xff] }
 0x4da   :  { %2833 = vmatprep.subr.bf16.mxu0 %v7120_v23 }
 0x4dd   :  { %2834 = vmatpush1.bf16.msra.mxu0 %v2515_v49  ;;  %v7354_v49 = vld [vmem:[#allocation132_spill] sm:$0xff] }
 0x4de   :  { %2835 = vmatprep.subr.bf16.mxu0 %v7120_v23 }
 0x4e0   :  { %2663 = vmatmul.mubr.bf16.gmra.mrb[120].mxu0 %v7305_v46  ;;  %v7358_v46 = vld [vmem:[#allocation134_spill] sm:$0xff] }
 0x4e1   :  { %v3482_v42 = vpop.f32.mrb[60].mxu0  ;;  %2670 = vmatprep.mubr.bf16.mxu0 %v7306_v33  ;;  %v7361_v33 = vld [vmem:[#allocation16_spill] sm:$0xff] }
 0x4e2   :  { %v2407_v17 = vpop.f32.mrb[61].mxu0  ;;  %v2484_v25 = vmul.f32 %v7307_v39, %v3482_v42  ;;  %v7360_v42 = vld [vmem:[#allocation135_spill] sm:$0xff]  ;;  %v7364_v39 = vld [vmem:[#allocation137_spill] sm:$0xff] }
 0x4e3   :  { %v3483_v32 = vpop.f32.mrb[62].mxu0  ;;  %v2482_v53 = vmul.f32 %v7309_v44, %v2407_v17  ;;  %v7362_v17 = vld [vmem:[#allocation136_spill] sm:$0xff] }
 0x4e4   :  { %v2485_v19 = vmul.f32 %v7308_v48, %v3483_v32  ;;  %v2410_v38 = vpop.f32.mrb[63].mxu0  ;;  %v7363_v32 = vld [vmem:[#allocation17_spill] sm:$0xff]  ;;  %v7366_v48 = vld [vmem:[#allocation138_spill] sm:$0xff]  ;;  %v7369_v44 = vld [vmem:[#allocation20_spill] sm:$0xff] }
 0x4e5   :  { %v2483_v40 = vmul.f32 %v7310_v58, %v2410_v38  ;;  %v7368_v38 = vld [vmem:[#allocation139_spill] sm:$0xff]  ;;  %v7371_v58 = vld [vmem:[#allocation21_spill] sm:$0xff] }
 0x4e6   :  { %v2517_v52 = vpack.c.bf16 %v2485_v19, %v2484_v25  ;;  %v7365_v25 = vld [vmem:[#allocation18_spill] sm:$0xff]  ;;  %v7367_v19 = vld [vmem:[#allocation19_spill] sm:$0xff] }
 0x4e7   :  { %v2516_v10 = vpack.c.bf16 %v2483_v40, %v2482_v53  ;;  %v7370_v53 = vld [vmem:[#allocation140_spill] sm:$0xff]  ;;  %v7372_v40 = vld [vmem:[#allocation141_spill] sm:$0xff] }
 0x4e8   :  { %2671 = vmatmul.mubr.bf16.gmra.mrb[124].mxu0 %v7311_v12  ;;  %v7375_v12 = vld [vmem:[#allocation23_spill] sm:$0xff] }
 0x4e9   :  { %2836 = vmatpush1.bf16.msra.mxu0 %v2516_v10  ;;  %2678 = vmatprep.mubr.bf16.mxu0 %v7312_v43  ;;  %v7374_v10 = vld [vmem:[#allocation142_spill] sm:$0xff]  ;;  %v7376_v43 = vld [vmem:[#allocation143_spill] sm:$0xff] }
 0x4ea   :  { %2837 = vmatprep.subr.bf16.mxu0 %v7120_v23  ;;  %v7322_v23 = vld [vmem:[#allocation111_spill] sm:$0xff] }
 0x4ed   :  { %2838 = vmatpush1.bf16.msra.mxu0 %v2517_v52  ;;  %v7373_v52 = vld [vmem:[#allocation22_spill] sm:$0xff] }
 0x4f0   :  { %2679 = vmatmul.mubr.bf16.gmra.mrb[128].mxu0 %v7313_v15  ;;  %v7377_v15 = vld [vmem:[#allocation25_spill] sm:$0xff] }
 0x4f1   :  { %2686 = vmatprep.mubr.bf16.mxu0 %v7314_v3  ;;  %v7378_v3 = vld [vmem:[#allocation144_spill] sm:$0xff] }
 0x4f8   :  { %2687 = vmatmul.mubr.bf16.gmra.mrb[132].mxu0 %v7315_v59  ;;  %v7379_v59 = vld [vmem:[#allocation26_spill] sm:$0xff] }
 0x4f9   :  { %2694 = vmatprep.mubr.bf16.mxu0 %v7316_v63  ;;  %v7380_v63 = vld [vmem:[#allocation145_spill] sm:$0xff] }
 0x500   :  { %2695 = vmatmul.mubr.bf16.gmra.mrb[136].mxu0 %v7317_v13  ;;  %v7381_v13 = vld [vmem:[#allocation27_spill] sm:$0xff] }
 0x501   :  { %2702 = vmatprep.mubr.bf16.mxu0 %v7318_v56  ;;  %v7382_v56 = vld [vmem:[#allocation146_spill] sm:$0xff] }
 0x508   :  { %2703 = vmatmul.mubr.bf16.gmra.mrb[140].mxu0 %v7319_v29  ;;  %v7383_v29 = vld [vmem:[#allocation28_spill] sm:$0xff] }
 0x509   :  { %2710 = vmatprep.mubr.bf16.mxu0 %v7320_v14  ;;  %v7384_v14 = vld [vmem:[#allocation147_spill] sm:$0xff] }
 0x510   :  { %2711 = vmatmul.mubr.bf16.gmra.mrb[144].mxu0 %v7321_v61  ;;  %v7385_v61 = vld [vmem:[#allocation29_spill] sm:$0xff] }
 0x511   :  { %2718 = vmatprep.mubr.bf16.mxu0 %v7322_v23 }
 0x518   :  { %2719 = vmatmul.mubr.bf16.gmra.mrb[148].mxu0 %v7323_v1 }
 0x519   :  { %2726 = vmatprep.mubr.bf16.mxu0 %v7324_v37 }
 0x520   :  { %2727 = vmatmul.mubr.bf16.gmra.mrb[152].mxu0 %v7325_v20 }
 0x521   :  { %2734 = vmatprep.mubr.bf16.mxu0 %v7326_v54 }
 0x528   :  { %2735 = vmatmul.mubr.bf16.gmra.mrb[156].mxu0 %v7327_v26 }
 0x529   :  { %2742 = vmatprep.mubr.bf16.mxu0 %v7328_v22  ;;  %v7386_v22 = vld [vmem:[#allocation148_spill] sm:$0xff] }
 0x530   :  { %2743 = vmatmul.mubr.bf16.gmra.mrb[160].mxu0 %v7329_v27  ;;  %v7387_v27 = vld [vmem:[#allocation38_spill] sm:$0xff] }
 0x531   :  { %2750 = vmatprep.mubr.bf16.mxu0 %v7330_v36 }
 0x538   :  { %2751 = vmatmul.mubr.bf16.gmra.mrb[164].mxu0 %v7331_v35 }
 0x539   :  { %2758 = vmatprep.mubr.bf16.mxu0 %v7332_v21 }
 0x540   :  { %2759 = vmatmul.mubr.bf16.gmra.mrb[168].mxu0 %v7333_v7 }
 0x541   :  { %2766 = vmatprep.mubr.bf16.mxu0 %v7334_v34 }
 0x548   :  { %2767 = vmatmul.mubr.bf16.gmra.mrb[172].mxu0 %v7335_v51 }
 0x549   :  { %2774 = vmatprep.mubr.bf16.mxu0 %v7336_v2  ;;  %v7388_v2 = vld [vmem:[#allocation149_spill] sm:$0xff] }
 0x550   :  { %2775 = vmatmul.mubr.bf16.gmra.mrb[176].mxu0 %v7337_v28  ;;  %v7389_v28 = vld [vmem:[#allocation39_spill] sm:$0xff] }
 0x551   :  { %2782 = vmatprep.mubr.bf16.mxu0 %v7338_v55 }
 0x558   :  { %2783 = vmatmul.mubr.bf16.gmra.mrb[180].mxu0 %v6137_v18  ;;  %v7343_v18 = vld [vmem:[#allocation4_spill] sm:$0xff] }
 0x559   :  { %2790 = vmatprep.mubr.bf16.mxu0 %v7339_v62 }
 0x560   :  { %2791 = vmatmul.mubr.bf16.gmra.mrb[184].mxu0 %v6155_v4  ;;  %v7344_v4 = vld [vmem:[#allocation5_spill] sm:$0xff] }
 0x561   :  { %2798 = vmatprep.mubr.bf16.mxu0 %v7340_v50 }
 0x568   :  { %2799 = vmatmul.mubr.bf16.gmra.mrb[188].mxu0 %v6173_v5  ;;  %v7345_v5 = vld [vmem:[#allocation6_spill] sm:$0xff] }
 0x569   :  { %2839 = vmatprep.mubr.bf16.mxu0 %v4173_v31  ;;  %v7347_v31 = vld [vmem:[#allocation8_spill] sm:$0xff] }
 0x570   :  { %2840 = vmatmul.mubr.bf16.vlgmr.msra.gmra.mrb[64].mxu0 %v4171_v30  ;;  %v7346_v30 = vld [vmem:[#allocation7_spill] sm:$0xff] }
 0x571   :  { %2847 = vmatprep.mubr.bf16.mxu0 %v7341_v47 }
 0x578   :  { %2848 = vmatmul.mubr.bf16.gmra.mrb[68].mxu0 %v6185_v6  ;;  %v7350_v6 = vld [vmem:[#allocation130_spill] sm:$0xff] }
 0x579   :  { %2855 = vmatprep.mubr.bf16.mxu0 %v7342_v41 }
 0x580   :  { %2856 = vmatmul.mubr.bf16.gmra.mrb[72].mxu0 %v6195_v16  ;;  %v7348_v16 = vld [vmem:[#allocation9_spill] sm:$0xff] }
 0x581   :  { %2863 = vmatprep.mubr.bf16.mxu0 %v7343_v18 }
 0x588   :  { %2864 = vmatmul.mubr.bf16.gmra.mrb[76].mxu0 %v6205_v57  ;;  %v7349_v57 = vld [vmem:[#allocation10_spill] sm:$0xff] }
 0x589   :  { %2871 = vmatprep.mubr.bf16.mxu0 %v7344_v4  ;;  %v7390_v4 = vld [vmem:[#allocation150_spill] sm:$0xff] }
 0x590   :  { %2872 = vmatmul.mubr.bf16.gmra.mrb[80].mxu0 %v6215_v11  ;;  %v7351_v11 = vld [vmem:[#allocation11_spill] sm:$0xff] }
 0x591   :  { %2879 = vmatprep.mubr.bf16.mxu0 %v7345_v5  ;;  %v7391_v5 = vld [vmem:[#allocation42_spill] sm:$0xff] }
 0x598   :  { %2880 = vmatmul.mubr.bf16.gmra.mrb[84].mxu0 %v6225_v24  ;;  %v7353_v24 = vld [vmem:[#allocation12_spill] sm:$0xff] }
 0x599   :  { %2887 = vmatprep.mubr.bf16.mxu0 %v7346_v30 }
 0x5a0   :  { %2888 = vmatmul.mubr.bf16.gmra.mrb[88].mxu0 %v6235_v45  ;;  %v7355_v45 = vld [vmem:[#allocation13_spill] sm:$0xff] }
 0x5a1   :  { %2895 = vmatprep.mubr.bf16.mxu0 %v7347_v31 }
 0x5a8   :  { %2896 = vmatmul.mubr.bf16.gmra.mrb[92].mxu0 %v6245_v60  ;;  %v7357_v60 = vld [vmem:[#allocation14_spill] sm:$0xff] }
 0x5a9   :  { %2903 = vmatprep.mubr.bf16.mxu0 %v7348_v16 }
 0x5b0   :  { %2904 = vmatmul.mubr.bf16.gmra.mrb[96].mxu0 %v6255_v8  ;;  %v7359_v8 = vld [vmem:[#allocation15_spill] sm:$0xff] }
 0x5b1   :  { %2911 = vmatprep.mubr.bf16.mxu0 %v7349_v57 }
 0x5b8   :  { %2912 = vmatmul.mubr.bf16.gmra.mrb[100].mxu0 %v7350_v6 }
 0x5b9   :  { %2919 = vmatprep.mubr.bf16.mxu0 %v7351_v11 }
 0x5c0   :  { %2920 = vmatmul.mubr.bf16.gmra.mrb[104].mxu0 %v7352_v0  ;;  %v7392_v0 = vld [vmem:[#allocation151_spill] sm:$0xff] }
 0x5c1   :  { %2927 = vmatprep.mubr.bf16.mxu0 %v7353_v24  ;;  %v7393_v24 = vld [vmem:[#allocation43_spill] sm:$0xff] }
 0x5c8   :  { %2928 = vmatmul.mubr.bf16.gmra.mrb[108].mxu0 %v7354_v49 }
 0x5c9   :  { %2935 = vmatprep.mubr.bf16.mxu0 %v7355_v45 }
 0x5d0   :  { %2936 = vmatmul.mubr.bf16.gmra.mrb[112].mxu0 %v7356_v9 }
 0x5d1   :  { %2943 = vmatprep.mubr.bf16.mxu0 %v7357_v60 }
 0x5d8   :  { %2944 = vmatmul.mubr.bf16.gmra.mrb[116].mxu0 %v7358_v46 }
 0x5d9   :  { %2951 = vmatprep.mubr.bf16.mxu0 %v7359_v8 }
 0x5e0   :  { %2952 = vmatmul.mubr.bf16.gmra.mrb[120].mxu0 %v7360_v42  ;;  %v7394_v42 = vld [vmem:[#allocation152_spill] sm:$0xff] }
 0x5e1   :  { %2959 = vmatprep.mubr.bf16.mxu0 %v7361_v33 }
 0x5e8   :  { %2960 = vmatmul.mubr.bf16.gmra.mrb[124].mxu0 %v7362_v17 }
 0x5e9   :  { %2967 = vmatprep.mubr.bf16.mxu0 %v7363_v32 }
 0x5f0   :  { %2968 = vmatmul.mubr.bf16.gmra.mrb[128].mxu0 %v7364_v39 }
 0x5f1   :  { %2975 = vmatprep.mubr.bf16.mxu0 %v7365_v25 }
 0x5f8   :  { %2976 = vmatmul.mubr.bf16.gmra.mrb[132].mxu0 %v7366_v48 }
 0x5f9   :  { %2983 = vmatprep.mubr.bf16.mxu0 %v7367_v19 }
 0x600   :  { %2984 = vmatmul.mubr.bf16.gmra.mrb[136].mxu0 %v7368_v38 }
 0x601   :  { %2991 = vmatprep.mubr.bf16.mxu0 %v7369_v44 }
 0x608   :  { %2992 = vmatmul.mubr.bf16.gmra.mrb[140].mxu0 %v7370_v53 }
 0x609   :  { %2999 = vmatprep.mubr.bf16.mxu0 %v7371_v58 }
 0x610   :  { %3000 = vmatmul.mubr.bf16.gmra.mrb[144].mxu0 %v7372_v40 }
 0x611   :  { %3007 = vmatprep.mubr.bf16.mxu0 %v7373_v52 }
 0x618   :  { %3008 = vmatmul.mubr.bf16.gmra.mrb[148].mxu0 %v7374_v10 }
 0x619   :  { %3015 = vmatprep.mubr.bf16.mxu0 %v7375_v12 }
 0x620   :  { %3016 = vmatmul.mubr.bf16.gmra.mrb[152].mxu0 %v7376_v43 }
 0x621   :  { %3023 = vmatprep.mubr.bf16.mxu0 %v7377_v15 }
 0x628   :  { %3024 = vmatmul.mubr.bf16.gmra.mrb[156].mxu0 %v7378_v3 }
 0x629   :  { %3031 = vmatprep.mubr.bf16.mxu0 %v7379_v59 }
 0x630   :  { %3032 = vmatmul.mubr.bf16.gmra.mrb[160].mxu0 %v7380_v63 }
 0x631   :  { %3039 = vmatprep.mubr.bf16.mxu0 %v7381_v13 }
 0x638   :  { %3040 = vmatmul.mubr.bf16.gmra.mrb[164].mxu0 %v7382_v56 }
 0x639   :  { %3047 = vmatprep.mubr.bf16.mxu0 %v7383_v29 }
 0x640   :  { %3048 = vmatmul.mubr.bf16.gmra.mrb[168].mxu0 %v7384_v14 }
 0x641   :  { %3055 = vmatprep.mubr.bf16.mxu0 %v7385_v61 }
 0x643   :  { %v2841_v23 = vpop.f32.mrb[64].mxu0 }
 0x644   :  { %v3096_v1 = vmax.f32 %v2841_v23, 0.0  ;;  %v2843_v37 = vpop.f32.mrb[65].mxu0 }
 0x645   :  { %v2844_v20 = vpop.f32.mrb[66].mxu0 }
 0x646   :  { %3160 = vst [vmem:[%s6932_s4] sm:$0xff] %v3096_v1  ;;  %v3097_v54 = vmax.f32 %v2844_v20, 0.0  ;;  %v2846_v26 = vpop.f32.mrb[67].mxu0 }
 0x648   :  { %3161 = vst [vmem:[%s6932_s4 + $0x8] sm:$0xff] %v3097_v54  ;;  %3056 = vmatmul.mubr.bf16.gmra.mrb[172].mxu0 %v7386_v22 }
 0x649   :  { %3063 = vmatprep.mubr.bf16.mxu0 %v7387_v27 }
 0x64b   :  { %v2849_v36 = vpop.f32.mrb[68].mxu0 }
 0x64c   :  { %v3098_v35 = vmax.f32 %v2849_v36, 0.0  ;;  %v2851_v21 = vpop.f32.mrb[69].mxu0 }
 0x64d   :  { %v2852_v7 = vpop.f32.mrb[70].mxu0 }
 0x64e   :  { %3162 = vst [vmem:[%s6932_s4 + $0x10] sm:$0xff] %v3098_v35  ;;  %v3099_v34 = vmax.f32 %v2852_v7, 0.0  ;;  %v2854_v51 = vpop.f32.mrb[71].mxu0 }
 0x650   :  { %3163 = vst [vmem:[%s6932_s4 + $0x18] sm:$0xff] %v3099_v34  ;;  %3064 = vmatmul.mubr.bf16.gmra.mrb[176].mxu0 %v7388_v2 }
 0x651   :  { %3071 = vmatprep.mubr.bf16.mxu0 %v7389_v28 }
 0x653   :  { %v2857_v55 = vpop.f32.mrb[72].mxu0 }
 0x654   :  { %v3100_v62 = vmax.f32 %v2857_v55, 0.0  ;;  %v2859_v50 = vpop.f32.mrb[73].mxu0 }
 0x655   :  { %v2860_v47 = vpop.f32.mrb[74].mxu0 }
 0x656   :  { %3164 = vst [vmem:[%s6932_s4 + $0x20] sm:$0xff] %v3100_v62  ;;  %v3101_v41 = vmax.f32 %v2860_v47, 0.0  ;;  %v2862_v18 = vpop.f32.mrb[75].mxu0 }
 0x658   :  { %3165 = vst [vmem:[%s6932_s4 + $0x28] sm:$0xff] %v3101_v41  ;;  %3072 = vmatmul.mubr.bf16.gmra.mrb[180].mxu0 %v7390_v4 }
 0x659   :  { %3079 = vmatprep.mubr.bf16.mxu0 %v7391_v5 }
 0x65b   :  { %v2865_v30 = vpop.f32.mrb[76].mxu0 }
 0x65c   :  { %v3102_v31 = vmax.f32 %v2865_v30, 0.0  ;;  %v2867_v16 = vpop.f32.mrb[77].mxu0 }
 0x65d   :  { %v2868_v57 = vpop.f32.mrb[78].mxu0 }
 0x65e   :  { %3166 = vst [vmem:[%s6932_s4 + $0x30] sm:$0xff] %v3102_v31  ;;  %v3103_v6 = vmax.f32 %v2868_v57, 0.0  ;;  %v2870_v11 = vpop.f32.mrb[79].mxu0 }
 0x660   :  { %3167 = vst [vmem:[%s6932_s4 + $0x38] sm:$0xff] %v3103_v6  ;;  %3080 = vmatmul.mubr.bf16.gmra.mrb[184].mxu0 %v7392_v0 }
 0x661   :  { %3087 = vmatprep.mubr.bf16.mxu0 %v7393_v24 }
 0x663   :  { %v2873_v49 = vpop.f32.mrb[80].mxu0 }
 0x664   :  { %v3104_v45 = vmax.f32 %v2873_v49, 0.0  ;;  %v2875_v9 = vpop.f32.mrb[81].mxu0 }
 0x665   :  { %v2876_v60 = vpop.f32.mrb[82].mxu0 }
 0x666   :  { %3168 = vst [vmem:[%s6932_s4 + $0x40] sm:$0xff] %v3104_v45  ;;  %v3105_v46 = vmax.f32 %v2876_v60, 0.0  ;;  %v2878_v8 = vpop.f32.mrb[83].mxu0 }
 0x668   :  { %3169 = vst [vmem:[%s6932_s4 + $0x48] sm:$0xff] %v3105_v46  ;;  %3088 = vmatmul.mubr.bf16.gmra.mrb[188].mxu0 %v7394_v42 }
 0x66b   :  { %v2881_v33 = vpop.f32.mrb[84].mxu0 }
 0x66c   :  { %v3106_v17 = vmax.f32 %v2881_v33, 0.0  ;;  %v2883_v32 = vpop.f32.mrb[85].mxu0 }
 0x66d   :  { %v2884_v39 = vpop.f32.mrb[86].mxu0 }
 0x66e   :  { %3170 = vst [vmem:[%s6932_s4 + $0x50] sm:$0xff] %v3106_v17  ;;  %v3107_v25 = vmax.f32 %v2884_v39, 0.0  ;;  %v2886_v48 = vpop.f32.mrb[87].mxu0 }
 0x670   :  { %3171 = vst [vmem:[%s6932_s4 + $0x58] sm:$0xff] %v3107_v25 }
 0x673   :  { %v2889_v19 = vpop.f32.mrb[88].mxu0 }
 0x674   :  { %v3108_v38 = vmax.f32 %v2889_v19, 0.0  ;;  %v2891_v44 = vpop.f32.mrb[89].mxu0 }
 0x675   :  { %v2892_v53 = vpop.f32.mrb[90].mxu0 }
 0x676   :  { %3172 = vst [vmem:[%s6932_s4 + $0x60] sm:$0xff] %v3108_v38  ;;  %v3109_v58 = vmax.f32 %v2892_v53, 0.0  ;;  %v2894_v40 = vpop.f32.mrb[91].mxu0 }
 0x678   :  { %3173 = vst [vmem:[%s6932_s4 + $0x68] sm:$0xff] %v3109_v58 }
 0x67b   :  { %v2897_v52 = vpop.f32.mrb[92].mxu0 }
 0x67c   :  { %v3110_v10 = vmax.f32 %v2897_v52, 0.0  ;;  %v2899_v12 = vpop.f32.mrb[93].mxu0 }
 0x67d   :  { %v2900_v43 = vpop.f32.mrb[94].mxu0 }
 0x67e   :  { %3174 = vst [vmem:[%s6932_s4 + $0x70] sm:$0xff] %v3110_v10  ;;  %v3111_v15 = vmax.f32 %v2900_v43, 0.0  ;;  %v2902_v3 = vpop.f32.mrb[95].mxu0 }
 0x680   :  { %3175 = vst [vmem:[%s6932_s4 + $0x78] sm:$0xff] %v3111_v15 }
 0x683   :  { %v2905_v59 = vpop.f32.mrb[96].mxu0 }
 0x684   :  { %v3112_v63 = vmax.f32 %v2905_v59, 0.0  ;;  %v2907_v13 = vpop.f32.mrb[97].mxu0 }
 0x685   :  { %v2908_v56 = vpop.f32.mrb[98].mxu0 }
 0x686   :  { %3176 = vst [vmem:[%s6932_s4 + $0x80] sm:$0xff] %v3112_v63  ;;  %v3113_v29 = vmax.f32 %v2908_v56, 0.0  ;;  %v2910_v14 = vpop.f32.mrb[99].mxu0 }
 0x688   :  { %3177 = vst [vmem:[%s6932_s4 + $0x88] sm:$0xff] %v3113_v29 }
 0x68b   :  { %v2913_v61 = vpop.f32.mrb[100].mxu0 }
 0x68c   :  { %v3114_v23 = vmax.f32 %v2913_v61, 0.0  ;;  %v2915_v1 = vpop.f32.mrb[101].mxu0 }
 0x68d   :  { %v2916_v37 = vpop.f32.mrb[102].mxu0 }
 0x68e   :  { %3178 = vst [vmem:[%s6932_s4 + $0x90] sm:$0xff] %v3114_v23  ;;  %v3115_v20 = vmax.f32 %v2916_v37, 0.0  ;;  %v2918_v54 = vpop.f32.mrb[103].mxu0 }
 0x690   :  { %3179 = vst [vmem:[%s6932_s4 + $0x98] sm:$0xff] %v3115_v20 }
 0x693   :  { %v2921_v26 = vpop.f32.mrb[104].mxu0 }
 0x694   :  { %v3116_v22 = vmax.f32 %v2921_v26, 0.0  ;;  %v2923_v27 = vpop.f32.mrb[105].mxu0 }
 0x695   :  { %v2924_v36 = vpop.f32.mrb[106].mxu0 }
 0x696   :  { %3180 = vst [vmem:[%s6932_s4 + $0xa0] sm:$0xff] %v3116_v22  ;;  %v3117_v35 = vmax.f32 %v2924_v36, 0.0  ;;  %v2926_v21 = vpop.f32.mrb[107].mxu0 }
 0x698   :  { %3181 = vst [vmem:[%s6932_s4 + $0xa8] sm:$0xff] %v3117_v35 }
 0x69b   :  { %v2929_v7 = vpop.f32.mrb[108].mxu0 }
 0x69c   :  { %v3118_v34 = vmax.f32 %v2929_v7, 0.0  ;;  %v2931_v51 = vpop.f32.mrb[109].mxu0 }
 0x69d   :  { %v2932_v2 = vpop.f32.mrb[110].mxu0 }
 0x69e   :  { %3182 = vst [vmem:[%s6932_s4 + $0xb0] sm:$0xff] %v3118_v34  ;;  %v3119_v28 = vmax.f32 %v2932_v2, 0.0  ;;  %v2934_v55 = vpop.f32.mrb[111].mxu0 }
 0x6a0   :  { %3183 = vst [vmem:[%s6932_s4 + $0xb8] sm:$0xff] %v3119_v28 }
 0x6a3   :  { %v2937_v62 = vpop.f32.mrb[112].mxu0 }
 0x6a4   :  { %v3120_v50 = vmax.f32 %v2937_v62, 0.0  ;;  %v2939_v47 = vpop.f32.mrb[113].mxu0 }
 0x6a5   :  { %v2940_v41 = vpop.f32.mrb[114].mxu0 }
 0x6a6   :  { %3184 = vst [vmem:[%s6932_s4 + $0xc0] sm:$0xff] %v3120_v50  ;;  %v3121_v18 = vmax.f32 %v2940_v41, 0.0  ;;  %v2942_v4 = vpop.f32.mrb[115].mxu0 }
 0x6a8   :  { %3185 = vst [vmem:[%s6932_s4 + $0xc8] sm:$0xff] %v3121_v18 }
 0x6ab   :  { %v2945_v5 = vpop.f32.mrb[116].mxu0 }
 0x6ac   :  { %v3122_v30 = vmax.f32 %v2945_v5, 0.0  ;;  %v2947_v31 = vpop.f32.mrb[117].mxu0 }
 0x6ad   :  { %v2948_v16 = vpop.f32.mrb[118].mxu0 }
 0x6ae   :  { %3186 = vst [vmem:[%s6932_s4 + $0xd0] sm:$0xff] %v3122_v30  ;;  %v3123_v57 = vmax.f32 %v2948_v16, 0.0  ;;  %v2950_v6 = vpop.f32.mrb[119].mxu0 }
 0x6b0   :  { %3187 = vst [vmem:[%s6932_s4 + $0xd8] sm:$0xff] %v3123_v57 }
 0x6b3   :  { %v2953_v11 = vpop.f32.mrb[120].mxu0 }
 0x6b4   :  { %v3124_v0 = vmax.f32 %v2953_v11, 0.0  ;;  %v2955_v24 = vpop.f32.mrb[121].mxu0 }
 0x6b5   :  { %v2956_v49 = vpop.f32.mrb[122].mxu0 }
 0x6b6   :  { %3188 = vst [vmem:[%s6932_s4 + $0xe0] sm:$0xff] %v3124_v0  ;;  %v3125_v45 = vmax.f32 %v2956_v49, 0.0  ;;  %v2958_v9 = vpop.f32.mrb[123].mxu0 }
 0x6b8   :  { %3189 = vst [vmem:[%s6932_s4 + $0xe8] sm:$0xff] %v3125_v45 }
 0x6bb   :  { %v2961_v60 = vpop.f32.mrb[124].mxu0 }
 0x6bc   :  { %v3126_v46 = vmax.f32 %v2961_v60, 0.0  ;;  %v2963_v8 = vpop.f32.mrb[125].mxu0 }
 0x6bd   :  { %v2964_v42 = vpop.f32.mrb[126].mxu0 }
 0x6be   :  { %3190 = vst [vmem:[%s6932_s4 + $0xf0] sm:$0xff] %v3126_v46  ;;  %v3127_v33 = vmax.f32 %v2964_v42, 0.0  ;;  %v2966_v17 = vpop.f32.mrb[127].mxu0 }
 0x6c0   :  { %3191 = vst [vmem:[%s6932_s4 + $0xf8] sm:$0xff] %v3127_v33 }
 0x6c3   :  { %v2969_v32 = vpop.f32.mrb[128].mxu0 }
 0x6c4   :  { %v3128_v39 = vmax.f32 %v2969_v32, 0.0  ;;  %v2971_v25 = vpop.f32.mrb[129].mxu0 }
 0x6c5   :  { %v2972_v48 = vpop.f32.mrb[130].mxu0 }
 0x6c6   :  { %3192 = vst [vmem:[%s6932_s4 + $0x100] sm:$0xff] %v3128_v39  ;;  %v3129_v19 = vmax.f32 %v2972_v48, 0.0  ;;  %v2974_v38 = vpop.f32.mrb[131].mxu0 }
 0x6c8   :  { %3193 = vst [vmem:[%s6932_s4 + $0x108] sm:$0xff] %v3129_v19 }
 0x6cb   :  { %v2977_v44 = vpop.f32.mrb[132].mxu0 }
 0x6cc   :  { %v3130_v53 = vmax.f32 %v2977_v44, 0.0  ;;  %v2979_v58 = vpop.f32.mrb[133].mxu0 }
 0x6cd   :  { %v2980_v40 = vpop.f32.mrb[134].mxu0 }
 0x6ce   :  { %3194 = vst [vmem:[%s6932_s4 + $0x110] sm:$0xff] %v3130_v53  ;;  %v3131_v52 = vmax.f32 %v2980_v40, 0.0  ;;  %v2982_v10 = vpop.f32.mrb[135].mxu0 }
 0x6d0   :  { %3195 = vst [vmem:[%s6932_s4 + $0x118] sm:$0xff] %v3131_v52 }
 0x6d3   :  { %v2985_v12 = vpop.f32.mrb[136].mxu0 }
 0x6d4   :  { %v3132_v43 = vmax.f32 %v2985_v12, 0.0  ;;  %v2987_v15 = vpop.f32.mrb[137].mxu0 }
 0x6d5   :  { %v2988_v3 = vpop.f32.mrb[138].mxu0 }
 0x6d6   :  { %3196 = vst [vmem:[%s6932_s4 + $0x120] sm:$0xff] %v3132_v43  ;;  %v3133_v59 = vmax.f32 %v2988_v3, 0.0  ;;  %v2990_v63 = vpop.f32.mrb[139].mxu0 }
 0x6d8   :  { %3197 = vst [vmem:[%s6932_s4 + $0x128] sm:$0xff] %v3133_v59 }
 0x6db   :  { %v2993_v13 = vpop.f32.mrb[140].mxu0 }
 0x6dc   :  { %v3134_v56 = vmax.f32 %v2993_v13, 0.0  ;;  %v2995_v29 = vpop.f32.mrb[141].mxu0 }
 0x6dd   :  { %v2996_v14 = vpop.f32.mrb[142].mxu0 }
 0x6de   :  { %3198 = vst [vmem:[%s6932_s4 + $0x130] sm:$0xff] %v3134_v56  ;;  %v3135_v61 = vmax.f32 %v2996_v14, 0.0  ;;  %v2998_v23 = vpop.f32.mrb[143].mxu0 }
 0x6e0   :  { %3199 = vst [vmem:[%s6932_s4 + $0x138] sm:$0xff] %v3135_v61 }
 0x6e3   :  { %v3001_v1 = vpop.f32.mrb[144].mxu0 }
 0x6e4   :  { %v3136_v37 = vmax.f32 %v3001_v1, 0.0  ;;  %v3003_v20 = vpop.f32.mrb[145].mxu0 }
 0x6e5   :  { %v3004_v54 = vpop.f32.mrb[146].mxu0 }
 0x6e6   :  { %3200 = vst [vmem:[%s6932_s4 + $0x140] sm:$0xff] %v3136_v37  ;;  %v3137_v26 = vmax.f32 %v3004_v54, 0.0  ;;  %v3006_v22 = vpop.f32.mrb[147].mxu0 }
 0x6e8   :  { %3201 = vst [vmem:[%s6932_s4 + $0x148] sm:$0xff] %v3137_v26 }
 0x6eb   :  { %v3009_v27 = vpop.f32.mrb[148].mxu0 }
 0x6ec   :  { %v3138_v36 = vmax.f32 %v3009_v27, 0.0  ;;  %v3011_v35 = vpop.f32.mrb[149].mxu0 }
 0x6ed   :  { %v3012_v21 = vpop.f32.mrb[150].mxu0 }
 0x6ee   :  { %3202 = vst [vmem:[%s6932_s4 + $0x150] sm:$0xff] %v3138_v36  ;;  %v3139_v7 = vmax.f32 %v3012_v21, 0.0  ;;  %v3014_v34 = vpop.f32.mrb[151].mxu0 }
 0x6f0   :  { %3203 = vst [vmem:[%s6932_s4 + $0x158] sm:$0xff] %v3139_v7 }
 0x6f3   :  { %v3017_v51 = vpop.f32.mrb[152].mxu0 }
 0x6f4   :  { %v3140_v2 = vmax.f32 %v3017_v51, 0.0  ;;  %v3019_v28 = vpop.f32.mrb[153].mxu0 }
 0x6f5   :  { %v3020_v55 = vpop.f32.mrb[154].mxu0 }
 0x6f6   :  { %3204 = vst [vmem:[%s6932_s4 + $0x160] sm:$0xff] %v3140_v2  ;;  %v3141_v62 = vmax.f32 %v3020_v55, 0.0  ;;  %v3022_v50 = vpop.f32.mrb[155].mxu0 }
 0x6f8   :  { %3205 = vst [vmem:[%s6932_s4 + $0x168] sm:$0xff] %v3141_v62 }
 0x6fb   :  { %v3025_v47 = vpop.f32.mrb[156].mxu0 }
 0x6fc   :  { %v3142_v41 = vmax.f32 %v3025_v47, 0.0  ;;  %v3027_v18 = vpop.f32.mrb[157].mxu0 }
 0x6fd   :  { %v3028_v4 = vpop.f32.mrb[158].mxu0 }
 0x6fe   :  { %3206 = vst [vmem:[%s6932_s4 + $0x170] sm:$0xff] %v3142_v41  ;;  %v3143_v5 = vmax.f32 %v3028_v4, 0.0  ;;  %v3030_v30 = vpop.f32.mrb[159].mxu0 }
 0x700   :  { %3207 = vst [vmem:[%s6932_s4 + $0x178] sm:$0xff] %v3143_v5 }
 0x703   :  { %v3033_v31 = vpop.f32.mrb[160].mxu0 }
 0x704   :  { %v3144_v16 = vmax.f32 %v3033_v31, 0.0  ;;  %v3035_v57 = vpop.f32.mrb[161].mxu0 }
 0x705   :  { %v3036_v6 = vpop.f32.mrb[162].mxu0 }
 0x706   :  { %3208 = vst [vmem:[%s6932_s4 + $0x180] sm:$0xff] %v3144_v16  ;;  %v3145_v11 = vmax.f32 %v3036_v6, 0.0  ;;  %v3038_v0 = vpop.f32.mrb[163].mxu0 }
 0x708   :  { %3209 = vst [vmem:[%s6932_s4 + $0x188] sm:$0xff] %v3145_v11 }
 0x70b   :  { %v3041_v24 = vpop.f32.mrb[164].mxu0 }
 0x70c   :  { %v3146_v49 = vmax.f32 %v3041_v24, 0.0  ;;  %v3043_v45 = vpop.f32.mrb[165].mxu0 }
 0x70d   :  { %v3044_v9 = vpop.f32.mrb[166].mxu0 }
 0x70e   :  { %3210 = vst [vmem:[%s6932_s4 + $0x190] sm:$0xff] %v3146_v49  ;;  %v3147_v60 = vmax.f32 %v3044_v9, 0.0  ;;  %v3046_v46 = vpop.f32.mrb[167].mxu0 }
 0x710   :  { %3211 = vst [vmem:[%s6932_s4 + $0x198] sm:$0xff] %v3147_v60 }
 0x713   :  { %v3049_v8 = vpop.f32.mrb[168].mxu0 }
 0x714   :  { %v3148_v42 = vmax.f32 %v3049_v8, 0.0  ;;  %v3051_v33 = vpop.f32.mrb[169].mxu0 }
 0x715   :  { %v3052_v17 = vpop.f32.mrb[170].mxu0 }
 0x716   :  { %3212 = vst [vmem:[%s6932_s4 + $0x1a0] sm:$0xff] %v3148_v42  ;;  %v3149_v32 = vmax.f32 %v3052_v17, 0.0  ;;  %v3054_v39 = vpop.f32.mrb[171].mxu0 }
 0x718   :  { %3213 = vst [vmem:[%s6932_s4 + $0x1a8] sm:$0xff] %v3149_v32 }
 0x71b   :  { %v3057_v25 = vpop.f32.mrb[172].mxu0 }
 0x71c   :  { %v3150_v48 = vmax.f32 %v3057_v25, 0.0  ;;  %v3059_v19 = vpop.f32.mrb[173].mxu0 }
 0x71d   :  { %v3060_v38 = vpop.f32.mrb[174].mxu0 }
 0x71e   :  { %3214 = vst [vmem:[%s6932_s4 + $0x1b0] sm:$0xff] %v3150_v48  ;;  %v3151_v44 = vmax.f32 %v3060_v38, 0.0  ;;  %v3062_v53 = vpop.f32.mrb[175].mxu0 }
 0x720   :  { %3215 = vst [vmem:[%s6932_s4 + $0x1b8] sm:$0xff] %v3151_v44 }
 0x723   :  { %v3065_v58 = vpop.f32.mrb[176].mxu0 }
 0x724   :  { %v3152_v40 = vmax.f32 %v3065_v58, 0.0  ;;  %v3067_v52 = vpop.f32.mrb[177].mxu0 }
 0x725   :  { %v3068_v10 = vpop.f32.mrb[178].mxu0 }
 0x726   :  { %3216 = vst [vmem:[%s6932_s4 + $0x1c0] sm:$0xff] %v3152_v40  ;;  %v3153_v12 = vmax.f32 %v3068_v10, 0.0  ;;  %v3070_v43 = vpop.f32.mrb[179].mxu0 }
 0x728   :  { %3217 = vst [vmem:[%s6932_s4 + $0x1c8] sm:$0xff] %v3153_v12 }
 0x72b   :  { %v3073_v15 = vpop.f32.mrb[180].mxu0 }
 0x72c   :  { %v3154_v3 = vmax.f32 %v3073_v15, 0.0  ;;  %v3075_v59 = vpop.f32.mrb[181].mxu0 }
 0x72d   :  { %v3076_v63 = vpop.f32.mrb[182].mxu0 }
 0x72e   :  { %3218 = vst [vmem:[%s6932_s4 + $0x1d0] sm:$0xff] %v3154_v3  ;;  %v3155_v13 = vmax.f32 %v3076_v63, 0.0  ;;  %v3078_v56 = vpop.f32.mrb[183].mxu0 }
 0x730   :  { %3219 = vst [vmem:[%s6932_s4 + $0x1d8] sm:$0xff] %v3155_v13 }
 0x733   :  { %v3081_v29 = vpop.f32.mrb[184].mxu0 }
 0x734   :  { %v3156_v14 = vmax.f32 %v3081_v29, 0.0  ;;  %v3083_v61 = vpop.f32.mrb[185].mxu0 }
 0x735   :  { %v3084_v23 = vpop.f32.mrb[186].mxu0 }
 0x736   :  { %3220 = vst [vmem:[%s6932_s4 + $0x1e0] sm:$0xff] %v3156_v14  ;;  %v3157_v1 = vmax.f32 %v3084_v23, 0.0  ;;  %v3086_v37 = vpop.f32.mrb[187].mxu0 }
 0x738   :  { %3221 = vst [vmem:[%s6932_s4 + $0x1e8] sm:$0xff] %v3157_v1 }
 0x73b   :  { %v3089_v20 = vpop.f32.mrb[188].mxu0 }
 0x73c   :  { %v3158_v54 = vmax.f32 %v3089_v20, 0.0  ;;  %v3091_v26 = vpop.f32.mrb[189].mxu0 }
 0x73d   :  { %v3092_v22 = vpop.f32.mrb[190].mxu0 }
 0x73e   :  { %3222 = vst [vmem:[%s6932_s4 + $0x1f0] sm:$0xff] %v3158_v54  ;;  %v3159_v27 = vmax.f32 %v3092_v22, 0.0  ;;  %v3094_v36 = vpop.f32.mrb[191].mxu0 }
 0x740   :  { %3223 = vst [vmem:[%s6932_s4 + $0x1f8] sm:$0xff] %v3159_v27 }

</bundles_post_ra>
